<compile_context>
chip_gen: v7x
topology: tpu7x:2x2x1
jax: 0.10.0
libtpu: 0.0.40
codegen_flags: <defaults>
</compile_context>

<pallas_src>
import math

import jax
import jax.numpy as jnp
from jax.experimental import pallas as pl
from jax.experimental.pallas import tpu as pltpu

EMBED_DIM = 128          # TransformerMIL(embed_dim=128) for a small test
NUM_HEADS = 8            # module default
NUM_LAYERS = 2           # module default
DIM_FF = 2048            # nn.TransformerEncoderLayer default dim_feedforward
HEAD_DIM = EMBED_DIM // NUM_HEADS
LN_EPS = 1e-5            # nn.TransformerEncoderLayer default layer_norm_eps


def _layernorm(x, w, b):
    # LayerNorm over the last (feature) axis, biased variance -- matches PyTorch.
    mu = jnp.mean(x, axis=-1, keepdims=True)
    xc = x - mu
    var = jnp.mean(xc * xc, axis=-1, keepdims=True)
    return xc * jax.lax.rsqrt(var + LN_EPS) * w + b


def _softmax_last(s):
    m = jnp.max(s, axis=-1, keepdims=True)
    e = jnp.exp(s - m)
    return e / jnp.sum(e, axis=-1, keepdims=True)


def transformer_mil_kernel(
    x_ref, emb_w_ref, emb_b_ref,
    w_in_ref, b_in_ref, w_out_ref, b_out_ref,
    ln1_w_ref, ln1_b_ref,
    ff1_w_ref, ff1_b_ref, ff2_w_ref, ff2_b_ref,
    ln2_w_ref, ln2_b_ref,
    head_w_ref, head_b_ref,
    out_ref,
    x_scratch,
):
    layer = pl.program_id(0)
    n = x_scratch.shape[0]
    scale = 1.0 / math.sqrt(HEAD_DIM)
    bf = jnp.bfloat16

    # ---- step 0: embedding + per-feature patch normalization (torch.std unbiased) ----
    @pl.when(layer == 0)
    def _():
        h = jnp.dot(x_ref[...].astype(bf), emb_w_ref[...],
                    preferred_element_type=jnp.float32) + emb_b_ref[...]
        mu = jnp.mean(h, axis=0, keepdims=True)
        hc = h - mu
        # NOTE: unbiased std matches PyTorch; NaN for a 1-patch bag, same as the module.
        var = jnp.sum(hc * hc, axis=0, keepdims=True) / (n - 1)
        x_scratch[...] = hc / (jnp.sqrt(var) + 1e-6)

    x = x_scratch[...]                               # residual stream (f32)
    xb = x.astype(bf)

    # ---- multi-head self-attention: fused QKV, per-head softmax, fused out-proj ----
    qkv = jnp.dot(xb, w_in_ref[...],
                  preferred_element_type=jnp.float32) + b_in_ref[...]   # (N, 3E) f32
    head_outs = []
    for h in range(NUM_HEADS):
        qs = h * HEAD_DIM
        q = qkv[:, qs:qs + HEAD_DIM].astype(bf)
        k = qkv[:, EMBED_DIM + qs:EMBED_DIM + qs + HEAD_DIM].astype(bf)
        v = qkv[:, 2 * EMBED_DIM + qs:2 * EMBED_DIM + qs + HEAD_DIM].astype(bf)
        s = jax.lax.dot_general(q, k, (((1,), (1,)), ((), ())),
                                preferred_element_type=jnp.float32) * scale
        p = _softmax_last(s)                                           # f32 stats
        head_outs.append(jnp.dot(p.astype(bf), v,
                                 preferred_element_type=jnp.float32))
    o = jnp.concatenate(head_outs, axis=-1).astype(bf)                  # (N, E)
    sa = jnp.dot(o, w_out_ref[...],
                 preferred_element_type=jnp.float32) + b_out_ref[...]

    x = _layernorm(x + sa, ln1_w_ref[...], ln1_b_ref[...])

    # ---- feed-forward (ReLU), post-norm ----
    h1 = jnp.dot(x.astype(bf), ff1_w_ref[...],
                 preferred_element_type=jnp.float32) + ff1_b_ref[...]
    h1 = jnp.maximum(h1, 0.0)
    ff = jnp.dot(h1.astype(bf), ff2_w_ref[...],
                 preferred_element_type=jnp.float32) + ff2_b_ref[...]
    x = _layernorm(x + ff, ln2_w_ref[...], ln2_b_ref[...])

    x_scratch[...] = x

    # ---- last step: MIL attention-pooling head ----
    @pl.when(layer == pl.num_programs(0) - 1)
    def _():
        scores = jnp.dot(x, head_w_ref[...],
                         preferred_element_type=jnp.float32) + head_b_ref[...]   # (N, 1)
        m = jnp.max(scores, axis=0, keepdims=True)
        e = jnp.exp(scores - m)
        attn = e / jnp.sum(e, axis=0, keepdims=True)          # softmax over patches
        weighted = jnp.sum(attn * x, axis=0, keepdims=True)   # (1, E)
        out_ref[...] = jnp.sum(weighted, axis=1, keepdims=True)  # (1, 1)


def transformer_mil_forward(x, params):
    """x: (1, N_patches, input_dim) float32 -> (1, 1) float32."""
    (emb_w, emb_b, w_in, b_in, w_out, b_out, ln1_w, ln1_b,
     ff1_w, ff1_b, ff2_w, ff2_b, ln2_w, ln2_b, head_w, head_b) = params
    x2d = x[0]                                   # squeeze batch of 1
    n, input_dim = x2d.shape
    bf = jnp.bfloat16

    inputs = [
        x2d.astype(jnp.float32),
        emb_w.astype(bf), emb_b,
        w_in.astype(bf), b_in, w_out.astype(bf), b_out,
        ln1_w, ln1_b,
        ff1_w.astype(bf), ff1_b, ff2_w.astype(bf), ff2_b,
        ln2_w, ln2_b,
        head_w, head_b,
    ]

    def whole(shape):
        # Fetched once (constant block index across the layer grid).
        return pl.BlockSpec(shape, lambda l, _s=shape: (0,) * len(_s))

    def per_layer(shape):
        # Leading layer axis squeezed; block index advances with the grid -> the Pallas
        # pipeline double-buffers layer l+1's weights behind layer l's compute.
        return pl.BlockSpec((None,) + shape, lambda l, _s=shape: (l,) + (0,) * len(_s))

    in_specs = [
        whole((n, input_dim)),
        whole((input_dim, EMBED_DIM)), whole((1, EMBED_DIM)),
        per_layer((EMBED_DIM, 3 * EMBED_DIM)), per_layer((1, 3 * EMBED_DIM)),
        per_layer((EMBED_DIM, EMBED_DIM)), per_layer((1, EMBED_DIM)),
        per_layer((1, EMBED_DIM)), per_layer((1, EMBED_DIM)),
        per_layer((EMBED_DIM, DIM_FF)), per_layer((1, DIM_FF)),
        per_layer((DIM_FF, EMBED_DIM)), per_layer((1, EMBED_DIM)),
        per_layer((1, EMBED_DIM)), per_layer((1, EMBED_DIM)),
        whole((EMBED_DIM, 1)), whole((1, 1)),
    ]

    return pl.pallas_call(
        transformer_mil_kernel,
        out_shape=jax.ShapeDtypeStruct((1, 1), jnp.float32),
        grid_spec=pltpu.PrefetchScalarGridSpec(
            num_scalar_prefetch=0,
            grid=(NUM_LAYERS,),
            in_specs=in_specs,
            out_specs=pl.BlockSpec((1, 1), lambda l: (0, 0)),
            scratch_shapes=[pltpu.VMEM((n, EMBED_DIM), jnp.float32)],
        ),
        compiler_params=pltpu.CompilerParams(
            dimension_semantics=("arbitrary",),
            vmem_limit_bytes=32 * 1024 * 1024,
        ),
    )(*inputs)


def init_params(key, input_dim):
    keys = iter(jax.random.split(key, 16))

    def w(shape, scale=0.02):
        return scale * jax.random.normal(next(keys), shape, dtype=jnp.float32)

    def stacked(shape):
        return w((NUM_LAYERS,) + shape)

    emb_w = w((input_dim, EMBED_DIM))              # stored (in, out)
    emb_b = w((1, EMBED_DIM))
    w_in = stacked((EMBED_DIM, 3 * EMBED_DIM))     # in_proj, stored (E, 3E)
    b_in = stacked((1, 3 * EMBED_DIM))
    w_out = stacked((EMBED_DIM, EMBED_DIM))        # out_proj, stored (E, E)
    b_out = stacked((1, EMBED_DIM))
    ln1_w = jnp.ones((NUM_LAYERS, 1, EMBED_DIM), jnp.float32)
    ln1_b = jnp.zeros((NUM_LAYERS, 1, EMBED_DIM), jnp.float32)
    ff1_w = stacked((EMBED_DIM, DIM_FF))
    ff1_b = stacked((1, DIM_FF))
    ff2_w = stacked((DIM_FF, EMBED_DIM))
    ff2_b = stacked((1, EMBED_DIM))
    ln2_w = jnp.ones((NUM_LAYERS, 1, EMBED_DIM), jnp.float32)
    ln2_b = jnp.zeros((NUM_LAYERS, 1, EMBED_DIM), jnp.float32)
    head_w = w((EMBED_DIM, 1))
    head_b = w((1, 1))
    return (emb_w, emb_b, w_in, b_in, w_out, b_out, ln1_w, ln1_b,
            ff1_w, ff1_b, ff2_w, ff2_b, ln2_w, ln2_b, head_w, head_b)


def reference_forward(x, params):
    """Pure-JAX reference with independent (reshape/transpose) MHA formulation.

    Mirrors the kernel's precision policy (bf16 matmul operands, f32 accumulation,
    f32 LayerNorm/softmax stats) so the comparison stays tight."""
    bf = jnp.bfloat16
    (emb_w, emb_b, w_in, b_in, w_out, b_out, ln1_w, ln1_b,
     ff1_w, ff1_b, ff2_w, ff2_b, ln2_w, ln2_b, head_w, head_b) = params

    def bdot(a, b):
        return jnp.dot(a.astype(bf), b.astype(bf), preferred_element_type=jnp.float32)

    h = bdot(x[0], emb_w) + emb_b
    n = h.shape[0]
    mu = h.mean(axis=0, keepdims=True)
    std = jnp.sqrt(((h - mu) ** 2).sum(axis=0, keepdims=True) / (n - 1))
    h = (h - mu) / (std + 1e-6)

    for l in range(NUM_LAYERS):
        qkv = bdot(h, w_in[l]) + b_in[l]
        q, k, v = jnp.split(qkv, 3, axis=-1)
        q = q.reshape(n, NUM_HEADS, HEAD_DIM).transpose(1, 0, 2)
        k = k.reshape(n, NUM_HEADS, HEAD_DIM).transpose(1, 0, 2)
        v = v.reshape(n, NUM_HEADS, HEAD_DIM).transpose(1, 0, 2)
        s = jnp.einsum("hqd,hkd->hqk", q.astype(bf), k.astype(bf),
                       preferred_element_type=jnp.float32) / math.sqrt(HEAD_DIM)
        p = jax.nn.softmax(s, axis=-1)
        o = jnp.einsum("hqk,hkd->hqd", p.astype(bf), v.astype(bf),
                       preferred_element_type=jnp.float32)
        o = o.transpose(1, 0, 2).reshape(n, EMBED_DIM)
        h = _layernorm(h + (bdot(o, w_out[l]) + b_out[l]), ln1_w[l], ln1_b[l])
        ff = bdot(jnp.maximum(bdot(h, ff1_w[l]) + ff1_b[l], 0.0), ff2_w[l]) + ff2_b[l]
        h = _layernorm(h + ff, ln2_w[l], ln2_b[l])

    scores = h @ head_w + head_b
    attn = jax.nn.softmax(scores, axis=0)
    weighted = (attn * h).sum(axis=0, keepdims=True)
    return weighted.sum(axis=1, keepdims=True)


if __name__ == "__main__":
    INPUT_DIM = 32
    N_PATCHES = 8

    key = jax.random.PRNGKey(0)
    kp, kx = jax.random.split(key)
    params = init_params(kp, INPUT_DIM)
    x = jax.random.normal(kx, (1, N_PATCHES, INPUT_DIM), dtype=jnp.float32)

    out = jax.block_until_ready(transformer_mil_forward(x, params))
    ref = reference_forward(x, params)

    assert out.shape == (1, 1), out.shape
    assert jnp.allclose(out, ref, atol=1e-2, rtol=1e-2), (out, ref)

    print("KERNEL_OK")
</pallas_src>

<mosaic_0001>
module attributes {stable_mosaic.version = 11 : i64} {
  func.func @transformer_mil_kernel(%arg0: i32, %arg1: memref<8x32xf32, #tpu.memory_space<vmem>>, %arg2: memref<32x128xbf16, #tpu.memory_space<vmem>>, %arg3: memref<1x128xf32, #tpu.memory_space<vmem>>, %arg4: memref<1x128x384xbf16, #tpu.memory_space<vmem>>, %arg5: memref<1x1x384xf32, #tpu.memory_space<vmem>>, %arg6: memref<1x128x128xbf16, #tpu.memory_space<vmem>>, %arg7: memref<1x1x128xf32, #tpu.memory_space<vmem>>, %arg8: memref<1x1x128xf32, #tpu.memory_space<vmem>>, %arg9: memref<1x1x128xf32, #tpu.memory_space<vmem>>, %arg10: memref<1x128x2048xbf16, #tpu.memory_space<vmem>>, %arg11: memref<1x1x2048xf32, #tpu.memory_space<vmem>>, %arg12: memref<1x2048x128xbf16, #tpu.memory_space<vmem>>, %arg13: memref<1x1x128xf32, #tpu.memory_space<vmem>>, %arg14: memref<1x1x128xf32, #tpu.memory_space<vmem>>, %arg15: memref<1x1x128xf32, #tpu.memory_space<vmem>>, %arg16: memref<128x1xf32, #tpu.memory_space<vmem>>, %arg17: memref<1x1xf32, #tpu.memory_space<vmem>>, %arg18: memref<1x1xf32, #tpu.memory_space<vmem>>, %arg19: memref<8x128xf32, #tpu.memory_space<vmem>>) attributes {dimension_semantics = [#tpu.dimension_semantics<arbitrary>], iteration_bounds = array<i64: 2>, scalar_prefetch = 0 : i64, scratch_operands = 1 : i64, tpu.core_type = #tpu.core_type<tc>, window_params = [{pipeline_mode = #tpu.pipeline_mode<synchronous>, transform_indices = @transform_0, window_bounds = array<i64: 8, 32>}, {pipeline_mode = #tpu.pipeline_mode<synchronous>, transform_indices = @transform_1, window_bounds = array<i64: 32, 128>}, {pipeline_mode = #tpu.pipeline_mode<synchronous>, transform_indices = @transform_2, window_bounds = array<i64: 1, 128>}, {transform_indices = @transform_3, window_bounds = array<i64: 1, 128, 384>}, {transform_indices = @transform_4, window_bounds = array<i64: 1, 1, 384>}, {transform_indices = @transform_5, window_bounds = array<i64: 1, 128, 128>}, {transform_indices = @transform_6, window_bounds = array<i64: 1, 1, 128>}, {transform_indices = @transform_7, window_bounds = array<i64: 1, 1, 128>}, {transform_indices = @transform_8, window_bounds = array<i64: 1, 1, 128>}, {transform_indices = @transform_9, window_bounds = array<i64: 1, 128, 2048>}, {transform_indices = @transform_10, window_bounds = array<i64: 1, 1, 2048>}, {transform_indices = @transform_11, window_bounds = array<i64: 1, 2048, 128>}, {transform_indices = @transform_12, window_bounds = array<i64: 1, 1, 128>}, {transform_indices = @transform_13, window_bounds = array<i64: 1, 1, 128>}, {transform_indices = @transform_14, window_bounds = array<i64: 1, 1, 128>}, {pipeline_mode = #tpu.pipeline_mode<synchronous>, transform_indices = @transform_15, window_bounds = array<i64: 128, 1>}, {pipeline_mode = #tpu.pipeline_mode<synchronous>, transform_indices = @transform_16, window_bounds = array<i64: 1, 1>}, {pipeline_mode = #tpu.pipeline_mode<synchronous>, transform_indices = @transform_17, window_bounds = array<i64: 1, 1>}]} {
    %c0_i32 = arith.constant 0 : i32
    %0 = arith.cmpi eq, %arg0, %c0_i32 : i32
    %1 = arith.extui %0 : i1 to i32
    %c0_i32_0 = arith.constant 0 : i32
    %2 = arith.cmpi ne, %1, %c0_i32_0 : i32
    scf.if %2 {
      %c0_95 = arith.constant 0 : index
      %c0_96 = arith.constant 0 : index
      %253 = vector.load %arg1[%c0_95, %c0_96] : memref<8x32xf32, #tpu.memory_space<vmem>>, vector<8x32xf32>
      %254 = arith.truncf %253 : vector<8x32xf32> to vector<8x32xbf16>
      %c0_97 = arith.constant 0 : index
      %c0_98 = arith.constant 0 : index
      %255 = vector.load %arg2[%c0_97, %c0_98] : memref<32x128xbf16, #tpu.memory_space<vmem>>, vector<32x128xbf16>
      %cst_99 = arith.constant dense<0.000000e+00> : vector<8x128xf32>
      %256 = tpu.matmul %254, %255, %cst_99 {dimension_numbers = #tpu.dot_dimension_numbers<[1], [0], [0], [1], [0, 0, 1, 1], [], []>} : vector<8x32xbf16>, vector<32x128xbf16>, vector<8x128xf32> -> vector<8x128xf32>
      %c0_100 = arith.constant 0 : index
      %c0_101 = arith.constant 0 : index
      %257 = vector.load %arg3[%c0_100, %c0_101] : memref<1x128xf32, #tpu.memory_space<vmem>>, vector<1x128xf32>
      %258 = vector.broadcast %257 : vector<1x128xf32> to vector<8x128xf32>
      %259 = arith.addf %256, %258 : vector<8x128xf32>
      %cst_102 = arith.constant dense<0.000000e+00> : vector<128xf32>
      %260 = vector.multi_reduction <add>, %259, %cst_102 [0] : vector<8x128xf32> to vector<128xf32>
      %261 = vector.shape_cast %260 : vector<128xf32> to vector<1x128xf32>
      %cst_103 = arith.constant 8.000000e+00 : f32
      %262 = vector.broadcast %cst_103 : f32 to vector<1x128xf32>
      %263 = arith.divf %261, %262 : vector<1x128xf32>
      %264 = vector.broadcast %263 : vector<1x128xf32> to vector<8x128xf32>
      %265 = arith.subf %259, %264 : vector<8x128xf32>
      %266 = arith.mulf %265, %265 : vector<8x128xf32>
      %cst_104 = arith.constant dense<0.000000e+00> : vector<128xf32>
      %267 = vector.multi_reduction <add>, %266, %cst_104 [0] : vector<8x128xf32> to vector<128xf32>
      %268 = vector.shape_cast %267 : vector<128xf32> to vector<1x128xf32>
      %cst_105 = arith.constant 7.000000e+00 : f32
      %269 = vector.broadcast %cst_105 : f32 to vector<1x128xf32>
      %270 = arith.divf %268, %269 : vector<1x128xf32>
      %271 = math.sqrt %270 : vector<1x128xf32>
      %cst_106 = arith.constant 9.99999997E-7 : f32
      %272 = vector.broadcast %cst_106 : f32 to vector<1x128xf32>
      %273 = arith.addf %271, %272 : vector<1x128xf32>
      %274 = vector.broadcast %273 : vector<1x128xf32> to vector<8x128xf32>
      %275 = arith.divf %265, %274 : vector<8x128xf32>
      %c0_107 = arith.constant 0 : index
      %c0_108 = arith.constant 0 : index
      %276 = vector.load %arg19[%c0_107, %c0_108] : memref<8x128xf32, #tpu.memory_space<vmem>>, vector<8x128xf32>
      tpu.vector_store %arg19[%c0_107, %c0_108], %275 {strides = array<i32>} : memref<8x128xf32, #tpu.memory_space<vmem>>, vector<8x128xf32>,
    } else {
    }
    %c0 = arith.constant 0 : index
    %c0_1 = arith.constant 0 : index
    %3 = vector.load %arg19[%c0, %c0_1] : memref<8x128xf32, #tpu.memory_space<vmem>>, vector<8x128xf32>
    %4 = arith.truncf %3 : vector<8x128xf32> to vector<8x128xbf16>
    %c0_2 = arith.constant 0 : index
    %c0_3 = arith.constant 0 : index
    %c0_4 = arith.constant 0 : index
    %5 = vector.load %arg4[%c0_2, %c0_3, %c0_4] : memref<1x128x384xbf16, #tpu.memory_space<vmem>>, vector<1x128x384xbf16>
    %6 = vector.shape_cast %5 : vector<1x128x384xbf16> to vector<128x384xbf16>
    %cst = arith.constant dense<0.000000e+00> : vector<8x384xf32>
    %7 = tpu.matmul %4, %6, %cst {dimension_numbers = #tpu.dot_dimension_numbers<[1], [0], [0], [1], [0, 0, 1, 1], [], []>} : vector<8x128xbf16>, vector<128x384xbf16>, vector<8x384xf32> -> vector<8x384xf32>
    %c0_5 = arith.constant 0 : index
    %c0_6 = arith.constant 0 : index
    %c0_7 = arith.constant 0 : index
    %8 = vector.load %arg5[%c0_5, %c0_6, %c0_7] : memref<1x1x384xf32, #tpu.memory_space<vmem>>, vector<1x1x384xf32>
    %9 = vector.shape_cast %8 : vector<1x1x384xf32> to vector<1x384xf32>
    %10 = vector.broadcast %9 : vector<1x384xf32> to vector<8x384xf32>
    %11 = arith.addf %7, %10 : vector<8x384xf32>
    %12 = vector.extract_strided_slice %11 {offsets = [0, 0], sizes = [8, 16], strides = [1, 1]} : vector<8x384xf32> to vector<8x16xf32>
    %13 = arith.truncf %12 : vector<8x16xf32> to vector<8x16xbf16>
    %14 = vector.extract_strided_slice %11 {offsets = [0, 128], sizes = [8, 16], strides = [1, 1]} : vector<8x384xf32> to vector<8x16xf32>
    %15 = arith.truncf %14 : vector<8x16xf32> to vector<8x16xbf16>
    %16 = vector.extract_strided_slice %11 {offsets = [0, 256], sizes = [8, 16], strides = [1, 1]} : vector<8x384xf32> to vector<8x16xf32>
    %17 = arith.truncf %16 : vector<8x16xf32> to vector<8x16xbf16>
    %cst_8 = arith.constant dense<0.000000e+00> : vector<8x8xf32>
    %18 = tpu.matmul %13, %15, %cst_8 {dimension_numbers = #tpu.dot_dimension_numbers<[1], [1], [0], [0], [0, 0, 1, 0], [], []>} : vector<8x16xbf16>, vector<8x16xbf16>, vector<8x8xf32> -> vector<8x8xf32>
    %cst_9 = arith.constant 2.500000e-01 : f32
    %19 = vector.broadcast %cst_9 : f32 to vector<8x8xf32>
    %20 = arith.mulf %18, %19 : vector<8x8xf32>
    %cst_10 = arith.constant dense<0xFF800000> : vector<8xf32>
    %21 = vector.multi_reduction <maximumf>, %20, %cst_10 [1] : vector<8x8xf32> to vector<8xf32>
    %22 = vector.shape_cast %21 : vector<8xf32> to vector<8x1xf32>
    %23 = vector.broadcast %22 : vector<8x1xf32> to vector<8x8xf32>
    %24 = arith.subf %20, %23 : vector<8x8xf32>
    %25 = math.exp %24 : vector<8x8xf32>
    %cst_11 = arith.constant dense<0.000000e+00> : vector<8xf32>
    %26 = vector.multi_reduction <add>, %25, %cst_11 [1] : vector<8x8xf32> to vector<8xf32>
    %27 = vector.shape_cast %26 : vector<8xf32> to vector<8x1xf32>
    %28 = vector.broadcast %27 : vector<8x1xf32> to vector<8x8xf32>
    %29 = arith.divf %25, %28 : vector<8x8xf32>
    %30 = arith.truncf %29 : vector<8x8xf32> to vector<8x8xbf16>
    %cst_12 = arith.constant dense<0.000000e+00> : vector<8x16xf32>
    %31 = tpu.matmul %30, %17, %cst_12 {dimension_numbers = #tpu.dot_dimension_numbers<[1], [0], [0], [1], [0, 0, 1, 1], [], []>} : vector<8x8xbf16>, vector<8x16xbf16>, vector<8x16xf32> -> vector<8x16xf32>
    %32 = vector.extract_strided_slice %11 {offsets = [0, 16], sizes = [8, 16], strides = [1, 1]} : vector<8x384xf32> to vector<8x16xf32>
    %33 = arith.truncf %32 : vector<8x16xf32> to vector<8x16xbf16>
    %34 = vector.extract_strided_slice %11 {offsets = [0, 144], sizes = [8, 16], strides = [1, 1]} : vector<8x384xf32> to vector<8x16xf32>
    %35 = arith.truncf %34 : vector<8x16xf32> to vector<8x16xbf16>
    %36 = vector.extract_strided_slice %11 {offsets = [0, 272], sizes = [8, 16], strides = [1, 1]} : vector<8x384xf32> to vector<8x16xf32>
    %37 = arith.truncf %36 : vector<8x16xf32> to vector<8x16xbf16>
    %cst_13 = arith.constant dense<0.000000e+00> : vector<8x8xf32>
    %38 = tpu.matmul %33, %35, %cst_13 {dimension_numbers = #tpu.dot_dimension_numbers<[1], [1], [0], [0], [0, 0, 1, 0], [], []>} : vector<8x16xbf16>, vector<8x16xbf16>, vector<8x8xf32> -> vector<8x8xf32>
    %cst_14 = arith.constant 2.500000e-01 : f32
    %39 = vector.broadcast %cst_14 : f32 to vector<8x8xf32>
    %40 = arith.mulf %38, %39 : vector<8x8xf32>
    %cst_15 = arith.constant dense<0xFF800000> : vector<8xf32>
    %41 = vector.multi_reduction <maximumf>, %40, %cst_15 [1] : vector<8x8xf32> to vector<8xf32>
    %42 = vector.shape_cast %41 : vector<8xf32> to vector<8x1xf32>
    %43 = vector.broadcast %42 : vector<8x1xf32> to vector<8x8xf32>
    %44 = arith.subf %40, %43 : vector<8x8xf32>
    %45 = math.exp %44 : vector<8x8xf32>
    %cst_16 = arith.constant dense<0.000000e+00> : vector<8xf32>
    %46 = vector.multi_reduction <add>, %45, %cst_16 [1] : vector<8x8xf32> to vector<8xf32>
    %47 = vector.shape_cast %46 : vector<8xf32> to vector<8x1xf32>
    %48 = vector.broadcast %47 : vector<8x1xf32> to vector<8x8xf32>
    %49 = arith.divf %45, %48 : vector<8x8xf32>
    %50 = arith.truncf %49 : vector<8x8xf32> to vector<8x8xbf16>
    %cst_17 = arith.constant dense<0.000000e+00> : vector<8x16xf32>
    %51 = tpu.matmul %50, %37, %cst_17 {dimension_numbers = #tpu.dot_dimension_numbers<[1], [0], [0], [1], [0, 0, 1, 1], [], []>} : vector<8x8xbf16>, vector<8x16xbf16>, vector<8x16xf32> -> vector<8x16xf32>
    %52 = vector.extract_strided_slice %11 {offsets = [0, 32], sizes = [8, 16], strides = [1, 1]} : vector<8x384xf32> to vector<8x16xf32>
    %53 = arith.truncf %52 : vector<8x16xf32> to vector<8x16xbf16>
    %54 = vector.extract_strided_slice %11 {offsets = [0, 160], sizes = [8, 16], strides = [1, 1]} : vector<8x384xf32> to vector<8x16xf32>
    %55 = arith.truncf %54 : vector<8x16xf32> to vector<8x16xbf16>
    %56 = vector.extract_strided_slice %11 {offsets = [0, 288], sizes = [8, 16], strides = [1, 1]} : vector<8x384xf32> to vector<8x16xf32>
    %57 = arith.truncf %56 : vector<8x16xf32> to vector<8x16xbf16>
    %cst_18 = arith.constant dense<0.000000e+00> : vector<8x8xf32>
    %58 = tpu.matmul %53, %55, %cst_18 {dimension_numbers = #tpu.dot_dimension_numbers<[1], [1], [0], [0], [0, 0, 1, 0], [], []>} : vector<8x16xbf16>, vector<8x16xbf16>, vector<8x8xf32> -> vector<8x8xf32>
    %cst_19 = arith.constant 2.500000e-01 : f32
    %59 = vector.broadcast %cst_19 : f32 to vector<8x8xf32>
    %60 = arith.mulf %58, %59 : vector<8x8xf32>
    %cst_20 = arith.constant dense<0xFF800000> : vector<8xf32>
    %61 = vector.multi_reduction <maximumf>, %60, %cst_20 [1] : vector<8x8xf32> to vector<8xf32>
    %62 = vector.shape_cast %61 : vector<8xf32> to vector<8x1xf32>
    %63 = vector.broadcast %62 : vector<8x1xf32> to vector<8x8xf32>
    %64 = arith.subf %60, %63 : vector<8x8xf32>
    %65 = math.exp %64 : vector<8x8xf32>
    %cst_21 = arith.constant dense<0.000000e+00> : vector<8xf32>
    %66 = vector.multi_reduction <add>, %65, %cst_21 [1] : vector<8x8xf32> to vector<8xf32>
    %67 = vector.shape_cast %66 : vector<8xf32> to vector<8x1xf32>
    %68 = vector.broadcast %67 : vector<8x1xf32> to vector<8x8xf32>
    %69 = arith.divf %65, %68 : vector<8x8xf32>
    %70 = arith.truncf %69 : vector<8x8xf32> to vector<8x8xbf16>
    %cst_22 = arith.constant dense<0.000000e+00> : vector<8x16xf32>
    %71 = tpu.matmul %70, %57, %cst_22 {dimension_numbers = #tpu.dot_dimension_numbers<[1], [0], [0], [1], [0, 0, 1, 1], [], []>} : vector<8x8xbf16>, vector<8x16xbf16>, vector<8x16xf32> -> vector<8x16xf32>
    %72 = vector.extract_strided_slice %11 {offsets = [0, 48], sizes = [8, 16], strides = [1, 1]} : vector<8x384xf32> to vector<8x16xf32>
    %73 = arith.truncf %72 : vector<8x16xf32> to vector<8x16xbf16>
    %74 = vector.extract_strided_slice %11 {offsets = [0, 176], sizes = [8, 16], strides = [1, 1]} : vector<8x384xf32> to vector<8x16xf32>
    %75 = arith.truncf %74 : vector<8x16xf32> to vector<8x16xbf16>
    %76 = vector.extract_strided_slice %11 {offsets = [0, 304], sizes = [8, 16], strides = [1, 1]} : vector<8x384xf32> to vector<8x16xf32>
    %77 = arith.truncf %76 : vector<8x16xf32> to vector<8x16xbf16>
    %cst_23 = arith.constant dense<0.000000e+00> : vector<8x8xf32>
    %78 = tpu.matmul %73, %75, %cst_23 {dimension_numbers = #tpu.dot_dimension_numbers<[1], [1], [0], [0], [0, 0, 1, 0], [], []>} : vector<8x16xbf16>, vector<8x16xbf16>, vector<8x8xf32> -> vector<8x8xf32>
    %cst_24 = arith.constant 2.500000e-01 : f32
    %79 = vector.broadcast %cst_24 : f32 to vector<8x8xf32>
    %80 = arith.mulf %78, %79 : vector<8x8xf32>
    %cst_25 = arith.constant dense<0xFF800000> : vector<8xf32>
    %81 = vector.multi_reduction <maximumf>, %80, %cst_25 [1] : vector<8x8xf32> to vector<8xf32>
    %82 = vector.shape_cast %81 : vector<8xf32> to vector<8x1xf32>
    %83 = vector.broadcast %82 : vector<8x1xf32> to vector<8x8xf32>
    %84 = arith.subf %80, %83 : vector<8x8xf32>
    %85 = math.exp %84 : vector<8x8xf32>
    %cst_26 = arith.constant dense<0.000000e+00> : vector<8xf32>
    %86 = vector.multi_reduction <add>, %85, %cst_26 [1] : vector<8x8xf32> to vector<8xf32>
    %87 = vector.shape_cast %86 : vector<8xf32> to vector<8x1xf32>
    %88 = vector.broadcast %87 : vector<8x1xf32> to vector<8x8xf32>
    %89 = arith.divf %85, %88 : vector<8x8xf32>
    %90 = arith.truncf %89 : vector<8x8xf32> to vector<8x8xbf16>
    %cst_27 = arith.constant dense<0.000000e+00> : vector<8x16xf32>
    %91 = tpu.matmul %90, %77, %cst_27 {dimension_numbers = #tpu.dot_dimension_numbers<[1], [0], [0], [1], [0, 0, 1, 1], [], []>} : vector<8x8xbf16>, vector<8x16xbf16>, vector<8x16xf32> -> vector<8x16xf32>
    %92 = vector.extract_strided_slice %11 {offsets = [0, 64], sizes = [8, 16], strides = [1, 1]} : vector<8x384xf32> to vector<8x16xf32>
    %93 = arith.truncf %92 : vector<8x16xf32> to vector<8x16xbf16>
    %94 = vector.extract_strided_slice %11 {offsets = [0, 192], sizes = [8, 16], strides = [1, 1]} : vector<8x384xf32> to vector<8x16xf32>
    %95 = arith.truncf %94 : vector<8x16xf32> to vector<8x16xbf16>
    %96 = vector.extract_strided_slice %11 {offsets = [0, 320], sizes = [8, 16], strides = [1, 1]} : vector<8x384xf32> to vector<8x16xf32>
    %97 = arith.truncf %96 : vector<8x16xf32> to vector<8x16xbf16>
    %cst_28 = arith.constant dense<0.000000e+00> : vector<8x8xf32>
    %98 = tpu.matmul %93, %95, %cst_28 {dimension_numbers = #tpu.dot_dimension_numbers<[1], [1], [0], [0], [0, 0, 1, 0], [], []>} : vector<8x16xbf16>, vector<8x16xbf16>, vector<8x8xf32> -> vector<8x8xf32>
    %cst_29 = arith.constant 2.500000e-01 : f32
    %99 = vector.broadcast %cst_29 : f32 to vector<8x8xf32>
    %100 = arith.mulf %98, %99 : vector<8x8xf32>
    %cst_30 = arith.constant dense<0xFF800000> : vector<8xf32>
    %101 = vector.multi_reduction <maximumf>, %100, %cst_30 [1] : vector<8x8xf32> to vector<8xf32>
    %102 = vector.shape_cast %101 : vector<8xf32> to vector<8x1xf32>
    %103 = vector.broadcast %102 : vector<8x1xf32> to vector<8x8xf32>
    %104 = arith.subf %100, %103 : vector<8x8xf32>
    %105 = math.exp %104 : vector<8x8xf32>
    %cst_31 = arith.constant dense<0.000000e+00> : vector<8xf32>
    %106 = vector.multi_reduction <add>, %105, %cst_31 [1] : vector<8x8xf32> to vector<8xf32>
    %107 = vector.shape_cast %106 : vector<8xf32> to vector<8x1xf32>
    %108 = vector.broadcast %107 : vector<8x1xf32> to vector<8x8xf32>
    %109 = arith.divf %105, %108 : vector<8x8xf32>
    %110 = arith.truncf %109 : vector<8x8xf32> to vector<8x8xbf16>
    %cst_32 = arith.constant dense<0.000000e+00> : vector<8x16xf32>
    %111 = tpu.matmul %110, %97, %cst_32 {dimension_numbers = #tpu.dot_dimension_numbers<[1], [0], [0], [1], [0, 0, 1, 1], [], []>} : vector<8x8xbf16>, vector<8x16xbf16>, vector<8x16xf32> -> vector<8x16xf32>
    %112 = vector.extract_strided_slice %11 {offsets = [0, 80], sizes = [8, 16], strides = [1, 1]} : vector<8x384xf32> to vector<8x16xf32>
    %113 = arith.truncf %112 : vector<8x16xf32> to vector<8x16xbf16>
    %114 = vector.extract_strided_slice %11 {offsets = [0, 208], sizes = [8, 16], strides = [1, 1]} : vector<8x384xf32> to vector<8x16xf32>
    %115 = arith.truncf %114 : vector<8x16xf32> to vector<8x16xbf16>
    %116 = vector.extract_strided_slice %11 {offsets = [0, 336], sizes = [8, 16], strides = [1, 1]} : vector<8x384xf32> to vector<8x16xf32>
    %117 = arith.truncf %116 : vector<8x16xf32> to vector<8x16xbf16>
    %cst_33 = arith.constant dense<0.000000e+00> : vector<8x8xf32>
    %118 = tpu.matmul %113, %115, %cst_33 {dimension_numbers = #tpu.dot_dimension_numbers<[1], [1], [0], [0], [0, 0, 1, 0], [], []>} : vector<8x16xbf16>, vector<8x16xbf16>, vector<8x8xf32> -> vector<8x8xf32>
    %cst_34 = arith.constant 2.500000e-01 : f32
    %119 = vector.broadcast %cst_34 : f32 to vector<8x8xf32>
    %120 = arith.mulf %118, %119 : vector<8x8xf32>
    %cst_35 = arith.constant dense<0xFF800000> : vector<8xf32>
    %121 = vector.multi_reduction <maximumf>, %120, %cst_35 [1] : vector<8x8xf32> to vector<8xf32>
    %122 = vector.shape_cast %121 : vector<8xf32> to vector<8x1xf32>
    %123 = vector.broadcast %122 : vector<8x1xf32> to vector<8x8xf32>
    %124 = arith.subf %120, %123 : vector<8x8xf32>
    %125 = math.exp %124 : vector<8x8xf32>
    %cst_36 = arith.constant dense<0.000000e+00> : vector<8xf32>
    %126 = vector.multi_reduction <add>, %125, %cst_36 [1] : vector<8x8xf32> to vector<8xf32>
    %127 = vector.shape_cast %126 : vector<8xf32> to vector<8x1xf32>
    %128 = vector.broadcast %127 : vector<8x1xf32> to vector<8x8xf32>
    %129 = arith.divf %125, %128 : vector<8x8xf32>
    %130 = arith.truncf %129 : vector<8x8xf32> to vector<8x8xbf16>
    %cst_37 = arith.constant dense<0.000000e+00> : vector<8x16xf32>
    %131 = tpu.matmul %130, %117, %cst_37 {dimension_numbers = #tpu.dot_dimension_numbers<[1], [0], [0], [1], [0, 0, 1, 1], [], []>} : vector<8x8xbf16>, vector<8x16xbf16>, vector<8x16xf32> -> vector<8x16xf32>
    %132 = vector.extract_strided_slice %11 {offsets = [0, 96], sizes = [8, 16], strides = [1, 1]} : vector<8x384xf32> to vector<8x16xf32>
    %133 = arith.truncf %132 : vector<8x16xf32> to vector<8x16xbf16>
    %134 = vector.extract_strided_slice %11 {offsets = [0, 224], sizes = [8, 16], strides = [1, 1]} : vector<8x384xf32> to vector<8x16xf32>
    %135 = arith.truncf %134 : vector<8x16xf32> to vector<8x16xbf16>
    %136 = vector.extract_strided_slice %11 {offsets = [0, 352], sizes = [8, 16], strides = [1, 1]} : vector<8x384xf32> to vector<8x16xf32>
    %137 = arith.truncf %136 : vector<8x16xf32> to vector<8x16xbf16>
    %cst_38 = arith.constant dense<0.000000e+00> : vector<8x8xf32>
    %138 = tpu.matmul %133, %135, %cst_38 {dimension_numbers = #tpu.dot_dimension_numbers<[1], [1], [0], [0], [0, 0, 1, 0], [], []>} : vector<8x16xbf16>, vector<8x16xbf16>, vector<8x8xf32> -> vector<8x8xf32>
    %cst_39 = arith.constant 2.500000e-01 : f32
    %139 = vector.broadcast %cst_39 : f32 to vector<8x8xf32>
    %140 = arith.mulf %138, %139 : vector<8x8xf32>
    %cst_40 = arith.constant dense<0xFF800000> : vector<8xf32>
    %141 = vector.multi_reduction <maximumf>, %140, %cst_40 [1] : vector<8x8xf32> to vector<8xf32>
    %142 = vector.shape_cast %141 : vector<8xf32> to vector<8x1xf32>
    %143 = vector.broadcast %142 : vector<8x1xf32> to vector<8x8xf32>
    %144 = arith.subf %140, %143 : vector<8x8xf32>
    %145 = math.exp %144 : vector<8x8xf32>
    %cst_41 = arith.constant dense<0.000000e+00> : vector<8xf32>
    %146 = vector.multi_reduction <add>, %145, %cst_41 [1] : vector<8x8xf32> to vector<8xf32>
    %147 = vector.shape_cast %146 : vector<8xf32> to vector<8x1xf32>
    %148 = vector.broadcast %147 : vector<8x1xf32> to vector<8x8xf32>
    %149 = arith.divf %145, %148 : vector<8x8xf32>
    %150 = arith.truncf %149 : vector<8x8xf32> to vector<8x8xbf16>
    %cst_42 = arith.constant dense<0.000000e+00> : vector<8x16xf32>
    %151 = tpu.matmul %150, %137, %cst_42 {dimension_numbers = #tpu.dot_dimension_numbers<[1], [0], [0], [1], [0, 0, 1, 1], [], []>} : vector<8x8xbf16>, vector<8x16xbf16>, vector<8x16xf32> -> vector<8x16xf32>
    %152 = vector.extract_strided_slice %11 {offsets = [0, 112], sizes = [8, 16], strides = [1, 1]} : vector<8x384xf32> to vector<8x16xf32>
    %153 = arith.truncf %152 : vector<8x16xf32> to vector<8x16xbf16>
    %154 = vector.extract_strided_slice %11 {offsets = [0, 240], sizes = [8, 16], strides = [1, 1]} : vector<8x384xf32> to vector<8x16xf32>
    %155 = arith.truncf %154 : vector<8x16xf32> to vector<8x16xbf16>
    %156 = vector.extract_strided_slice %11 {offsets = [0, 368], sizes = [8, 16], strides = [1, 1]} : vector<8x384xf32> to vector<8x16xf32>
    %157 = arith.truncf %156 : vector<8x16xf32> to vector<8x16xbf16>
    %cst_43 = arith.constant dense<0.000000e+00> : vector<8x8xf32>
    %158 = tpu.matmul %153, %155, %cst_43 {dimension_numbers = #tpu.dot_dimension_numbers<[1], [1], [0], [0], [0, 0, 1, 0], [], []>} : vector<8x16xbf16>, vector<8x16xbf16>, vector<8x8xf32> -> vector<8x8xf32>
    %cst_44 = arith.constant 2.500000e-01 : f32
    %159 = vector.broadcast %cst_44 : f32 to vector<8x8xf32>
    %160 = arith.mulf %158, %159 : vector<8x8xf32>
    %cst_45 = arith.constant dense<0xFF800000> : vector<8xf32>
    %161 = vector.multi_reduction <maximumf>, %160, %cst_45 [1] : vector<8x8xf32> to vector<8xf32>
    %162 = vector.shape_cast %161 : vector<8xf32> to vector<8x1xf32>
    %163 = vector.broadcast %162 : vector<8x1xf32> to vector<8x8xf32>
    %164 = arith.subf %160, %163 : vector<8x8xf32>
    %165 = math.exp %164 : vector<8x8xf32>
    %cst_46 = arith.constant dense<0.000000e+00> : vector<8xf32>
    %166 = vector.multi_reduction <add>, %165, %cst_46 [1] : vector<8x8xf32> to vector<8xf32>
    %167 = vector.shape_cast %166 : vector<8xf32> to vector<8x1xf32>
    %168 = vector.broadcast %167 : vector<8x1xf32> to vector<8x8xf32>
    %169 = arith.divf %165, %168 : vector<8x8xf32>
    %170 = arith.truncf %169 : vector<8x8xf32> to vector<8x8xbf16>
    %cst_47 = arith.constant dense<0.000000e+00> : vector<8x16xf32>
    %171 = tpu.matmul %170, %157, %cst_47 {dimension_numbers = #tpu.dot_dimension_numbers<[1], [0], [0], [1], [0, 0, 1, 1], [], []>} : vector<8x8xbf16>, vector<8x16xbf16>, vector<8x16xf32> -> vector<8x16xf32>
    %172 = tpu.concatenate %31, %51, %71, %91, %111, %131, %151, %171 in 1 : vector<8x16xf32>, vector<8x16xf32>, vector<8x16xf32>, vector<8x16xf32>, vector<8x16xf32>, vector<8x16xf32>, vector<8x16xf32>, vector<8x16xf32> -> vector<8x128xf32>
    %173 = arith.truncf %172 : vector<8x128xf32> to vector<8x128xbf16>
    %c0_48 = arith.constant 0 : index
    %c0_49 = arith.constant 0 : index
    %c0_50 = arith.constant 0 : index
    %174 = vector.load %arg6[%c0_48, %c0_49, %c0_50] : memref<1x128x128xbf16, #tpu.memory_space<vmem>>, vector<1x128x128xbf16>
    %175 = vector.shape_cast %174 : vector<1x128x128xbf16> to vector<128x128xbf16>
    %cst_51 = arith.constant dense<0.000000e+00> : vector<8x128xf32>
    %176 = tpu.matmul %173, %175, %cst_51 {dimension_numbers = #tpu.dot_dimension_numbers<[1], [0], [0], [1], [0, 0, 1, 1], [], []>} : vector<8x128xbf16>, vector<128x128xbf16>, vector<8x128xf32> -> vector<8x128xf32>
    %c0_52 = arith.constant 0 : index
    %c0_53 = arith.constant 0 : index
    %c0_54 = arith.constant 0 : index
    %177 = vector.load %arg7[%c0_52, %c0_53, %c0_54] : memref<1x1x128xf32, #tpu.memory_space<vmem>>, vector<1x1x128xf32>
    %178 = vector.shape_cast %177 : vector<1x1x128xf32> to vector<1x128xf32>
    %179 = vector.broadcast %178 : vector<1x128xf32> to vector<8x128xf32>
    %180 = arith.addf %176, %179 : vector<8x128xf32>
    %181 = arith.addf %3, %180 : vector<8x128xf32>
    %c0_55 = arith.constant 0 : index
    %c0_56 = arith.constant 0 : index
    %c0_57 = arith.constant 0 : index
    %182 = vector.load %arg8[%c0_55, %c0_56, %c0_57] : memref<1x1x128xf32, #tpu.memory_space<vmem>>, vector<1x1x128xf32>
    %183 = vector.shape_cast %182 : vector<1x1x128xf32> to vector<1x128xf32>
    %c0_58 = arith.constant 0 : index
    %c0_59 = arith.constant 0 : index
    %c0_60 = arith.constant 0 : index
    %184 = vector.load %arg9[%c0_58, %c0_59, %c0_60] : memref<1x1x128xf32, #tpu.memory_space<vmem>>, vector<1x1x128xf32>
    %185 = vector.shape_cast %184 : vector<1x1x128xf32> to vector<1x128xf32>
    %cst_61 = arith.constant dense<0.000000e+00> : vector<8xf32>
    %186 = vector.multi_reduction <add>, %181, %cst_61 [1] : vector<8x128xf32> to vector<8xf32>
    %187 = vector.shape_cast %186 : vector<8xf32> to vector<8x1xf32>
    %cst_62 = arith.constant 1.280000e+02 : f32
    %188 = vector.broadcast %cst_62 : f32 to vector<8x1xf32>
    %189 = arith.divf %187, %188 : vector<8x1xf32>
    %190 = vector.broadcast %189 : vector<8x1xf32> to vector<8x128xf32>
    %191 = arith.subf %181, %190 : vector<8x128xf32>
    %192 = arith.mulf %191, %191 : vector<8x128xf32>
    %cst_63 = arith.constant dense<0.000000e+00> : vector<8xf32>
    %193 = vector.multi_reduction <add>, %192, %cst_63 [1] : vector<8x128xf32> to vector<8xf32>
    %194 = vector.shape_cast %193 : vector<8xf32> to vector<8x1xf32>
    %cst_64 = arith.constant 1.280000e+02 : f32
    %195 = vector.broadcast %cst_64 : f32 to vector<8x1xf32>
    %196 = arith.divf %194, %195 : vector<8x1xf32>
    %cst_65 = arith.constant 9.99999974E-6 : f32
    %197 = vector.broadcast %cst_65 : f32 to vector<8x1xf32>
    %198 = arith.addf %196, %197 : vector<8x1xf32>
    %199 = math.rsqrt %198 : vector<8x1xf32>
    %200 = vector.broadcast %199 : vector<8x1xf32> to vector<8x128xf32>
    %201 = arith.mulf %191, %200 : vector<8x128xf32>
    %202 = vector.broadcast %183 : vector<1x128xf32> to vector<8x128xf32>
    %203 = arith.mulf %201, %202 : vector<8x128xf32>
    %204 = vector.broadcast %185 : vector<1x128xf32> to vector<8x128xf32>
    %205 = arith.addf %203, %204 : vector<8x128xf32>
    %206 = arith.truncf %205 : vector<8x128xf32> to vector<8x128xbf16>
    %c0_66 = arith.constant 0 : index
    %c0_67 = arith.constant 0 : index
    %c0_68 = arith.constant 0 : index
    %207 = vector.load %arg10[%c0_66, %c0_67, %c0_68] : memref<1x128x2048xbf16, #tpu.memory_space<vmem>>, vector<1x128x2048xbf16>
    %208 = vector.shape_cast %207 : vector<1x128x2048xbf16> to vector<128x2048xbf16>
    %cst_69 = arith.constant dense<0.000000e+00> : vector<8x2048xf32>
    %209 = tpu.matmul %206, %208, %cst_69 {dimension_numbers = #tpu.dot_dimension_numbers<[1], [0], [0], [1], [0, 0, 1, 1], [], []>} : vector<8x128xbf16>, vector<128x2048xbf16>, vector<8x2048xf32> -> vector<8x2048xf32>
    %c0_70 = arith.constant 0 : index
    %c0_71 = arith.constant 0 : index
    %c0_72 = arith.constant 0 : index
    %210 = vector.load %arg11[%c0_70, %c0_71, %c0_72] : memref<1x1x2048xf32, #tpu.memory_space<vmem>>, vector<1x1x2048xf32>
    %211 = vector.shape_cast %210 : vector<1x1x2048xf32> to vector<1x2048xf32>
    %212 = vector.broadcast %211 : vector<1x2048xf32> to vector<8x2048xf32>
    %213 = arith.addf %209, %212 : vector<8x2048xf32>
    %cst_73 = arith.constant 0.000000e+00 : f32
    %214 = vector.broadcast %cst_73 : f32 to vector<8x2048xf32>
    %215 = arith.maximumf %213, %214 : vector<8x2048xf32>
    %216 = arith.truncf %215 : vector<8x2048xf32> to vector<8x2048xbf16>
    %c0_74 = arith.constant 0 : index
    %c0_75 = arith.constant 0 : index
    %c0_76 = arith.constant 0 : index
    %217 = vector.load %arg12[%c0_74, %c0_75, %c0_76] : memref<1x2048x128xbf16, #tpu.memory_space<vmem>>, vector<1x2048x128xbf16>
    %218 = vector.shape_cast %217 : vector<1x2048x128xbf16> to vector<2048x128xbf16>
    %cst_77 = arith.constant dense<0.000000e+00> : vector<8x128xf32>
    %219 = tpu.matmul %216, %218, %cst_77 {dimension_numbers = #tpu.dot_dimension_numbers<[1], [0], [0], [1], [0, 0, 1, 1], [], []>} : vector<8x2048xbf16>, vector<2048x128xbf16>, vector<8x128xf32> -> vector<8x128xf32>
    %c0_78 = arith.constant 0 : index
    %c0_79 = arith.constant 0 : index
    %c0_80 = arith.constant 0 : index
    %220 = vector.load %arg13[%c0_78, %c0_79, %c0_80] : memref<1x1x128xf32, #tpu.memory_space<vmem>>, vector<1x1x128xf32>
    %221 = vector.shape_cast %220 : vector<1x1x128xf32> to vector<1x128xf32>
    %222 = vector.broadcast %221 : vector<1x128xf32> to vector<8x128xf32>
    %223 = arith.addf %219, %222 : vector<8x128xf32>
    %224 = arith.addf %205, %223 : vector<8x128xf32>
    %c0_81 = arith.constant 0 : index
    %c0_82 = arith.constant 0 : index
    %c0_83 = arith.constant 0 : index
    %225 = vector.load %arg14[%c0_81, %c0_82, %c0_83] : memref<1x1x128xf32, #tpu.memory_space<vmem>>, vector<1x1x128xf32>
    %226 = vector.shape_cast %225 : vector<1x1x128xf32> to vector<1x128xf32>
    %c0_84 = arith.constant 0 : index
    %c0_85 = arith.constant 0 : index
    %c0_86 = arith.constant 0 : index
    %227 = vector.load %arg15[%c0_84, %c0_85, %c0_86] : memref<1x1x128xf32, #tpu.memory_space<vmem>>, vector<1x1x128xf32>
    %228 = vector.shape_cast %227 : vector<1x1x128xf32> to vector<1x128xf32>
    %cst_87 = arith.constant dense<0.000000e+00> : vector<8xf32>
    %229 = vector.multi_reduction <add>, %224, %cst_87 [1] : vector<8x128xf32> to vector<8xf32>
    %230 = vector.shape_cast %229 : vector<8xf32> to vector<8x1xf32>
    %cst_88 = arith.constant 1.280000e+02 : f32
    %231 = vector.broadcast %cst_88 : f32 to vector<8x1xf32>
    %232 = arith.divf %230, %231 : vector<8x1xf32>
    %233 = vector.broadcast %232 : vector<8x1xf32> to vector<8x128xf32>
    %234 = arith.subf %224, %233 : vector<8x128xf32>
    %235 = arith.mulf %234, %234 : vector<8x128xf32>
    %cst_89 = arith.constant dense<0.000000e+00> : vector<8xf32>
    %236 = vector.multi_reduction <add>, %235, %cst_89 [1] : vector<8x128xf32> to vector<8xf32>
    %237 = vector.shape_cast %236 : vector<8xf32> to vector<8x1xf32>
    %cst_90 = arith.constant 1.280000e+02 : f32
    %238 = vector.broadcast %cst_90 : f32 to vector<8x1xf32>
    %239 = arith.divf %237, %238 : vector<8x1xf32>
    %cst_91 = arith.constant 9.99999974E-6 : f32
    %240 = vector.broadcast %cst_91 : f32 to vector<8x1xf32>
    %241 = arith.addf %239, %240 : vector<8x1xf32>
    %242 = math.rsqrt %241 : vector<8x1xf32>
    %243 = vector.broadcast %242 : vector<8x1xf32> to vector<8x128xf32>
    %244 = arith.mulf %234, %243 : vector<8x128xf32>
    %245 = vector.broadcast %226 : vector<1x128xf32> to vector<8x128xf32>
    %246 = arith.mulf %244, %245 : vector<8x128xf32>
    %247 = vector.broadcast %228 : vector<1x128xf32> to vector<8x128xf32>
    %248 = arith.addf %246, %247 : vector<8x128xf32>
    %c0_92 = arith.constant 0 : index
    %c0_93 = arith.constant 0 : index
    %249 = vector.load %arg19[%c0_92, %c0_93] : memref<8x128xf32, #tpu.memory_space<vmem>>, vector<8x128xf32>
    tpu.vector_store %arg19[%c0_92, %c0_93], %248 {strides = array<i32>} : memref<8x128xf32, #tpu.memory_space<vmem>>, vector<8x128xf32>,
    %c1_i32 = arith.constant 1 : i32
    %250 = arith.cmpi eq, %arg0, %c1_i32 : i32
    %251 = arith.extui %250 : i1 to i32
    %c0_i32_94 = arith.constant 0 : i32
    %252 = arith.cmpi ne, %251, %c0_i32_94 : i32
    scf.if %252 {
      %c0_95 = arith.constant 0 : index
      %c0_96 = arith.constant 0 : index
      %253 = vector.load %arg16[%c0_95, %c0_96] : memref<128x1xf32, #tpu.memory_space<vmem>>, vector<128x1xf32>
      %cst_97 = arith.constant dense<0.000000e+00> : vector<8x1xf32>
      %254 = tpu.matmul %248, %253, %cst_97 {dimension_numbers = #tpu.dot_dimension_numbers<[1], [0], [0], [1], [0, 0, 1, 1], [], []>} : vector<8x128xf32>, vector<128x1xf32>, vector<8x1xf32> -> vector<8x1xf32>
      %c0_98 = arith.constant 0 : index
      %c0_99 = arith.constant 0 : index
      %255 = vector.load %arg17[%c0_98, %c0_99] : memref<1x1xf32, #tpu.memory_space<vmem>>, vector<1x1xf32>
      %256 = vector.broadcast %255 : vector<1x1xf32> to vector<8x1xf32>
      %257 = arith.addf %254, %256 : vector<8x1xf32>
      %cst_100 = arith.constant dense<0xFF800000> : vector<1xf32>
      %258 = vector.multi_reduction <maximumf>, %257, %cst_100 [0] : vector<8x1xf32> to vector<1xf32>
      %259 = vector.shape_cast %258 : vector<1xf32> to vector<1x1xf32>
      %260 = vector.broadcast %259 : vector<1x1xf32> to vector<8x1xf32>
      %261 = arith.subf %257, %260 : vector<8x1xf32>
      %262 = math.exp %261 : vector<8x1xf32>
      %cst_101 = arith.constant dense<0.000000e+00> : vector<1xf32>
      %263 = vector.multi_reduction <add>, %262, %cst_101 [0] : vector<8x1xf32> to vector<1xf32>
      %264 = vector.shape_cast %263 : vector<1xf32> to vector<1x1xf32>
      %265 = vector.broadcast %264 : vector<1x1xf32> to vector<8x1xf32>
      %266 = arith.divf %262, %265 : vector<8x1xf32>
      %267 = vector.broadcast %266 : vector<8x1xf32> to vector<8x128xf32>
      %268 = arith.mulf %267, %248 : vector<8x128xf32>
      %cst_102 = arith.constant dense<0.000000e+00> : vector<128xf32>
      %269 = vector.multi_reduction <add>, %268, %cst_102 [0] : vector<8x128xf32> to vector<128xf32>
      %270 = vector.shape_cast %269 : vector<128xf32> to vector<1x128xf32>
      %cst_103 = arith.constant dense<0.000000e+00> : vector<1xf32>
      %271 = vector.multi_reduction <add>, %270, %cst_103 [1] : vector<1x128xf32> to vector<1xf32>
      %272 = vector.shape_cast %271 : vector<1xf32> to vector<1x1xf32>
      %c0_104 = arith.constant 0 : index
      %c0_105 = arith.constant 0 : index
      %273 = vector.load %arg18[%c0_104, %c0_105] : memref<1x1xf32, #tpu.memory_space<vmem>>, vector<1x1xf32>
      tpu.vector_store %arg18[%c0_104, %c0_105], %272 {strides = array<i32>} : memref<1x1xf32, #tpu.memory_space<vmem>>, vector<1x1xf32>,
    } else {
    }
    return
  }
  func.func @transform_0(%arg0: i32) -> (i32, i32) {
    %c0_i32 = arith.constant 0 : i32
    %c0_i32_0 = arith.constant 0 : i32
    %c0_i32_1 = arith.constant 0 : i32
    return %c0_i32, %c0_i32_0 : i32, i32
  }
  func.func @transform_1(%arg0: i32) -> (i32, i32) {
    %c0_i32 = arith.constant 0 : i32
    %c0_i32_0 = arith.constant 0 : i32
    %c0_i32_1 = arith.constant 0 : i32
    return %c0_i32, %c0_i32_0 : i32, i32
  }
  func.func @transform_2(%arg0: i32) -> (i32, i32) {
    %c0_i32 = arith.constant 0 : i32
    %c0_i32_0 = arith.constant 0 : i32
    %c0_i32_1 = arith.constant 0 : i32
    return %c0_i32, %c0_i32_0 : i32, i32
  }
  func.func @transform_3(%arg0: i32) -> (i32, i32, i32) {
    %c0_i32 = arith.constant 0 : i32
    %c0_i32_0 = arith.constant 0 : i32
    %c0_i32_1 = arith.constant 0 : i32
    return %arg0, %c0_i32, %c0_i32_0 : i32, i32, i32
  }
  func.func @transform_4(%arg0: i32) -> (i32, i32, i32) {
    %c0_i32 = arith.constant 0 : i32
    %c0_i32_0 = arith.constant 0 : i32
    %c0_i32_1 = arith.constant 0 : i32
    return %arg0, %c0_i32, %c0_i32_0 : i32, i32, i32
  }
  func.func @transform_5(%arg0: i32) -> (i32, i32, i32) {
    %c0_i32 = arith.constant 0 : i32
    %c0_i32_0 = arith.constant 0 : i32
    %c0_i32_1 = arith.constant 0 : i32
    return %arg0, %c0_i32, %c0_i32_0 : i32, i32, i32
  }
  func.func @transform_6(%arg0: i32) -> (i32, i32, i32) {
    %c0_i32 = arith.constant 0 : i32
    %c0_i32_0 = arith.constant 0 : i32
    %c0_i32_1 = arith.constant 0 : i32
    return %arg0, %c0_i32, %c0_i32_0 : i32, i32, i32
  }
  func.func @transform_7(%arg0: i32) -> (i32, i32, i32) {
    %c0_i32 = arith.constant 0 : i32
    %c0_i32_0 = arith.constant 0 : i32
    %c0_i32_1 = arith.constant 0 : i32
    return %arg0, %c0_i32, %c0_i32_0 : i32, i32, i32
  }
  func.func @transform_8(%arg0: i32) -> (i32, i32, i32) {
    %c0_i32 = arith.constant 0 : i32
    %c0_i32_0 = arith.constant 0 : i32
    %c0_i32_1 = arith.constant 0 : i32
    return %arg0, %c0_i32, %c0_i32_0 : i32, i32, i32
  }
  func.func @transform_9(%arg0: i32) -> (i32, i32, i32) {
    %c0_i32 = arith.constant 0 : i32
    %c0_i32_0 = arith.constant 0 : i32
    %c0_i32_1 = arith.constant 0 : i32
    return %arg0, %c0_i32, %c0_i32_0 : i32, i32, i32
  }
  func.func @transform_10(%arg0: i32) -> (i32, i32, i32) {
    %c0_i32 = arith.constant 0 : i32
    %c0_i32_0 = arith.constant 0 : i32
    %c0_i32_1 = arith.constant 0 : i32
    return %arg0, %c0_i32, %c0_i32_0 : i32, i32, i32
  }
  func.func @transform_11(%arg0: i32) -> (i32, i32, i32) {
    %c0_i32 = arith.constant 0 : i32
    %c0_i32_0 = arith.constant 0 : i32
    %c0_i32_1 = arith.constant 0 : i32
    return %arg0, %c0_i32, %c0_i32_0 : i32, i32, i32
  }
  func.func @transform_12(%arg0: i32) -> (i32, i32, i32) {
    %c0_i32 = arith.constant 0 : i32
    %c0_i32_0 = arith.constant 0 : i32
    %c0_i32_1 = arith.constant 0 : i32
    return %arg0, %c0_i32, %c0_i32_0 : i32, i32, i32
  }
  func.func @transform_13(%arg0: i32) -> (i32, i32, i32) {
    %c0_i32 = arith.constant 0 : i32
    %c0_i32_0 = arith.constant 0 : i32
    %c0_i32_1 = arith.constant 0 : i32
    return %arg0, %c0_i32, %c0_i32_0 : i32, i32, i32
  }
  func.func @transform_14(%arg0: i32) -> (i32, i32, i32) {
    %c0_i32 = arith.constant 0 : i32
    %c0_i32_0 = arith.constant 0 : i32
    %c0_i32_1 = arith.constant 0 : i32
    return %arg0, %c0_i32, %c0_i32_0 : i32, i32, i32
  }
  func.func @transform_15(%arg0: i32) -> (i32, i32) {
    %c0_i32 = arith.constant 0 : i32
    %c0_i32_0 = arith.constant 0 : i32
    %c0_i32_1 = arith.constant 0 : i32
    return %c0_i32, %c0_i32_0 : i32, i32
  }
  func.func @transform_16(%arg0: i32) -> (i32, i32) {
    %c0_i32 = arith.constant 0 : i32
    %c0_i32_0 = arith.constant 0 : i32
    %c0_i32_1 = arith.constant 0 : i32
    return %c0_i32, %c0_i32_0 : i32, i32
  }
  func.func @transform_17(%arg0: i32) -> (i32, i32) {
    %c0_i32 = arith.constant 0 : i32
    %c0_i32_0 = arith.constant 0 : i32
    %c0_i32_1 = arith.constant 0 : i32
    return %c0_i32, %c0_i32_0 : i32, i32
  }
}

</mosaic_0001>

<bundles_post_ra>
// kernel: tpu_custom_call.1
= control target key start
LH: loop header
LB: loop body
LE: loop exit
PB: predicated region body
PF: predicated region fallthrough
CT: control target
= control target key end

     0   :  { %s7974_s0 = inlined_call_operand.hbm [shape: f32[8,32], index: 0, kind: input, shape index: {}]   ;;  %s7975_s1 = inlined_call_operand.hbm [shape: bf16[32,128], index: 1, kind: input, shape index: {}]   ;;  %s7976_s2 = inlined_call_operand.hbm [shape: f32[1,128], index: 2, kind: input, shape index: {}]   ;;  %s7977_s3 = inlined_call_operand.hbm [shape: bf16[2,128,384], index: 3, kind: input, shape index: {}]   ;;  %s7978_s4 = inlined_call_operand.hbm [shape: f32[2,1,384], index: 4, kind: input, shape index: {}]   ;;  %s7979_s5 = inlined_call_operand.vmem [shape: bf16[2,128,128], index: 5, kind: input, shape index: {}]   ;;  %s7980_s6 = inlined_call_operand.vmem [shape: f32[2,1,128], index: 6, kind: input, shape index: {}]   ;;  %s7981_s7 = inlined_call_operand.hbm [shape: f32[2,1,128], index: 7, kind: input, shape index: {}]   ;;  %s7982_s8 = inlined_call_operand.hbm [shape: f32[2,1,128], index: 8, kind: input, shape index: {}]   ;;  %s7983_s9 = inlined_call_operand.hbm [shape: bf16[2,128,2048], index: 9, kind: input, shape index: {}]   ;;  %s7984_s10 = inlined_call_operand.vmem [shape: f32[2,1,2048], index: 10, kind: input, shape index: {}]   ;;  %s7985_s11 = inlined_call_operand.hbm [shape: bf16[2,2048,128], index: 11, kind: input, shape index: {}]   ;;  %s7986_s12 = inlined_call_operand.vmem [shape: f32[2,1,128], index: 12, kind: input, shape index: {}]   ;;  %s7987_s13 = inlined_call_operand.vmem [shape: f32[2,1,128], index: 13, kind: input, shape index: {}]   ;;  %s7988_s14 = inlined_call_operand.vmem [shape: f32[2,1,128], index: 14, kind: input, shape index: {}]   ;;  %s7989_s15 = inlined_call_operand.vmem [shape: f32[128,1], index: 15, kind: input, shape index: {}]   ;;  %s7990_s16 = inlined_call_operand.<no memory space> [shape: f32[1,1], index: 16, kind: input, shape index: {}]   ;;  %s7991_s17 = inlined_call_operand.hbm [shape: f32[1,1], index: 17, kind: output, shape index: {}]  }
   0x1   :  { %8025 = sst [smem:[#allocation32_spill]] %s7974_s0  ;;  %v22_v0 = vstv %s7990_s16 }
   0x2   :  { %8026 = sst [smem:[#allocation33_spill]] %s7975_s1  ;;  %23 = vst [vmem:[#allocation3] sm:$0x1] %v22_v0 }
   0x3   :  { %8027 = sst [smem:[#allocation34_spill]] %s7976_s2 }
   0x4   :  { %8028 = sst [smem:[#allocation35_spill]] %s7977_s3 }
   0x5   :  { %8029 = sst [smem:[#allocation36_spill]] %s7978_s4 }
   0x6   :  { %8030 = sst [smem:[#allocation37_spill]] %s7979_s5 }
   0x7   :  { %8031 = sst [smem:[#allocation38_spill]] %s7980_s6 }
   0x8   :  { %8032 = sst [smem:[#allocation39_spill]] %s7981_s7 }
   0x9   :  { %8033 = sst [smem:[#allocation40_spill]] %s7983_s9 }
   0xa   :  { %8034 = sst [smem:[#allocation41_spill]] %s7984_s10 }
   0xb   :  { %8035 = sst [smem:[#allocation42_spill]] %s7986_s12 }
   0xc   :  { %8036 = sst [smem:[#allocation43_spill]] %s7987_s13 }
   0xd   :  { %8037 = sst [smem:[#allocation44_spill]] %s7988_s14 }
   0xe   :  { %8038 = sst [smem:[#allocation45_spill]] %s7989_s15 }
   0xf   :  { %8039 = sst [smem:[#allocation46_spill]] %s7991_s17 }
  0x10   :  { %24 = vsyncpa [#allocation5], 0 }
  0x11   :  { %25 = vsyncpa [#allocation8], 0 }
  0x12   :  { %26 = vsyncpa [#allocation11], 0 }
  0x13   :  { %28 = vsyncpa [#allocation11 + $0x1], 0 }
  0x14   :  { %29 = vsyncpa [#allocation14], 0 }
  0x15   :  { %31 = vsyncpa [#allocation14 + $0x1], 0 }
  0x16   :  { %32 = vsyncpa [#allocation17], 0 }
  0x17   :  { %34 = vsyncpa [#allocation17 + $0x1], 0 }
  0x18   :  { %35 = vsyncpa [#allocation6], 0  ;;  %s6890_s26 = smov 0   ;;  %s6892_s27 = smov 0  }
  0x19   :  { %s6894_s28 = smov 0   ;;  %s6896_s29 = smov 0  }
  0x1a LB: > { %8040 = sst [smem:[#allocation26_spill]] %s6756_s27  ;;  %s6909_s16 = sadd.s32 4294967295, %s6764_s29   ;;  %s6764_s29 = sphi %s6896_s29, %s8100_s29   ;;  %s6760_s28 = sphi %s6894_s28, %s8103_s28   ;;  %s6756_s27 = sphi %s6892_s27, %s8102_s27   ;;  %s6752_s26 = sphi %s6890_s26, %s8101_s26  }
  0x1b   : > { %8041 = sst [smem:[#allocation27_spill]] %s6760_s28  ;;  %s6912_s0 = sadd.s32 1, %s6764_s29  }
  0x1c   : > { %8042 = sst [smem:[#allocation28_spill]] %s6909_s16  ;;  %s108_s30 = ssub.s32 %s6764_s29, %s6912_s0 }
  0x1d   : > { %8043 = sst [smem:[#allocation29_spill]] %s6912_s0  ;;  %s111_s18 = sadd.s32 1, %s6760_s28 }
  0x1e   : > { %p109_p0 = scmp.eq.s32.totalorder %s108_s30, 0  ;;  %p118_p1 = scmp.ne.s32.totalorder %s6760_s28, %s6756_s27 }
  0x1f   : > { %p119_p2 = scmp.eq.s32.totalorder %s6764_s29, 0  ;;  %p124_p3 = scmp.ne.s32.totalorder %s6756_s27, %s6752_s26 }
  0x20   : > { %s6922_s19 = scalar_select %p109_p0, %s6760_s28, %s111_s18  }
  0x21   : > { %p6924_p4 = por %p119_p2, %p118_p1  ;;  %p7999_p5 = scmp.eq.s32.totalorder %s6909_s16, 0 }
  0x22   : > { %8044 = sst [smem:[#allocation30_spill]] %s6922_s19  ;;  %p5278_p6 = scmp.ge.s32.totalorder %s6764_s29, 1 }
  0x23   : > { %p484_p7 = scmp.lt.s32.totalorder %s6764_s29, 3  ;;  %p6933_p8 = por %p7999_p5, %p124_p3 }
  0x24   : > { %s6766_s22 = smov [#allocation7]   ;;  %p6141_p13 = scmp.lt.s32.totalorder %s6764_s29, 2 }
  0x25   : > { %s8046_s20 = scalar_select %p6933_p8, 1, 0 }
  0x26   : > { %p6938_p10 = pnand %p5278_p6, %p484_p7  ;;  %s507_s23 = sshll.u32 %s6766_s22, 4  ;;  %s508_s23 = int_to_ptr.vmem [resolvable:$true] %s507_s23 }
  0x27   : > { %8047 = sst [smem:[#allocation31_spill]] %s8046_s20  ;;  %s6952_s25 = sand.u32 1, %s6764_s29  }
  0x28   : > { %s8048_s21 = scalar_select %p6938_p10, 1, 0 }
  0x29   : > { %p6109_p11 = pneg %p6938_p10  ;;  %s6955_s26 = sand.u32 1, %s6760_s28  }
  0x2a   : > { %p6959_p0 = pnand %p6141_p13, %p6924_p4  ;;  %s8051_s19 = sld [smem:[#allocation33_spill]] }
  0x2b   : > { %p6946_p12 = pnand %p6109_p11, %p7999_p5 }
  0x2c   : > { %s8050_s30 = scalar_select %p6959_p0, 1, 0 }
  0x2d   : > { %s8049_s24 = scalar_select %p6946_p12, 1, 0 }
  0x2e   : > { %p6971_p2 = pneg %p6946_p12 }
  0x30   : > { %s6420_s0 = scalar_lea.hbm %s8051_s19, 256 }
  0x31   : > { %p6421_p1 = scmp.ne.s32.totalorder %s8051_s19, %s6420_s0  ;;  %p6427_p6 = scmp.lt.u32.totalorder %s6420_s0, %s8051_s19 }
  0x32   : > { %s8052_s14 = scalar_select %p6971_p2, 1, 0 }
  0x33   : > { %p6423_p3 = pnand %p6971_p2, %p6421_p1 }
  0x35   : > { %p6424_p4 = pneg %p6423_p3 }
  0x37   : > { %p6429_p7 = pnand %p6427_p6, %p6424_p4 }
  0x39   : > { %6432 = shalt.err (!%p6429_p7)
}
  0x3a   : > { %s6433_s18 = scalar_lea.vmem %s508_s23, 256  ;;  %p6441_p5 = scmp.lt.s32.totalorder %s508_s23, %s508_s23 }
  0x3b   : > { %p6434_p11 = scmp.ne.s32.totalorder %s508_s23, %s6433_s18  ;;  %p6442_p8 = scmp.lt.s32.totalorder %s6433_s18, %s6433_s18 }
  0x3d   : > { %p6436_p13 = pnand %p6434_p11, %p6971_p2  ;;  %p6443_p10 = por %p6442_p8, %p6441_p5 }
  0x3f   : > { %p6437_p9 = pneg %p6436_p13 }
  0x41   : > { %p6444_p0 = pnand %p6443_p10, %p6437_p9 }
  0x43   : > { %6447 = shalt.err (!%p6444_p0)
}
  0x44   : > { %s8010_s15 = smov 64   ;;  %s8009_s17 = smov 4  }
  0x45   : > { %6115 = dma.hbm_to_vmem [thread:$0]  (!%p6946_p12), %s8051_s19, 256, %s508_s23, [#allocation8], %s8010_s15, %s8010_s15, %s8009_s17  }
  0x46   : > { %s6075_s22 = smul.u32 192, %s6955_s26  ;;  %s8053_s3 = sld [smem:[#allocation35_spill]] }
  0x47   : > { %s6076_s1 = smul.u32 3072, %s6764_s29  ;;  %s8012_s6 = scalar_lea.sflag [#allocation11], %s6952_s25 }
  0x48   : > { %s542_s10 = scalar_lea.vmem [#allocation10], %s6075_s22  ;;  %p8054_p8 = scmp.ne.s32.totalorder %s8050_s30, 0 }
  0x49   : > { %s549_s5 = sshll.u32 %s542_s10, 4  ;;  %s6997_s5 = int_to_ptr.vmem [resolvable:$true] %s549_s5 }
  0x4a   : > { %p7004_p9 = pneg %p8054_p8 }
  0x4c   : > { %s6995_s12 = scalar_lea.hbm %s8053_s3, %s6076_s1  ;;  %s6453_s0 = scalar_lea.hbm %s8053_s3, 6144 }
  0x4d   : > { %s6448_s20 = scalar_lea.hbm %s6995_s12, 3072  ;;  %p6454_p1 = scmp.lt.u32.totalorder %s6995_s12, %s8053_s3 }
  0x4e   : > { %p6449_p5 = scmp.ne.s32.totalorder %s6995_s12, %s6448_s20  ;;  %p6455_p3 = scmp.lt.u32.totalorder %s6453_s0, %s6448_s20 }
  0x4f   : > { %s8055_s23 = scalar_select %p7004_p9, 1, 0 }
  0x50   : > { %p6451_p10 = pnand %p7004_p9, %p6449_p5  ;;  %p6456_p4 = por %p6455_p3, %p6454_p1 }
  0x51   : > { %p6457_p6 = scmp.lt.u32.totalorder %s6448_s20, %s6995_s12 }
  0x52   : > { %p6452_p0 = pneg %p6451_p10 }
  0x53   : > { %p6458_p7 = por %p6457_p6, %p6456_p4 }
  0x55   : > { %p6459_p11 = pnand %p6458_p7, %p6452_p0 }
  0x57   : > { %6462 = shalt.err (!%p6459_p11)
}
  0x58   : > { %s6463_s1 = scalar_lea.vmem %s6997_s5, 3072  ;;  %s6769_s18 = smov [#allocation10]  }
  0x59   : > { %p6464_p13 = scmp.ne.s32.totalorder %s6997_s5, %s6463_s1  ;;  %s6468_s13 = sshll.u32 %s6769_s18, 4  ;;  %s6469_s13 = int_to_ptr.vmem [resolvable:$false] %s6468_s13 }
  0x5a   : > { %s6470_s28 = scalar_lea.vmem %s6469_s13, 6144  ;;  %p6471_p12 = scmp.lt.s32.totalorder %s6997_s5, %s6469_s13 }
  0x5b   : > { %p6466_p5 = pnand %p6464_p13, %p7004_p9  ;;  %p6472_p2 = scmp.lt.s32.totalorder %s6470_s28, %s6463_s1 }
  0x5d   : > { %p6467_p10 = pneg %p6466_p5  ;;  %p6473_p1 = por %p6472_p2, %p6471_p12 }
  0x5f   : > { %p6474_p3 = pnand %p6473_p1, %p6467_p10 }
  0x61   : > { %6477 = shalt.err (!%p6474_p3)
}
  0x62   : > { %s6770_s20 = smov 192   ;;  %s6771_s0 = smov 12  }
  0x63   : > { %6122 = dma.hbm_to_vmem [thread:$0]  (!%p8054_p8), %s6995_s12, 3072, %s6997_s5, %s8012_s6, %s6770_s20, %s6770_s20, %s6771_s0  }
  0x64   : > { %s5285_s22 = sshll.u32 %s6764_s29, 4  ;;  %s595_s10 = scalar_lea.vmem [#allocation13], %s6955_s26 }
  0x65   : > { %s602_s1 = sshll.u32 %s595_s10, 4  ;;  %s8056_s7 = sld [smem:[#allocation39_spill]]  ;;  %s603_s1 = int_to_ptr.vmem [resolvable:$true] %s602_s1 }
  0x66   : > { %s8014_s17 = scalar_lea.sflag [#allocation14], %s6952_s25 }
  0x6b   : > { %s7036_s28 = scalar_lea.hbm %s8056_s7, %s5285_s22  ;;  %s6483_s20 = scalar_lea.hbm %s8056_s7, 32 }
  0x6c   : > { %s6478_s15 = scalar_lea.hbm %s7036_s28, 16  ;;  %p6484_p4 = scmp.lt.u32.totalorder %s7036_s28, %s8056_s7 }
  0x6d   : > { %p6479_p12 = scmp.ne.s32.totalorder %s7036_s28, %s6478_s15  ;;  %p6485_p6 = scmp.lt.u32.totalorder %s6483_s20, %s6478_s15 }
  0x6e   : > { %p6487_p11 = scmp.lt.u32.totalorder %s6478_s15, %s7036_s28 }
  0x6f   : > { %p6481_p2 = pnand %p6479_p12, %p7004_p9  ;;  %p6486_p7 = por %p6485_p6, %p6484_p4 }
  0x71   : > { %p6482_p0 = pneg %p6481_p2  ;;  %p6488_p13 = por %p6487_p11, %p6486_p7 }
  0x73   : > { %p6489_p5 = pnand %p6488_p13, %p6482_p0 }
  0x75   : > { %6492 = shalt.err (!%p6489_p5)
}
  0x76   : > { %s6493_s18 = scalar_lea.vmem %s603_s1, 16  ;;  %s6772_s13 = smov [#allocation13]  }
  0x77   : > { %p6494_p10 = scmp.ne.s32.totalorder %s603_s1, %s6493_s18  ;;  %s6498_s6 = sshll.u32 %s6772_s13, 4  ;;  %s6499_s6 = int_to_ptr.vmem [resolvable:$false] %s6498_s6 }
  0x78   : > { %s6500_s5 = scalar_lea.vmem %s6499_s6, 32  ;;  %p6501_p12 = scmp.lt.s32.totalorder %s603_s1, %s6499_s6 }
  0x79   : > { %p6496_p1 = pnand %p6494_p10, %p7004_p9  ;;  %p6502_p2 = scmp.lt.s32.totalorder %s6500_s5, %s6493_s18 }
  0x7b   : > { %p6497_p3 = pneg %p6496_p1  ;;  %p6503_p8 = por %p6502_p2, %p6501_p12 }
  0x7d   : > { %p6504_p4 = pnand %p6503_p8, %p6497_p3 }
  0x7f   : > { %6507 = shalt.err (!%p6504_p4)
}
  0x80   : > { %p8057_p6 = scmp.ne.s32.totalorder %s8050_s30, 0  ;;  %s8015_s15 = sshll.u32 %s6955_s26, 10 }
  0x81   : > { %s5623_s12 = sshll.u32 %s6764_s29, 14  ;;  %s8058_s9 = sld [smem:[#allocation40_spill]] }
  0x82   : > { %6128 = dma.hbm_to_vmem [thread:$0]  (!%p8057_p6), %s7036_s28, 16, %s603_s1, %s8014_s17  }
  0x83   : > { %s630_s10 = scalar_lea.vmem [#allocation16], %s8015_s15  ;;  %s8018_s13 = scalar_lea.sflag [#allocation17], %s6952_s25 }
  0x84   : > { %s637_s18 = sshll.u32 %s630_s10, 4  ;;  %s7069_s18 = int_to_ptr.vmem [resolvable:$true] %s637_s18 }
  0x87   : > { %s7065_s0 = scalar_lea.hbm %s8058_s9, %s5623_s12  ;;  %s6513_s6 = scalar_lea.hbm %s8058_s9, 32768 }
  0x88   : > { %s6508_s5 = scalar_lea.hbm %s7065_s0, 16384  ;;  %p6514_p11 = scmp.lt.u32.totalorder %s7065_s0, %s8058_s9 }
  0x89   : > { %p6509_p8 = scmp.ne.s32.totalorder %s7065_s0, %s6508_s5  ;;  %p6515_p13 = scmp.lt.u32.totalorder %s6513_s6, %s6508_s5 }
  0x8a   : > { %p6517_p10 = scmp.lt.u32.totalorder %s6508_s5, %s7065_s0 }
  0x8b   : > { %p6511_p0 = pnand %p6509_p8, %p7004_p9  ;;  %p6516_p5 = por %p6515_p13, %p6514_p11 }
  0x8d   : > { %p6512_p7 = pneg %p6511_p0  ;;  %p6518_p1 = por %p6517_p10, %p6516_p5 }
  0x8f   : > { %p6519_p3 = pnand %p6518_p1, %p6512_p7 }
  0x91   : > { %6522 = shalt.err (!%p6519_p3)
}
  0x92   : > { %s6523_s10 = scalar_lea.vmem %s7069_s18, 16384  ;;  %s6773_s1 = smov [#allocation16]  }
  0x93   : > { %p6524_p12 = scmp.ne.s32.totalorder %s7069_s18, %s6523_s10  ;;  %s6528_s28 = sshll.u32 %s6773_s1, 4  ;;  %s6529_s28 = int_to_ptr.vmem [resolvable:$false] %s6528_s28 }
  0x94   : > { %s6530_s17 = scalar_lea.vmem %s6529_s28, 32768  ;;  %p6531_p8 = scmp.lt.s32.totalorder %s7069_s18, %s6529_s28 }
  0x95   : > { %p6526_p2 = pnand %p6524_p12, %p7004_p9  ;;  %p6532_p0 = scmp.lt.s32.totalorder %s6530_s17, %s6523_s10 }
  0x97   : > { %p6527_p4 = pneg %p6526_p2  ;;  %p6533_p11 = por %p6532_p0, %p6531_p8 }
  0x99   : > { %p6534_p13 = pnand %p6533_p11, %p6527_p4 }
  0x9b   : > { %6537 = shalt.err (!%p6534_p13)
}
  0x9c   : > { %s6774_s5 = smov 1024   ;;  %s8059_s6 = smov 64  }
  0x9d   : > { %6134 = dma.hbm_to_vmem [thread:$0]  (!%p8057_p6), %s7065_s0, 16384, %s7069_s18, %s8018_s13, %s6774_s5, %s6774_s5, %s8059_s6  }
  0x9e   : > { %s7101_s10 = scalar_lea.hbm %s7982_s8, %s5285_s22  ;;  %s7108_s15 = scalar_lea.hbm %s7985_s11, %s5623_s12 }
  0x9f   : > { %s8060_s3 = sshll.u32 %s6955_s26, 10  ;;  %s6775_s19 = smov [#allocation4]  }
  0xa0   : > { %s7112_s7 = scalar_lea.vmem [#allocation18], %s8060_s3  ;;  %s497_s27 = sshll.u32 %s6775_s19, 4  ;;  %s498_s27 = int_to_ptr.vmem [resolvable:$true] %s497_s27 }
  0xa1   : > { %s665_s9 = sshll.u32 %s7112_s7, 4  ;;  %s6776_s0 = smov [#allocation9]   ;;  %s7172_s9 = int_to_ptr.vmem [resolvable:$true] %s665_s9 }
  0xa2   : > { %s521_s18 = sshll.u32 %s6776_s0, 4  ;;  %s8061_s22 = sld [smem:[#allocation32_spill]]  ;;  %s522_s18 = int_to_ptr.vmem [resolvable:$true] %s521_s18 }
  0xa3   : > { %p8062_p5 = scmp.ne.s32.totalorder %s8052_s14, 0 }
  0xa8   : > { %s6538_s1 = scalar_lea.hbm %s8061_s22, 128 }
  0xa9   : > { %p6539_p7 = scmp.ne.s32.totalorder %s8061_s22, %s6538_s1  ;;  %p6545_p3 = scmp.lt.u32.totalorder %s6538_s1, %s8061_s22 }
  0xab   : > { %p6541_p10 = pnand %p6539_p7, %p8062_p5 }
  0xad   : > { %p6542_p1 = pneg %p6541_p10 }
  0xaf   : > { %p6547_p12 = pnand %p6545_p3, %p6542_p1 }
  0xb1   : > { %6550 = shalt.err (!%p6547_p12)
}
  0xb2   : > { %s6551_s19 = scalar_lea.vmem %s498_s27, 128  ;;  %p6559_p0 = scmp.lt.s32.totalorder %s498_s27, %s498_s27 }
  0xb3   : > { %p6552_p2 = scmp.ne.s32.totalorder %s498_s27, %s6551_s19  ;;  %p6560_p11 = scmp.lt.s32.totalorder %s6551_s19, %s6551_s19 }
  0xb5   : > { %p6554_p4 = pnand %p6552_p2, %p8062_p5  ;;  %p6561_p13 = por %p6560_p11, %p6559_p0 }
  0xb7   : > { %p6555_p8 = pneg %p6554_p4 }
  0xb9   : > { %p6562_p6 = pnand %p6561_p13, %p6555_p8 }
  0xbb   : > { %6565 = shalt.err (!%p6562_p6)
}
  0xbc   : > { %p8063_p7 = scmp.ne.s32.totalorder %s8049_s24, 0  ;;  %s6077_s28 = smul.u32 3, %s6955_s26 }
  0xbd   : > { %s8064_s2 = sld [smem:[#allocation34_spill]] }
  0xbe   : > { %6112 = dma.hbm_to_vmem [thread:$0]  (!%p8063_p7), %s8061_s22, 128, %s498_s27, [#allocation5]  }
  0xc3   : > { %s6566_s5 = scalar_lea.hbm %s8064_s2, 16 }
  0xc4   : > { %p6567_p10 = scmp.ne.s32.totalorder %s8064_s2, %s6566_s5  ;;  %p6573_p3 = scmp.lt.u32.totalorder %s6566_s5, %s8064_s2 }
  0xc6   : > { %p6569_p6 = pnand %p6567_p10, %p8062_p5 }
  0xc8   : > { %p6570_p1 = pneg %p6569_p6 }
  0xca   : > { %p6575_p12 = pnand %p6573_p3, %p6570_p1 }
  0xcc   : > { %6578 = shalt.err (!%p6575_p12)
}
  0xcd   : > { %s6579_s27 = scalar_lea.vmem %s522_s18, 16  ;;  %s6586_s19 = scalar_lea.vmem %s522_s18, 32 }
  0xce   : > { %p6580_p2 = scmp.ne.s32.totalorder %s522_s18, %s6579_s27  ;;  %p6587_p0 = scmp.lt.s32.totalorder %s522_s18, %s522_s18 }
  0xcf   : > { %p6588_p11 = scmp.lt.s32.totalorder %s6586_s19, %s6579_s27 }
  0xd0   : > { %p6582_p4 = pnand %p6580_p2, %p8062_p5 }
  0xd1   : > { %p6589_p13 = por %p6588_p11, %p6587_p0 }
  0xd2   : > { %p6583_p8 = pneg %p6582_p4 }
  0xd4   : > { %p6590_p9 = pnand %p6589_p13, %p6583_p8 }
  0xd6   : > { %6593 = shalt.err (!%p6590_p9)
}
  0xd7   : > { %6118 = dma.hbm_to_vmem [thread:$0]  (!%p8063_p7), %s8064_s2, 16, %s522_s18, [#allocation8]  }
  0xd8   : > { %s6078_s17 = smul.u32 48, %s6764_s29  ;;  %s563_s0 = scalar_lea.vmem [#allocation12], %s6077_s28 }
  0xd9   : > { %s571_s5 = sshll.u32 %s563_s0, 4  ;;  %s8065_s4 = sld [smem:[#allocation36_spill]]  ;;  %s572_s5 = int_to_ptr.vmem [resolvable:$true] %s571_s5 }
  0xda   : > { %p8066_p10 = scmp.ne.s32.totalorder %s8055_s23, 0 }
  0xdf   : > { %s569_s1 = scalar_lea.hbm %s8065_s4, %s6078_s17  ;;  %s6599_s27 = scalar_lea.hbm %s8065_s4, 96 }
  0xe0   : > { %s6594_s3 = scalar_lea.hbm %s569_s1, 48  ;;  %p6600_p7 = scmp.lt.u32.totalorder %s569_s1, %s8065_s4 }
  0xe1   : > { %p6595_p5 = scmp.ne.s32.totalorder %s569_s1, %s6594_s3  ;;  %p6601_p1 = scmp.lt.u32.totalorder %s6599_s27, %s6594_s3 }
  0xe2   : > { %p6603_p12 = scmp.lt.u32.totalorder %s6594_s3, %s569_s1 }
  0xe3   : > { %p6597_p9 = pnand %p6595_p5, %p8066_p10  ;;  %p6602_p3 = por %p6601_p1, %p6600_p7 }
  0xe5   : > { %p6598_p6 = pneg %p6597_p9  ;;  %p6604_p2 = por %p6603_p12, %p6602_p3 }
  0xe7   : > { %p6605_p4 = pnand %p6604_p2, %p6598_p6 }
  0xe9   : > { %6608 = shalt.err (!%p6605_p4)
}
  0xea   : > { %s6609_s29 = scalar_lea.vmem %s572_s5, 48  ;;  %s6777_s18 = smov [#allocation12]  }
  0xeb   : > { %p6610_p8 = scmp.ne.s32.totalorder %s572_s5, %s6609_s29  ;;  %s6614_s28 = sshll.u32 %s6777_s18, 4  ;;  %s6615_s28 = int_to_ptr.vmem [resolvable:$false] %s6614_s28 }
  0xec   : > { %s6616_s13 = scalar_lea.vmem %s6615_s28, 96  ;;  %p6617_p13 = scmp.lt.s32.totalorder %s572_s5, %s6615_s28 }
  0xed   : > { %p6612_p0 = pnand %p6610_p8, %p8066_p10  ;;  %p6618_p5 = scmp.lt.s32.totalorder %s6616_s13, %s6609_s29 }
  0xef   : > { %p6613_p11 = pneg %p6612_p0  ;;  %p6619_p9 = por %p6618_p5, %p6617_p13 }
  0xf1   : > { %p6620_p1 = pnand %p6619_p9, %p6613_p11 }
  0xf3   : > { %6623 = shalt.err (!%p6620_p1)
}
  0xf4   : > { %p8067_p7 = scmp.ne.s32.totalorder %s8050_s30, 0  ;;  %s8068_s17 = scalar_lea.sflag [#allocation11], %s6952_s25 }
  0xf5   : > { %s612_s0 = scalar_lea.vmem [#allocation15], %s6955_s26  ;;  %s6624_s20 = scalar_lea.hbm %s7101_s10, 16 }
  0xf6   : > { %6125 = dma.hbm_to_vmem [thread:$0]  (!%p8067_p7), %s569_s1, 48, %s572_s5, %s8068_s17  }
  0xf7   : > { %s619_s14 = sshll.u32 %s612_s0, 4  ;;  %p6625_p6 = scmp.ne.s32.totalorder %s7101_s10, %s6624_s20  ;;  %s620_s14 = int_to_ptr.vmem [resolvable:$true] %s619_s14 }
  0xf8   : > { %s6629_s12 = scalar_lea.hbm %s7982_s8, 32  ;;  %p6630_p2 = scmp.lt.u32.totalorder %s7101_s10, %s7982_s8 }
  0xf9   : > { %p6627_p3 = pnand %p6625_p6, %p8066_p10  ;;  %p6631_p4 = scmp.lt.u32.totalorder %s6629_s12, %s6624_s20 }
  0xfa   : > { %p6633_p0 = scmp.lt.u32.totalorder %s6624_s20, %s7101_s10 }
  0xfb   : > { %p6628_p12 = pneg %p6627_p3  ;;  %p6632_p8 = por %p6631_p4, %p6630_p2 }
  0xfd   : > { %p6634_p11 = por %p6633_p0, %p6632_p8 }
  0xff   : > { %p6635_p13 = pnand %p6634_p11, %p6628_p12 }
 0x101   : > { %6638 = shalt.err (!%p6635_p13)
}
 0x102   : > { %s6639_s7 = scalar_lea.vmem %s620_s14, 16  ;;  %s6778_s26 = smov [#allocation15]  }
 0x103   : > { %p6640_p5 = scmp.ne.s32.totalorder %s620_s14, %s6639_s7  ;;  %s6644_s5 = sshll.u32 %s6778_s26, 4  ;;  %s6645_s5 = int_to_ptr.vmem [resolvable:$false] %s6644_s5 }
 0x104   : > { %s6646_s1 = scalar_lea.vmem %s6645_s5, 32  ;;  %p6647_p6 = scmp.lt.s32.totalorder %s620_s14, %s6645_s5 }
 0x105   : > { %p6642_p9 = pnand %p6640_p5, %p8066_p10  ;;  %p6648_p3 = scmp.lt.s32.totalorder %s6646_s1, %s6639_s7 }
 0x107   : > { %p6643_p1 = pneg %p6642_p9  ;;  %p6649_p7 = por %p6648_p3, %p6647_p6 }
 0x109   : > { %p6650_p2 = pnand %p6649_p7, %p6643_p1 }
 0x10b   : > { %6653 = shalt.err (!%p6650_p2)
}
 0x10c   : > { %p8069_p4 = scmp.ne.s32.totalorder %s8050_s30, 0  ;;  %s8070_s16 = scalar_lea.sflag [#allocation14], %s6952_s25 }
 0x10d   : > { %s6654_s29 = scalar_lea.hbm %s7108_s15, 16384  ;;  %s6659_s13 = scalar_lea.hbm %s7985_s11, 32768 }
 0x10e   : > { %6131 = dma.hbm_to_vmem [thread:$0]  (!%p8069_p4), %s7101_s10, 16, %s620_s14, %s8070_s16  }
 0x10f   : > { %p6655_p12 = scmp.ne.s32.totalorder %s7108_s15, %s6654_s29  ;;  %p6660_p7 = scmp.lt.u32.totalorder %s7108_s15, %s7985_s11 }
 0x110   : > { %p6661_p11 = scmp.lt.u32.totalorder %s6659_s13, %s6654_s29  ;;  %p6663_p5 = scmp.lt.u32.totalorder %s6654_s29, %s7108_s15 }
 0x111   : > { %p6657_p8 = pnand %p6655_p12, %p8066_p10 }
 0x112   : > { %p6662_p13 = por %p6661_p11, %p6660_p7 }
 0x113   : > { %p6658_p0 = pneg %p6657_p8 }
 0x114   : > { %p6664_p9 = por %p6663_p5, %p6662_p13 }
 0x116   : > { %p6665_p1 = pnand %p6664_p9, %p6658_p0 }
 0x118   : > { %6668 = shalt.err (!%p6665_p1)
}
 0x119   : > { %s6669_s10 = scalar_lea.vmem %s7172_s9, 16384  ;;  %s6779_s14 = smov [#allocation18]  }
 0x11a   : > { %p6670_p6 = scmp.ne.s32.totalorder %s7172_s9, %s6669_s10  ;;  %s6674_s20 = sshll.u32 %s6779_s14, 4  ;;  %s6675_s20 = int_to_ptr.vmem [resolvable:$false] %s6674_s20 }
 0x11b   : > { %s6676_s3 = scalar_lea.vmem %s6675_s20, 32768  ;;  %p6677_p12 = scmp.lt.s32.totalorder %s7172_s9, %s6675_s20 }
 0x11c   : > { %p6672_p3 = pnand %p6670_p6, %p8066_p10  ;;  %p6678_p8 = scmp.lt.s32.totalorder %s6676_s3, %s6669_s10 }
 0x11e   : > { %p6673_p2 = pneg %p6672_p3  ;;  %p6679_p7 = por %p6678_p8, %p6677_p12 }
 0x120   : > { %p6680_p11 = pnand %p6679_p7, %p6673_p2 }
 0x122   : > { %6683 = shalt.err (!%p6680_p11)
}
 0x123   : > { %s8071_s24 = smov 4   ;;  %s8072_s12 = scalar_lea.sflag [#allocation17], %s6952_s25 }
 0x124   : > { %6137 = dma.hbm_to_vmem [thread:$0]  (!%p8069_p4), %s7108_s15, 16384, %s7172_s9, %s8072_s12, %s8059_s6, %s8059_s6, %s8071_s24  }
 0x125   : > { %p8073_p10 = scmp.ne.s32.totalorder %s8048_s21, 0 }
 0x126   : > { %s8074_s23 = sld [smem:[#allocation28_spill]] (!%p8073_p10) }
 0x127   : > { %695 = sbr.rel (%p8073_p10) target bundleno = 4316 (0x10dc), region = 88 }
 0x12c   : > { %p8075_p0 = scmp.eq.s32.totalorder (!%p8073_p10), %s8074_s23, 0 }
 0x12e   : > { %6727 = dma.done.wait (%p8075_p0), [#allocation5], 128   ;;  %p8076_p13 = pmov %p8075_p0 }
 0x12f   : > { %p8077_p5 = pmov %p8075_p0 }
 0x130   : > { %6729 = vsyncadd (%p8076_p13), [#allocation5], 4294967168 }
 0x131   : > { %6731 = dma.done.wait (%p8077_p5), [#allocation8], 272   ;;  %p8078_p9 = pmov %p8075_p0 }
 0x132   : > { %s8079_s25 = sld [smem:[#allocation26_spill]]  ;;  %s8080_s30 = sld [smem:[#allocation31_spill]] }
 0x133   : > { %6733 = vsyncadd (%p8078_p9), [#allocation8], 4294967024  ;;  %s709_s27 = sand.u32 1, %s8074_s23  }
 0x134   : > { %s710_s15 = scalar_lea.sflag [#allocation11], %s709_s27 }
 0x138   : > { %s7232_s9 = sand.u32 1, %s8079_s25   ;;  %p8081_p4 = scmp.ne.s32.totalorder %s8080_s30, 0 }
 0x139   : > { %s6079_s21 = smul.u32 192, %s7232_s9 }
 0x13b   : > { %s7235_s6 = scalar_lea.vmem [#allocation10], %s6079_s21 }
 0x13c   : > { %6735 = dma.done.wait (%p8081_p4), %s710_s15, 3120  }
 0x13d   : > { %6737 = vsyncadd (%p8081_p4), %s710_s15, 4294964176  ;;  %s6080_s19 = smul.u32 3, %s7232_s9  ;;  %s728_s26 = scalar_lea.sflag [#allocation14], %s709_s27 }
 0x13f   : > { %s7242_s7 = scalar_lea.vmem [#allocation12], %s6080_s19 }
 0x140   : > { %6739 = dma.done.wait (%p8081_p4), %s728_s26, 32  }
 0x141   : > { %6741 = vsyncadd (%p8081_p4), %s728_s26, 4294967264  ;;  %s5297_s1 = sshll.u32 %s7232_s9, 10  ;;  %s744_s29 = scalar_lea.sflag [#allocation17], %s709_s27 }
 0x142   : > { %s7251_s18 = scalar_lea.vmem [#allocation16], %s5297_s1 }
 0x143   : > { %6743 = dma.done.wait (%p8081_p4), %s744_s29, 32768  }
 0x144   : > { %6745 = vsyncadd (%p8081_p4), %s744_s29, 4294934528  ;;  %p846_p1 = scmp.lt.s32.totalorder %s8074_s23, 1  ;;  %s8083_s24 = sld [smem:[#allocation37_spill]] }
 0x145   : > { %s8084_s21 = sld [smem:[#allocation41_spill]]  ;;  %s8085_s29 = sld [smem:[#allocation42_spill]] }
 0x146   : > { %s7259_s28 = scalar_select %p846_p1, %s8074_s23, 1 }
 0x147   : > { %s8086_s4 = sld [smem:[#allocation43_spill]]  ;;  %s8087_s14 = sld [smem:[#allocation44_spill]] }
 0x148   : > { %s5625_s13 = sshll.u32 %s7259_s28, 6  ;;  %s5301_s25 = sshll.u32 %s7259_s28, 4 }
 0x149   : > { %p8088_p6 = scmp.ne.s32.totalorder %s8074_s23, 0 }
 0x14a   : > { %s7269_s12 = scalar_lea.vmem %s8083_s24, %s5625_s13  ;;  %s7289_s13 = scalar_lea.vmem [#allocation18], %s5297_s1  ;;  %v6204_v1 = vld [vmem:[#allocation7] sm:$0xff] (!%p8088_p6)   ;;  %v6780_v2 = vmov (!%p8088_p6), 0.0   ;;  %v6205_v3 = vld [vmem:[#allocation7 + $0x8] sm:$0xff] (!%p8088_p6)   ;;  %vm6781_vm0 = vmmov (!%p8088_p6), 0   ;;  %v872_v4 = vld [vmem:[#allocation4] sm:$0xff] (!%p8088_p6) }
 0x14b   : > { %s7275_s15 = scalar_lea.vmem %s8084_s21, %s5301_s25  ;;  %s860_s16 = scalar_lea.vmem %s8085_s29, %s7259_s28  ;;  %5872 = vmatprep.subr.bf16.mxu0 (!%p8088_p6), %v6780_v2  ;;  %5876 = vmatprep.mubr.msk.bf16.mxu0 (!%p8088_p6), %vm6781_vm0, %v6780_v2  ;;  %v873_v5 = vpack.c.bf16 (!%p8088_p6), %v872_v4, %v872_v4  ;;  %vm897_vm1 = vcmask (!%p8088_p6), 261120   ;;  %v5303_v6 = vld [vmem:[#allocation9] ss:$0 sm:$0xff] (!%p8088_p6) }
 0x14c   : > { %871 = sbr.rel (%p8088_p6) target bundleno = 616 (0x268), region = 128  ;;  %5873 = vmatpush3.bf16.msra.mxu0 (!%p8088_p6), %v6204_v1 }
 0x14d   : > { %s863_s17 = scalar_lea.vmem %s8086_s4, %s7259_s28  ;;  %s866_s20 = scalar_lea.vmem %s8087_s14, %s7259_s28  ;;  %5874 = vmatprep.subr.bf16.mxu0 (!%p8088_p6), %v6780_v2 }
 0x150   : > { %5875 = vmatpush3.bf16.msra.mxu0 (!%p8088_p6), %v6205_v3 }
 0x153   : > { %5877 = vmatmul.mubr.msk.bf16.vlgmr.msra.gmra.mrb[0].mxu0 %vm897_vm1, %v873_v5 }
 0x226   : > { %v935_v7 = vpop.f32.mrb[0].mxu0 }
 0x227   : > { %v936_v8 = vadd.f32 %v5303_v6, %v935_v7  ;;  %v5878_v9 = vpop.f32.mrb[1].mxu0 }
 0x228   : > { %v938_v10 = vpop.f32.mrb[2].mxu0 }
 0x229   : > { %v941_v11 = vrot.slane %v936_v8, 4  ;;  %v5879_v12 = vpop.f32.mrb[3].mxu0 }
 0x22b   : > { %v942_v13 = vadd.f32 %v941_v11, %v936_v8 }
 0x22d   : > { %v943_v14 = vrot.slane %v942_v13, 2 }
 0x22f   : > { %v944_v15 = vadd.f32 %v943_v14, %v942_v13 }
 0x231   : > { %v945_v16 = vrot.slane %v944_v15, 1 }
 0x233   : > { %v946_v17 = vadd.f32 %v945_v16, %v944_v15 }
 0x235   : > { %v948_v18 = vmul.f32 0.125, %v946_v17 }
 0x237   : > { %v949_v19 = vsub.f32 %v936_v8, %v948_v18 }
 0x239   : > { %v950_v20 = vmul.f32 %v949_v19, %v949_v19 }
 0x23b   : > { %v951_v21 = vrot.slane %v950_v20, 4 }
 0x23d   : > { %v952_v22 = vadd.f32 %v951_v21, %v950_v20 }
 0x23f   : > { %v953_v23 = vrot.slane %v952_v22, 2 }
 0x241   : > { %v954_v24 = vadd.f32 %v953_v23, %v952_v22 }
 0x243   : > { %v955_v25 = vrot.slane %v954_v24, 1 }
 0x245   : > { %v956_v26 = vadd.f32 %v955_v25, %v954_v24 }
 0x247   : > { %v958_v27 = vmul.f32 0.14285715, %v956_v26 }
 0x249   : > { %6206 = vrsqrt.f32 %v958_v27  ;;  %vm961_vm2 = vcmp.eq.f32.partialorder %v958_v27, inf  ;;  %v964_v30 = vand.u32 2147483648, %v958_v27  ;;  %vm963_vm3 = vcmp.eq.f32.partialorder %v958_v27, 0.0 }
 0x253   : > { %v6207_v28 = vpop.eup %6206 }
 0x254   : > { %v960_v29 = vmul.f32 %v6207_v28, %v958_v27 }
 0x256   : > { %v962_v31 = vsel %vm961_vm2, %v958_v27, %v960_v29 }
 0x257   : > { %v965_v32 = vsel %vm963_vm3, %v964_v30, %v962_v31 }
 0x258   : > { %v966_v33 = vadd.f32 1e-06, %v965_v32 }
 0x25a   : > { %6208 = vrcp.f32 %v966_v33 }
 0x264   : > { %v6209_v34 = vpop.eup %6208 }
 0x265   : > { %v968_v35 = vmul.f32 %v6209_v34, %v949_v19 }
 0x267   : > { %969 = vst [vmem:[#allocation2] sm:$0xff] %v968_v35 }
 0x268 PF: > { %v6210_v36 = vld [vmem:[%s7235_s6 + $0x4] ss:$12 sps:$4 sm:$0xff]   ;;  %v6212_v37 = vld [vmem:[%s7235_s6] ss:$12 sps:$4 sm:$0xff]   ;;  %v6782_v38 = vmov 0   ;;  %v6783_v39 = vmov 0.0   ;;  %v1006_v0 = vlaneseq }
 0x269   : > { %1181 = vmatprep.mubr.bf16.mxu0 %v6782_v38  ;;  %5880 = vmatprep.subr.bf16.mxu1 %v6783_v39  ;;  %v6213_v40 = vld [vmem:[%s7235_s6 + $0x1c] ss:$12 sps:$4 sm:$0xff]   ;;  %v6215_v41 = vld [vmem:[%s7235_s6 + $0x18] ss:$12 sps:$4 sm:$0xff]   ;;  %v6216_v42 = vld [vmem:[%s7235_s6 + $0x34] ss:$12 sps:$4 sm:$0xff]  }
 0x26a   : > { %1149 = vmatprep.subr.bf16.mxu0 %v6210_v36  ;;  %v6218_v43 = vld [vmem:[%s7235_s6 + $0x30] ss:$12 sps:$4 sm:$0xff]   ;;  %v6219_v44 = vld [vmem:[%s7235_s6 + $0x4c] ss:$12 sps:$4 sm:$0xff]   ;;  %v6221_v45 = vld [vmem:[%s7235_s6 + $0x48] ss:$12 sps:$4 sm:$0xff]  }
 0x26b   : > { %1150 = vmatpush1.bf16.msra.mxu0 %v6212_v37  ;;  %v6234_v46 = vld [vmem:[%s7235_s6 + $0x8] ss:$12 sps:$4 sm:$0xff]   ;;  %v6222_v47 = vld [vmem:[%s7235_s6 + $0x64] ss:$12 sps:$4 sm:$0xff]   ;;  %v6235_v48 = vld [vmem:[%s7235_s6 + $0x20] ss:$12 sps:$4 sm:$0xff]  }
 0x26c   : > { %1151 = vmatprep.subr.bf16.mxu0 %v6213_v40  ;;  %5881 = vmatpush3.bf16.msra.mxu1 %v6234_v46  ;;  %v6224_v49 = vld [vmem:[%s7235_s6 + $0x60] ss:$12 sps:$4 sm:$0xff]   ;;  %v6225_v50 = vld [vmem:[%s7235_s6 + $0x7c] ss:$12 sps:$4 sm:$0xff]   ;;  %v6227_v51 = vld [vmem:[%s7235_s6 + $0x78] ss:$12 sps:$4 sm:$0xff]  }
 0x26d   : > { %5882 = vmatprep.subr.bf16.mxu1 %v6783_v39  ;;  %v6236_v52 = vld [vmem:[%s7235_s6 + $0x38] ss:$12 sps:$4 sm:$0xff]   ;;  %v6228_v53 = vld [vmem:[%s7235_s6 + $0x94] ss:$12 sps:$4 sm:$0xff]   ;;  %v6237_v54 = vld [vmem:[%s7235_s6 + $0x50] ss:$12 sps:$4 sm:$0xff]  }
 0x26e   : > { %v6230_v55 = vld [vmem:[%s7235_s6 + $0x90] ss:$12 sps:$4 sm:$0xff]   ;;  %v6231_v56 = vld [vmem:[%s7235_s6 + $0xac] ss:$12 sps:$4 sm:$0xff]   ;;  %v6238_v57 = vld [vmem:[%s7235_s6 + $0x68] ss:$12 sps:$4 sm:$0xff]  }
 0x26f   : > { %1152 = vmatpush1.bf16.msra.mxu0 %v6215_v41  ;;  %v6233_v58 = vld [vmem:[%s7235_s6 + $0xa8] ss:$12 sps:$4 sm:$0xff]   ;;  %v970_v59 = vld [vmem:[#allocation2] sm:$0xff]  ;;  %vm6784_vm4 = vmmov 0   ;;  %v7334_v1 = vshrl.u32 %v1006_v0, 7  ;;  %vm1233_vm5 = vcmask 130048  }
 0x270   : > { %1153 = vmatprep.subr.bf16.mxu0 %v6216_v42  ;;  %5883 = vmatpush3.bf16.msra.mxu1 %v6235_v48  ;;  %v6239_v60 = vld [vmem:[%s7235_s6 + $0x80] ss:$12 sps:$4 sm:$0xff]   ;;  %v971_v61 = vpack.c.bf16 %v970_v59, %v970_v59  ;;  %v6240_v62 = vld [vmem:[%s7235_s6 + $0x98] ss:$12 sps:$4 sm:$0xff]   ;;  %v6241_v63 = vld [vmem:[%s7235_s6 + $0xb0] ss:$12 sps:$4 sm:$0xff]  }
 0x271   : > { %5884 = vmatprep.subr.bf16.mxu1 %v6783_v39  ;;  %5896 = vmatprep.mubr.msk.bf16.mxu1 %vm6784_vm4, %v6783_v39  ;;  %v7337_v2 = vsub.s32 1, %v7334_v1  ;;  %v1004_v3 = vld [vmem:[%s7242_s7] sm:$0x7]  ;;  %v7341_v4 = vsub.s32 0, %v7334_v1  ;;  %s6785_s2 = smov 112   ;;  %s6786_s4 = smov 96  }
 0x272   : > { %s6787_s23 = smov 80   ;;  %s6788_s6 = smov 64   ;;  %v7361_v16 = vsub.s32 2, %v7334_v1  ;;  %vm1297_vm6 = vcmask 1043456   ;;  %vm1281_vm7 = vcmask 64512   ;;  %vm2150_vm8 = vcmask 261120  }
 0x273   : > { %1154 = vmatpush1.bf16.msra.mxu0 %v6218_v43  ;;  %v1013_v5 = vrot.slane %v1004_v3, %v7337_v2  ;;  %v1009_v6 = vrot.slane %v1004_v3, %v7341_v4  ;;  %s6789_s7 = smov 48   ;;  %s6790_s5 = smov 32   ;;  %vm2152_vm9 = vcmask 392192   ;;  %vm2154_vm10 = vcmask 523264  }
 0x274   : > { %1155 = vmatprep.subr.bf16.mxu0 %v6219_v44  ;;  %5885 = vmatpush3.bf16.msra.mxu1 %v6236_v52  ;;  %s6791_s1 = smov 16   ;;  %v1017_v17 = vrot.slane %v1004_v3, %v7361_v16  ;;  %vm2156_vm11 = vcmask 654336   ;;  %vm2158_vm12 = vcmask 785408   ;;  %vm2160_vm13 = vcmask 916480   ;;  %s8089_s24 = sld [smem:[#allocation38_spill]] }
 0x275   : > { %5886 = vmatprep.subr.bf16.mxu1 %v6783_v39  ;;  %s8091_s25 = scalar_lea.vmem [#allocation13], %s7232_s9  ;;  %s8092_s30 = scalar_lea.vmem [#allocation15], %s7232_s9 }
 0x276   : > { %s8096_s0 = sld [smem:[#allocation28_spill]] }
 0x277   : > { %1156 = vmatpush1.bf16.msra.mxu0 %v6221_v45 }
 0x278   : > { %1157 = vmatprep.subr.bf16.mxu0 %v6222_v47  ;;  %5887 = vmatpush3.bf16.msra.mxu1 %v6237_v54 }
 0x279   : > { %5888 = vmatprep.subr.bf16.mxu1 %v6783_v39 }
 0x27b   : > { %1158 = vmatpush1.bf16.msra.mxu0 %v6224_v49 }
 0x27c   : > { %1159 = vmatprep.subr.bf16.mxu0 %v6225_v50  ;;  %5889 = vmatpush3.bf16.msra.mxu1 %v6238_v57  ;;  %p5617_p3 = scmp.ne.s32.totalorder %s8096_s0, 1 }
 0x27d   : > { %5890 = vmatprep.subr.bf16.mxu1 %v6783_v39  ;;  %vm6793_vm14 = vmmov (!%p5617_p3), 0   ;;  %vm4993_vm15 = vcmask (!%p5617_p3), 7168   ;;  %vm5027_vm0 = vcmask (!%p5617_p3), 0  }
 0x27f   : > { %1160 = vmatpush1.bf16.msra.mxu0 %v6227_v51 }
 0x280   : > { %1161 = vmatprep.subr.bf16.mxu0 %v6228_v53  ;;  %5891 = vmatpush3.bf16.msra.mxu1 %v6239_v60 }
 0x281   : > { %5892 = vmatprep.subr.bf16.mxu1 %v6783_v39 }
 0x283   : > { %1162 = vmatpush1.bf16.msra.mxu0 %v6230_v55 }
 0x284   : > { %1163 = vmatprep.subr.bf16.mxu0 %v6231_v56  ;;  %5893 = vmatpush3.bf16.msra.mxu1 %v6240_v62 }
 0x285   : > { %5894 = vmatprep.subr.bf16.mxu1 %v6783_v39 }
 0x287   : > { %1164 = vmatpush1.bf16.msra.mxu0 %v6233_v58 }
 0x288   : > { %5924 = vmatprep.subr.bf16.mxu0 %v6783_v39  ;;  %5895 = vmatpush3.bf16.msra.mxu1 %v6241_v63 }
 0x289   : > { %5900 = vmatprep.subr.bf16.mxu1 %v6783_v39 }
 0x28a   : > { %1182 = vmatmul.mubr.bf16.vlgmr.msra.gmra.mrb[0].mxu0 %v971_v61 }
 0x28b   : > { %5926 = vmatprep.mubr.msk.bf16.mxu0 %vm6784_vm4, %v6783_v39  ;;  %5897 = vmatmul.mubr.bf16.vlgmr.msra.gmra.mrb[0].mxu1 %v971_v61 }
 0x28c   : > { %5902 = vmatprep.mubr.msk.bf16.mxu1 %vm6784_vm4, %v6783_v39 }
 0x35d   : > { %v1183_v7 = vpop.f32.mrb[0].mxu0 }
 0x35e   : > { %v1185_v8 = vpop.f32.mrb[1].mxu0  ;;  %v1184_v12 = vadd.f32 %v1183_v7, %v1009_v6  ;;  %v1224_v18 = vpop.f32.mrb[0].mxu1 }
 0x35f   : > { %v1186_v9 = vadd.f32 %v1185_v8, %v1013_v5  ;;  %v1187_v10 = vpop.f32.mrb[2].mxu0  ;;  %v1225_v19 = vadd.f32 %v1224_v18, %v1017_v17  ;;  %v5898_v20 = vpop.f32.mrb[1].mxu1 }
 0x360   : > { %v1188_v11 = vpop.f32.mrb[3].mxu0  ;;  %v1230_v15 = vpack.c.bf16 %v1184_v12, %v1184_v12  ;;  %v1227_v21 = vpop.f32.mrb[2].mxu1 }
 0x361   : > { %v1231_v13 = vpack.c.bf16 %v1186_v9, %v1186_v9  ;;  %v7364_v22 = vpack.c.bf16 %v1225_v19, %v1225_v19  ;;  %v5899_v23 = vpop.f32.mrb[3].mxu1 }
 0x363   : > { %1345 = vrot.lane.b32.xlu1 %v1231_v13, %s6785_s2  ;;  %v1238_v14 = vsel %vm1233_vm5, %v1231_v13, 0  ;;  %v1299_v24 = vsel %vm1297_vm6, %v7364_v22, 0 }
 0x364   : > { %5901 = vmatpush3.bf16.xpose.msra.mxu1 %v1238_v14 }
 0x365   : > { %5906 = vmatprep.subr.bf16.mxu1 %v6783_v39 }
 0x367   : > { %1342 = vrot.lane.b32.xlu1 %v1230_v15, %s6785_s2 }
 0x36b   : > { %1455 = vrot.lane.b32.xlu1 %v1230_v15, %s6786_s4  ;;  %5903 = vmatmul.mubr.msk.bf16.vlgmr.msra.gmra.mrb[4].mxu1 %vm1233_vm5, %v1230_v15 }
 0x36c   : > { %5908 = vmatprep.mubr.msk.bf16.mxu1 %vm6784_vm4, %v6783_v39  ;;  %5907 = vmatpush3.bf16.msra.mxu1 %v1299_v24 }
 0x36d   : > { %5912 = vmatprep.subr.bf16.mxu1 %v6783_v39 }
 0x36f   : > { %1568 = vrot.lane.b32.xlu1 %v1231_v13, %s6787_s23 }
 0x373   : > { %1566 = vrot.lane.b32.xlu1 %v1230_v15, %s6787_s23 }
 0x377   : > { %1679 = vrot.lane.b32.xlu1 %v1231_v13, %s6788_s6 }
 0x37b   : > { %1677 = vrot.lane.b32.xlu1 %v1230_v15, %s6788_s6 }
 0x37f   : > { %1790 = vrot.lane.b32.xlu1 %v1231_v13, %s6789_s7 }
 0x383   : > { %1901 = vrot.lane.b32.xlu1 %v1231_v13, %s6790_s5 }
 0x387   : > { %2012 = vrot.lane.b32.xlu1 %v1231_v13, %s6791_s1 }
 0x3d5   : > { %v1346_v36 = vpop.permute.xlu1 %1345 }
 0x3d6   : > { %v1351_v51 = vsel %vm1233_vm5, %v1346_v36, 0 }
 0x3d9   : > { %v1343_v37 = vpop.permute.xlu1 %1342 }
 0x3dd   : > { %v1456_v40 = vpop.permute.xlu1 %1455 }
 0x3e1   : > { %v1569_v42 = vpop.permute.xlu1 %1568 }
 0x3e2   : > { %v1574_v48 = vsel %vm1233_vm5, %v1569_v42, 0 }
 0x3e5   : > { %v1567_v45 = vpop.permute.xlu1 %1566 }
 0x3e9   : > { %v1680_v49 = vpop.permute.xlu1 %1679 }
 0x3ea   : > { %v1685_v53 = vsel %vm1233_vm5, %v1680_v49, 0 }
 0x3ed   : > { %v1678_v52 = vpop.permute.xlu1 %1677 }
 0x3f1   : > { %v1791_v54 = vpop.permute.xlu1 %1790 }
 0x3f2   : > { %v1796_v55 = vsel %vm1233_vm5, %v1791_v54, 0 }
 0x3f5   : > { %v1902_v56 = vpop.permute.xlu1 %1901 }
 0x3f6   : > { %v1907_v58 = vsel %vm1233_vm5, %v1902_v56, 0 }
 0x3f9   : > { %v2013_v59 = vpop.permute.xlu1 %2012 }
 0x3fa   : > { %v2018_v61 = vsel %vm1233_vm5, %v2013_v59, 0 }
 0x43e   : > { %v1274_v25 = vpop.f32.mrb[4].mxu1 }
 0x43f   : > { %v1280_v26 = vmul.f32 0.25, %v1274_v25  ;;  %v5904_v27 = vpop.f32.mrb[5].mxu1 }
 0x440   : > { %v1277_v28 = vpop.f32.mrb[6].mxu1 }
 0x441   : > { %v5905_v29 = vpop.f32.mrb[7].mxu1  ;;  %v1282_v30 = vsel %vm1281_vm7, %v1280_v26, -inf }
 0x442   : > { %1283 = vmax.xlane.f32.xlu0 %v1282_v30 }
 0x4cf   : > { %v1284_v31 = vpop.xlane.xlu0 %1283 }
 0x4d0   : > { %v1285_v32 = vsub.f32 %v1280_v26, %v1284_v31 }
 0x4d2   : > { %v1286_v33 = vmul.f32 1.442695, %v1285_v32 }
 0x4d4   : > { %6378 = vpow2.f32 %v1286_v33 }
 0x4de   : > { %v6379_v34 = vpop.eup %6378 }
 0x4df   : > { %v1288_v35 = vsel %vm1281_vm7, %v6379_v34, 0.0 }
 0x4e0   : > { %1289 = vadd.xlane.f32.xlu0 %v1288_v35 }
 0x4f6   : > { %1457 = vrot.lane.b32.xlu0 %v1231_v13, %s6786_s4 }
 0x4fa   : > { %1788 = vrot.lane.b32.xlu0 %v1230_v15, %s6789_s7 }
 0x4fe   : > { %1899 = vrot.lane.b32.xlu0 %v1230_v15, %s6790_s5 }
 0x502   : > { %2010 = vrot.lane.b32.xlu0 %v1230_v15, %s6791_s1 }
 0x56d   : > { %v1290_v41 = vpop.xlane.xlu0 %1289 }
 0x56e   : > { %6380 = vrcp.f32 %v1290_v41 }
 0x571   : > { %v1458_v43 = vpop.permute.xlu0 %1457 }
 0x572   : > { %v1463_v44 = vsel %vm1233_vm5, %v1458_v43, 0 }
 0x573   : > { %5925 = vmatpush3.bf16.xpose.msra.mxu0 %v1463_v44 }
 0x574   : > { %5936 = vmatprep.subr.bf16.mxu0 %v6783_v39 }
 0x575   : > { %v1789_v57 = vpop.permute.xlu0 %1788 }
 0x578   : > { %v6381_v46 = vpop.eup %6380 }
 0x579   : > { %v1292_v47 = vmul.f32 %v6381_v46, %v6379_v34  ;;  %v1900_v60 = vpop.permute.xlu0 %1899 }
 0x57a   : > { %5927 = vmatmul.mubr.msk.bf16.vlgmr.msra.gmra.mrb[4].mxu0 %vm1233_vm5, %v1456_v40 }
 0x57b   : > { %5937 = vmatpush3.bf16.xpose.msra.mxu0 %v1574_v48  ;;  %v1293_v50 = vpack.c.bf16 %v1292_v47, %v1292_v47  ;;  %5938 = vmatprep.mubr.msk.bf16.mxu0 %vm6784_vm4, %v6783_v39 }
 0x57c   : > { %5948 = vmatprep.subr.bf16.mxu0 %v6783_v39 }
 0x57d   : > { %5909 = vmatmul.mubr.msk.bf16.vlgmr.msra.gmra.mrb[8].mxu1 %vm1281_vm7, %v1293_v50  ;;  %v2011_v62 = vpop.permute.xlu0 %2010 }
 0x57e   : > { %5913 = vmatpush3.bf16.xpose.msra.mxu1 %v1351_v51  ;;  %5914 = vmatprep.mubr.msk.bf16.mxu1 %vm6784_vm4, %v6783_v39 }
 0x57f   : > { %5918 = vmatprep.subr.bf16.mxu1 %v6783_v39 }
 0x582   : > { %5939 = vmatmul.mubr.msk.bf16.vlgmr.msra.gmra.mrb[8].mxu0 %vm1233_vm5, %v1567_v45 }
 0x583   : > { %5949 = vmatpush3.bf16.xpose.msra.mxu0 %v1685_v53  ;;  %5950 = vmatprep.mubr.msk.bf16.mxu0 %vm6784_vm4, %v6783_v39 }
 0x584   : > { %5960 = vmatprep.subr.bf16.mxu0 %v6783_v39 }
 0x585   : > { %5915 = vmatmul.mubr.msk.bf16.vlgmr.msra.gmra.mrb[12].mxu1 %vm1233_vm5, %v1343_v37 }
 0x586   : > { %5920 = vmatprep.mubr.msk.bf16.mxu1 %vm6784_vm4, %v6783_v39 }
 0x58a   : > { %5951 = vmatmul.mubr.msk.bf16.vlgmr.msra.gmra.mrb[12].mxu0 %vm1233_vm5, %v1678_v52 }
 0x58b   : > { %5961 = vmatpush3.bf16.xpose.msra.mxu0 %v1796_v55  ;;  %5962 = vmatprep.mubr.msk.bf16.mxu0 %vm6784_vm4, %v6783_v39 }
 0x58c   : > { %5972 = vmatprep.subr.bf16.mxu0 %v6783_v39 }
 0x592   : > { %5963 = vmatmul.mubr.msk.bf16.vlgmr.msra.gmra.mrb[16].mxu0 %vm1233_vm5, %v1789_v57 }
 0x593   : > { %5973 = vmatpush3.bf16.xpose.msra.mxu0 %v1907_v58  ;;  %5974 = vmatprep.mubr.msk.bf16.mxu0 %vm6784_vm4, %v6783_v39 }
 0x594   : > { %5984 = vmatprep.subr.bf16.mxu0 %v6783_v39 }
 0x59a   : > { %5975 = vmatmul.mubr.msk.bf16.vlgmr.msra.gmra.mrb[20].mxu0 %vm1233_vm5, %v1900_v60 }
 0x59b   : > { %5985 = vmatpush3.bf16.xpose.msra.mxu0 %v2018_v61  ;;  %5986 = vmatprep.mubr.msk.bf16.mxu0 %vm6784_vm4, %v6783_v39 }
 0x59c   : > { %5996 = vmatprep.subr.bf16.mxu0 %v6783_v39 }
 0x5a2   : > { %5987 = vmatmul.mubr.msk.bf16.vlgmr.msra.gmra.mrb[24].mxu0 %vm1233_vm5, %v2011_v62 }
 0x5a3   : > { %6012 = vmatprep.mubr.msk.bf16.mxu0 %vm6784_vm4, %v6783_v39 }
 0x64d   : > { %v1499_v63 = vpop.f32.mrb[4].mxu0 }
 0x64e   : > { %v1505_v0 = vmul.f32 0.25, %v1499_v63  ;;  %v5928_v3 = vpop.f32.mrb[5].mxu0 }
 0x64f   : > { %v1502_v5 = vpop.f32.mrb[6].mxu0 }
 0x650   : > { %v7413_v6 = vpop.f32.mrb[8].mxu1  ;;  %v5929_v7 = vpop.f32.mrb[7].mxu0  ;;  %v1506_v8 = vsel %vm1281_vm7, %v1505_v0, -inf }
 0x651   : > { %1507 = vmax.xlane.f32.xlu0 %v1506_v8  ;;  %v5910_v9 = vpop.f32.mrb[9].mxu1 }
 0x652   : > { %v1338_v10 = vpop.f32.mrb[10].mxu1 }
 0x653   : > { %v5911_v11 = vpop.f32.mrb[11].mxu1 }
 0x655   : > { %v1610_v12 = vpop.f32.mrb[8].mxu0 }
 0x656   : > { %v1616_v13 = vmul.f32 0.25, %v1610_v12  ;;  %v5940_v14 = vpop.f32.mrb[9].mxu0 }
 0x657   : > { %v1613_v15 = vpop.f32.mrb[10].mxu0 }
 0x658   : > { %v1387_v17 = vpop.f32.mrb[12].mxu1  ;;  %v5941_v18 = vpop.f32.mrb[11].mxu0  ;;  %v1617_v19 = vsel %vm1281_vm7, %v1616_v13, -inf }
 0x659   : > { %v1393_v20 = vmul.f32 0.25, %v1387_v17  ;;  %1618 = vmax.xlane.f32.xlu0 %v1617_v19  ;;  %v5916_v21 = vpop.f32.mrb[13].mxu1 }
 0x65a   : > { %v1390_v23 = vpop.f32.mrb[14].mxu1 }
 0x65b   : > { %v5917_v24 = vpop.f32.mrb[15].mxu1  ;;  %v1394_v25 = vsel %vm1281_vm7, %v1393_v20, -inf }
 0x65c   : > { %1395 = vmax.xlane.f32.xlu1 %v1394_v25 }
 0x65d   : > { %v1721_v26 = vpop.f32.mrb[12].mxu0 }
 0x65e   : > { %v1727_v27 = vmul.f32 0.25, %v1721_v26  ;;  %v5952_v28 = vpop.f32.mrb[13].mxu0 }
 0x65f   : > { %v1724_v29 = vpop.f32.mrb[14].mxu0 }
 0x660   : > { %v5953_v30 = vpop.f32.mrb[15].mxu0  ;;  %v1728_v31 = vsel %vm1281_vm7, %v1727_v27, -inf }
 0x661   : > { %1729 = vmax.xlane.f32.xlu1 %v1728_v31 }
 0x665   : > { %v1832_v32 = vpop.f32.mrb[16].mxu0 }
 0x666   : > { %v1838_v33 = vmul.f32 0.25, %v1832_v32  ;;  %v5964_v34 = vpop.f32.mrb[17].mxu0 }
 0x667   : > { %v1835_v35 = vpop.f32.mrb[18].mxu0 }
 0x668   : > { %v5965_v36 = vpop.f32.mrb[19].mxu0  ;;  %v1839_v37 = vsel %vm1281_vm7, %v1838_v33, -inf }
 0x669   : > { %1840 = vmax.xlane.f32.xlu0 %v1839_v37 }
 0x66d   : > { %v1943_v40 = vpop.f32.mrb[20].mxu0 }
 0x66e   : > { %v1949_v41 = vmul.f32 0.25, %v1943_v40  ;;  %v5976_v42 = vpop.f32.mrb[21].mxu0 }
 0x66f   : > { %v1946_v43 = vpop.f32.mrb[22].mxu0 }
 0x670   : > { %v5977_v44 = vpop.f32.mrb[23].mxu0  ;;  %v1950_v45 = vsel %vm1281_vm7, %v1949_v41, -inf }
 0x671   : > { %1951 = vmax.xlane.f32.xlu1 %v1950_v45 }
 0x675   : > { %v2054_v46 = vpop.f32.mrb[24].mxu0 }
 0x676   : > { %v2060_v47 = vmul.f32 0.25, %v2054_v46  ;;  %v5988_v48 = vpop.f32.mrb[25].mxu0 }
 0x677   : > { %v2057_v49 = vpop.f32.mrb[26].mxu0 }
 0x678   : > { %v5989_v50 = vpop.f32.mrb[27].mxu0  ;;  %v2061_v51 = vsel %vm1281_vm7, %v2060_v47, -inf }
 0x679   : > { %2062 = vmax.xlane.f32.xlu0 %v2061_v51 }
 0x6de   : > { %v1508_v52 = vpop.xlane.xlu0 %1507 }
 0x6df   : > { %v1509_v53 = vsub.f32 %v1505_v0, %v1508_v52 }
 0x6e1   : > { %v1510_v54 = vmul.f32 1.442695, %v1509_v53 }
 0x6e3   : > { %6382 = vpow2.f32 %v1510_v54 }
 0x6e6   : > { %v1619_v55 = vpop.xlane.xlu0 %1618 }
 0x6e7   : > { %v1620_v56 = vsub.f32 %v1616_v13, %v1619_v55 }
 0x6e9   : > { %v1621_v57 = vmul.f32 1.442695, %v1620_v56  ;;  %v1396_v58 = vpop.xlane.xlu1 %1395 }
 0x6ea   : > { %v1397_v59 = vsub.f32 %v1393_v20, %v1396_v58 }
 0x6eb   : > { %6384 = vpow2.f32 %v1621_v57 }
 0x6ec   : > { %v1398_v60 = vmul.f32 1.442695, %v1397_v59 }
 0x6ed   : > { %v7422_v61 = vpop.eup %6382 }
 0x6ee   : > { %6386 = vpow2.f32 %v1398_v60  ;;  %v1730_v62 = vpop.xlane.xlu1 %1729  ;;  %v1512_v63 = vsel %vm1281_vm7, %v7422_v61, 0.0 }
 0x6ef   : > { %v1731_v3 = vsub.f32 %v1727_v27, %v1730_v62  ;;  %1513 = vadd.xlane.f32.xlu0 %v1512_v63 }
 0x6f1   : > { %v1732_v5 = vmul.f32 1.442695, %v1731_v3 }
 0x6f3   : > { %6388 = vpow2.f32 %v1732_v5 }
 0x6f5   : > { %v7426_v0 = vpop.eup %6384 }
 0x6f6   : > { %v1841_v7 = vpop.xlane.xlu0 %1840  ;;  %v1623_v8 = vsel %vm1281_vm7, %v7426_v0, 0.0 }
 0x6f7   : > { %v1842_v9 = vsub.f32 %v1838_v33, %v1841_v7  ;;  %1624 = vadd.xlane.f32.xlu1 %v1623_v8 }
 0x6f8   : > { %v6387_v10 = vpop.eup %6386 }
 0x6f9   : > { %v1843_v11 = vmul.f32 1.442695, %v1842_v9  ;;  %v1400_v12 = vsel %vm1281_vm7, %v6387_v10, 0.0 }
 0x6fb   : > { %6390 = vpow2.f32 %v1843_v11  ;;  %1401 = vadd.xlane.f32.xlu1 %v1400_v12 }
 0x6fd   : > { %v7431_v13 = vpop.eup %6388 }
 0x6fe   : > { %v1734_v14 = vsel %vm1281_vm7, %v7431_v13, 0.0  ;;  %v1952_v18 = vpop.xlane.xlu1 %1951 }
 0x6ff   : > { %1735 = vadd.xlane.f32.xlu0 %v1734_v14  ;;  %v1953_v19 = vsub.f32 %v1949_v41, %v1952_v18 }
 0x701   : > { %v1954_v20 = vmul.f32 1.442695, %v1953_v19 }
 0x703   : > { %6392 = vpow2.f32 %v1954_v20 }
 0x705   : > { %v7435_v15 = vpop.eup %6390 }
 0x706   : > { %v1845_v17 = vsel %vm1281_vm7, %v7435_v15, 0.0  ;;  %v2063_v21 = vpop.xlane.xlu0 %2062 }
 0x707   : > { %1846 = vadd.xlane.f32.xlu0 %v1845_v17  ;;  %v2064_v23 = vsub.f32 %v2060_v47, %v2063_v21 }
 0x709   : > { %v2065_v25 = vmul.f32 1.442695, %v2064_v23 }
 0x70b   : > { %6394 = vpow2.f32 %v2065_v25 }
 0x70c   : > { %1407 = vrot.lane.b32.xlu1 %v7364_v22, %s6785_s2 }
 0x70d   : > { %v7445_v24 = vpop.eup %6392 }
 0x70e   : > { %v1956_v26 = vsel %vm1281_vm7, %v7445_v24, 0.0 }
 0x715   : > { %v7449_v27 = vpop.eup %6394 }
 0x716   : > { %v2067_v28 = vsel %vm1281_vm7, %v7449_v27, 0.0 }
 0x71d   : > { %1518 = vrot.lane.b32.xlu0 %v7364_v22, %s6786_s4 }
 0x721   : > { %1629 = vrot.lane.b32.xlu0 %v7364_v22, %s6787_s23 }
 0x730   : > { %1957 = vadd.xlane.f32.xlu1 %v1956_v26  ;;  %v6242_v26 = vld [vmem:[%s7269_s12] sm:$0xff]  }
 0x731   : > { %5997 = vmatpush3.bf16.msra.mxu0 %v6242_v26  ;;  %v2329_v26 = vld [vmem:[%s7251_s18 + $0xc8] sm:$0xff] }
 0x732   : > { %5998 = vmatprep.subr.bf16.mxu0 %v6783_v39 }
 0x740   : > { %2068 = vadd.xlane.f32.xlu0 %v2067_v28  ;;  %v6244_v28 = vld [vmem:[%s7269_s12 + $0x10] sm:$0xff]  }
 0x741   : > { %1740 = vrot.lane.b32.xlu1 %v7364_v22, %s6788_s6 }
 0x745   : > { %1962 = vrot.lane.b32.xlu1 %v7364_v22, %s6790_s5 }
 0x749   : > { %2073 = vrot.lane.b32.xlu1 %v7364_v22, %s6791_s1 }
 0x756   : > { %1851 = vrot.lane.b32.xlu0 %v7364_v22, %s6789_s7 }
 0x77c   : > { %v1514_v31 = vpop.xlane.xlu0 %1513 }
 0x784   : > { %v1625_v29 = vpop.xlane.xlu1 %1624 }
 0x788   : > { %v1402_v30 = vpop.xlane.xlu1 %1401 }
 0x789   : > { %6396 = vrcp.f32 %v1402_v30 }
 0x78a   : > { %6398 = vrcp.f32 %v1514_v31 }
 0x78b   : > { %6400 = vrcp.f32 %v1625_v29 }
 0x78c   : > { %v1408_v32 = vpop.permute.xlu1 %1407  ;;  %v1736_v34 = vpop.xlane.xlu0 %1735 }
 0x78d   : > { %v1413_v33 = vsel %vm1297_vm6, %v1408_v32, 0  ;;  %6402 = vrcp.f32 %v1736_v34  ;;  %v6246_v34 = vld [vmem:[%s7269_s12 + $0x20] sm:$0xff]  }
 0x78e   : > { %5919 = vmatpush3.bf16.msra.mxu1 %v1413_v33  ;;  %v6245_v33 = vld [vmem:[%s7269_s12 + $0x18] sm:$0xff]  }
 0x78f   : > { %5930 = vmatprep.subr.bf16.mxu1 %v6783_v39 }
 0x793   : > { %v6397_v35 = vpop.eup %6396 }
 0x794   : > { %v1404_v36 = vmul.f32 %v6397_v35, %v6387_v10  ;;  %v1847_v37 = vpop.xlane.xlu0 %1846  ;;  %v6399_v41 = vpop.eup %6398  ;;  %v6247_v35 = vld [vmem:[%s7269_s12 + $0x28] sm:$0xff]  }
 0x795   : > { %v1516_v43 = vmul.f32 %v6399_v41, %v7422_v61  ;;  %v6401_v46 = vpop.eup %6400  ;;  %6404 = vrcp.f32 %v1847_v37 }
 0x796   : > { %v1405_v40 = vpack.c.bf16 %v1404_v36, %v1404_v36  ;;  %v1627_v48 = vmul.f32 %v6401_v46, %v7426_v0  ;;  %v6248_v36 = vld [vmem:[%s7269_s12 + $0x30] sm:$0xff]  }
 0x797   : > { %v1517_v45 = vpack.c.bf16 %v1516_v43, %v1516_v43  ;;  %v6403_v50 = vpop.eup %6402 }
 0x798   : > { %v1519_v42 = vpop.permute.xlu0 %1518  ;;  %5921 = vmatmul.mubr.msk.bf16.vlgmr.msra.gmra.mrb[16].mxu1 %vm1281_vm7, %v1405_v40  ;;  %v1628_v49 = vpack.c.bf16 %v1627_v48, %v1627_v48  ;;  %v1738_v52 = vmul.f32 %v6403_v50, %v7431_v13 }
 0x799   : > { %v1524_v22 = vsel %vm1297_vm6, %v1519_v42, 0  ;;  %5932 = vmatprep.mubr.msk.bf16.mxu1 %vm6784_vm4, %v6783_v39 }
 0x79a   : > { %5931 = vmatpush3.bf16.msra.mxu1 %v1524_v22  ;;  %v1739_v55 = vpack.c.bf16 %v1738_v52, %v1738_v52  ;;  %v6249_v22 = vld [vmem:[%s7269_s12 + $0x38] sm:$0xff]  }
 0x79b   : > { %5942 = vmatprep.subr.bf16.mxu1 %v6783_v39 }
 0x79c   : > { %v1630_v44 = vpop.permute.xlu0 %1629 }
 0x79d   : > { %v1635_v47 = vsel %vm1297_vm6, %v1630_v44, 0 }
 0x79f   : > { %v6405_v56 = vpop.eup %6404 }
 0x7a0   : > { %5933 = vmatmul.mubr.msk.bf16.vlgmr.msra.gmra.mrb[20].mxu1 %vm1281_vm7, %v1517_v45  ;;  %v1849_v58 = vmul.f32 %v6405_v56, %v7435_v15 }
 0x7a1   : > { %5943 = vmatpush3.bf16.msra.mxu1 %v1635_v47  ;;  %5944 = vmatprep.mubr.msk.bf16.mxu1 %vm6784_vm4, %v6783_v39 }
 0x7a2   : > { %5954 = vmatprep.subr.bf16.mxu1 %v6783_v39  ;;  %v1850_v62 = vpack.c.bf16 %v1849_v58, %v1849_v58 }
 0x7a8   : > { %5945 = vmatmul.mubr.msk.bf16.vlgmr.msra.gmra.mrb[24].mxu1 %vm1281_vm7, %v1628_v49 }
 0x7a9   : > { %5956 = vmatprep.mubr.msk.bf16.mxu1 %vm6784_vm4, %v6783_v39 }
 0x7bd   : > { %v1958_v51 = vpop.xlane.xlu1 %1957 }
 0x7be   : > { %6406 = vrcp.f32 %v1958_v51 }
 0x7c1   : > { %v1741_v53 = vpop.permute.xlu1 %1740 }
 0x7c2   : > { %v1746_v54 = vsel %vm1297_vm6, %v1741_v53, 0 }
 0x7c3   : > { %5955 = vmatpush3.bf16.msra.mxu1 %v1746_v54 }
 0x7c4   : > { %5966 = vmatprep.subr.bf16.mxu1 %v6783_v39 }
 0x7c5   : > { %v1963_v61 = vpop.permute.xlu1 %1962 }
 0x7c6   : > { %5957 = vmatmul.mubr.msk.bf16.vlgmr.msra.gmra.mrb[28].mxu1 %vm1281_vm7, %v1739_v55  ;;  %v1968_v3 = vsel %vm1297_vm6, %v1963_v61, 0 }
 0x7c7   : > { %5968 = vmatprep.mubr.msk.bf16.mxu1 %vm6784_vm4, %v6783_v39 }
 0x7c8   : > { %v6407_v63 = vpop.eup %6406 }
 0x7c9   : > { %v1960_v5 = vmul.f32 %v6407_v63, %v7445_v24  ;;  %v2074_v0 = vpop.permute.xlu1 %2073 }
 0x7ca   : > { %v2079_v9 = vsel %vm1297_vm6, %v2074_v0, 0 }
 0x7cb   : > { %v1961_v7 = vpack.c.bf16 %v1960_v5, %v1960_v5 }
 0x7cd   : > { %v2069_v57 = vpop.xlane.xlu0 %2068 }
 0x7ce   : > { %6408 = vrcp.f32 %v2069_v57 }
 0x7d1   : > { %v1852_v59 = vpop.permute.xlu0 %1851 }
 0x7d2   : > { %v1857_v60 = vsel %vm1297_vm6, %v1852_v59, 0 }
 0x7d3   : > { %5967 = vmatpush3.bf16.msra.mxu1 %v1857_v60 }
 0x7d4   : > { %5978 = vmatprep.subr.bf16.mxu1 %v6783_v39 }
 0x7d6   : > { %5969 = vmatmul.mubr.msk.bf16.vlgmr.msra.gmra.mrb[32].mxu1 %vm1281_vm7, %v1850_v62 }
 0x7d7   : > { %5979 = vmatpush3.bf16.msra.mxu1 %v1968_v3  ;;  %5980 = vmatprep.mubr.msk.bf16.mxu1 %vm6784_vm4, %v6783_v39 }
 0x7d8   : > { %5990 = vmatprep.subr.bf16.mxu1 %v6783_v39  ;;  %v6409_v8 = vpop.eup %6408 }
 0x7d9   : > { %v2071_v10 = vmul.f32 %v6409_v8, %v7449_v27  ;;  %v6243_v27 = vld [vmem:[%s7269_s12 + $0x8] sm:$0xff]   ;;  %s8090_s12 = scalar_lea.vmem %s8089_s24, %s7259_s28 }
 0x7da   : > { %5999 = vmatpush3.bf16.msra.mxu0 %v6243_v27  ;;  %v2336_v27 = vld [vmem:[%s7251_s18 + $0x100] sm:$0xff] }
 0x7db   : > { %v2072_v11 = vpack.c.bf16 %v2071_v10, %v2071_v10  ;;  %6000 = vmatprep.subr.bf16.mxu0 %v6783_v39  ;;  %v6414_v10 = vld [vmem:[#allocation2] sm:$0xff] }
 0x7de   : > { %5981 = vmatmul.mubr.msk.bf16.vlgmr.msra.gmra.mrb[36].mxu1 %vm1281_vm7, %v1961_v7  ;;  %6001 = vmatpush3.bf16.msra.mxu0 %v6244_v28 }
 0x7df   : > { %5991 = vmatpush3.bf16.msra.mxu1 %v2079_v9  ;;  %5992 = vmatprep.mubr.msk.bf16.mxu1 %vm6784_vm4, %v6783_v39 }
 0x7e0   : > { %6002 = vmatprep.subr.bf16.mxu0 %v6783_v39 }
 0x7e2   : > { %6003 = vmatpush3.bf16.msra.mxu0 %v6245_v33 }
 0x7e3   : > { %6004 = vmatprep.subr.bf16.mxu0 %v6783_v39 }
 0x7e6   : > { %5993 = vmatmul.mubr.msk.bf16.vlgmr.msra.gmra.mrb[40].mxu1 %vm1281_vm7, %v2072_v11  ;;  %6005 = vmatpush3.bf16.msra.mxu0 %v6246_v34 }
 0x7e7   : > { %3188 = vmatprep.mubr.bf16.mxu1 %v6782_v38  ;;  %6006 = vmatprep.subr.bf16.mxu0 %v6783_v39 }
 0x7ea   : > { %6007 = vmatpush3.bf16.msra.mxu0 %v6247_v35 }
 0x7eb   : > { %6008 = vmatprep.subr.bf16.mxu0 %v6783_v39 }
 0x7ee   : > { %6009 = vmatpush3.bf16.msra.mxu0 %v6248_v36 }
 0x7ef   : > { %6010 = vmatprep.subr.bf16.mxu0 %v6783_v39 }
 0x7f2   : > { %6011 = vmatpush3.bf16.msra.mxu0 %v6249_v22 }
 0x86b   : > { %v1449_v12 = vpop.f32.mrb[16].mxu1 }
 0x86c   : > { %2122 = vrot.lane.b32.xlu1 %v1449_v12, %s6791_s1  ;;  %v5922_v13 = vpop.f32.mrb[17].mxu1  ;;  %v2304_v12 = vld [vmem:[%s7251_s18] sm:$0xff] }
 0x86d   : > { %v1452_v14 = vpop.f32.mrb[18].mxu1  ;;  %v2312_v13 = vld [vmem:[%s7251_s18 + $0x40] sm:$0xff] }
 0x86e   : > { %v5923_v15 = vpop.f32.mrb[19].mxu1  ;;  %v2305_v14 = vld [vmem:[%s7251_s18 + $0x8] sm:$0xff] }
 0x86f   : > { %v5358_v15 = vcombine.low %v2304_v12, %v2312_v13 }
 0x873   : > { %v1560_v17 = vpop.f32.mrb[20].mxu1 }
 0x874   : > { %2126 = vrot.lane.b32.xlu1 %v1560_v17, %s6790_s5  ;;  %v5934_v18 = vpop.f32.mrb[21].mxu1  ;;  %v5359_v17 = vcombine.high %v2304_v12, %v2312_v13  ;;  %v2416_v13 = vld [vmem:[%s7251_s18 + $0x380] sm:$0xff] }
 0x875   : > { %v1563_v19 = vpop.f32.mrb[22].mxu1  ;;  %v2313_v18 = vld [vmem:[%s7251_s18 + $0x48] sm:$0xff] }
 0x876   : > { %v5935_v20 = vpop.f32.mrb[23].mxu1  ;;  %v2320_v19 = vld [vmem:[%s7251_s18 + $0x80] sm:$0xff]  ;;  %3156 = vmatprep.subr.bf16.mxu1 %v5359_v17 }
 0x877   : > { %v2328_v20 = vld [vmem:[%s7251_s18 + $0xc0] sm:$0xff]  ;;  %3157 = vmatpush1.bf16.msra.mxu1 %v5358_v15  ;;  %v2417_v15 = vld [vmem:[%s7251_s18 + $0x388] sm:$0xff] }
 0x87b   : > { %v1671_v21 = vpop.f32.mrb[24].mxu1 }
 0x87c   : > { %2130 = vrot.lane.b32.xlu0 %v1671_v21, %s6789_s7  ;;  %v5946_v23 = vpop.f32.mrb[25].mxu1  ;;  %v5360_v21 = vcombine.low %v2305_v14, %v2313_v18 }
 0x87d   : > { %v1674_v24 = vpop.f32.mrb[26].mxu1  ;;  %v5361_v23 = vcombine.high %v2305_v14, %v2313_v18  ;;  %v2424_v14 = vld [vmem:[%s7251_s18 + $0x3c0] sm:$0xff]  ;;  %v2425_v18 = vld [vmem:[%s7251_s18 + $0x3c8] sm:$0xff] }
 0x87e   : > { %v5947_v25 = vpop.f32.mrb[27].mxu1  ;;  %v5375_v24 = vcombine.high %v2320_v19, %v2328_v20  ;;  %v5471_v17 = vcombine.high %v2416_v13, %v2424_v14 }
 0x87f   : > { %v2321_v25 = vld [vmem:[%s7251_s18 + $0x88] sm:$0xff]  ;;  %3197 = vmatprep.subr.bf16.mxu0 %v5361_v23  ;;  %v2306_v23 = vld [vmem:[%s7251_s18 + $0x10] sm:$0xff] }
 0x880   : > { %v5377_v28 = vcombine.high %v2321_v25, %v2329_v26  ;;  %3158 = vmatprep.subr.bf16.mxu1 %v5375_v24  ;;  %v5376_v33 = vcombine.low %v2321_v25, %v2329_v26  ;;  %v2314_v24 = vld [vmem:[%s7251_s18 + $0x50] sm:$0xff]  ;;  %v2307_v25 = vld [vmem:[%s7251_s18 + $0x18] sm:$0xff] }
 0x881   : > { %v5362_v26 = vcombine.low %v2306_v23, %v2314_v24 }
 0x899   : > { %v1782_v29 = vpop.f32.mrb[28].mxu1 }
 0x89a   : > { %2134 = vrot.lane.b32.xlu1 %v1782_v29, %s6788_s6  ;;  %v5958_v30 = vpop.f32.mrb[29].mxu1  ;;  %v2344_v29 = vld [vmem:[%s7251_s18 + $0x140] sm:$0xff] }
 0x89b   : > { %v1785_v31 = vpop.f32.mrb[30].mxu1  ;;  %v2337_v30 = vld [vmem:[%s7251_s18 + $0x108] sm:$0xff]  ;;  %v5391_v34 = vcombine.high %v2336_v27, %v2344_v29  ;;  %v5390_v36 = vcombine.low %v2336_v27, %v2344_v29  ;;  %v5363_v27 = vcombine.high %v2306_v23, %v2314_v24  ;;  %v2411_v23 = vld [vmem:[%s7251_s18 + $0x358] sm:$0xff] }
 0x89c   : > { %v5959_v32 = vpop.f32.mrb[31].mxu1  ;;  %v2345_v31 = vld [vmem:[%s7251_s18 + $0x148] sm:$0xff] }
 0x89d   : > { %v5374_v32 = vcombine.low %v2320_v19, %v2328_v20  ;;  %v5393_v35 = vcombine.high %v2337_v30, %v2345_v31  ;;  %v5470_v19 = vcombine.low %v2416_v13, %v2424_v14  ;;  %v5472_v20 = vcombine.low %v2417_v15, %v2425_v18  ;;  %v2395_v13 = vld [vmem:[%s7251_s18 + $0x2d8] sm:$0xff] }
 0x89f   : > { %3159 = vmatpush1.bf16.msra.mxu1 %v5374_v32 }
 0x8a0   : > { %3160 = vmatprep.subr.bf16.mxu1 %v5391_v34 }
 0x8a3   : > { %3161 = vmatpush1.bf16.msra.mxu1 %v5390_v36 }
 0x8a9   : > { %v1893_v37 = vpop.f32.mrb[32].mxu1 }
 0x8aa   : > { %2138 = vrot.lane.b32.xlu0 %v1893_v37, %s6787_s23  ;;  %v5970_v40 = vpop.f32.mrb[33].mxu1  ;;  %v5392_v37 = vcombine.low %v2337_v30, %v2345_v31 }
 0x8ab   : > { %v1896_v41 = vpop.f32.mrb[34].mxu1 }
 0x8ac   : > { %v5971_v42 = vpop.f32.mrb[35].mxu1 }
 0x8b1   : > { %v2004_v43 = vpop.f32.mrb[36].mxu1 }
 0x8b2   : > { %2142 = vrot.lane.b32.xlu1 %v2004_v43, %s6786_s4  ;;  %v5982_v44 = vpop.f32.mrb[37].mxu1  ;;  %v2352_v43 = vld [vmem:[%s7251_s18 + $0x180] sm:$0xff] }
 0x8b3   : > { %v2007_v45 = vpop.f32.mrb[38].mxu1  ;;  %v2360_v44 = vld [vmem:[%s7251_s18 + $0x1c0] sm:$0xff] }
 0x8b4   : > { %v5983_v46 = vpop.f32.mrb[39].mxu1  ;;  %v2353_v45 = vld [vmem:[%s7251_s18 + $0x188] sm:$0xff] }
 0x8b5   : > { %v5407_v46 = vcombine.high %v2352_v43, %v2360_v44 }
 0x8b7   : > { %3162 = vmatprep.subr.bf16.mxu1 %v5407_v46 }
 0x8b9   : > { %v2115_v47 = vpop.f32.mrb[40].mxu1 }
 0x8ba   : > { %2146 = vrot.lane.b32.xlu0 %v2115_v47, %s6785_s2  ;;  %v5994_v48 = vpop.f32.mrb[41].mxu1  ;;  %v2361_v47 = vld [vmem:[%s7251_s18 + $0x1c8] sm:$0xff]  ;;  %s8097_s2 = sld [smem:[#allocation45_spill]] (!%p5617_p3) }
 0x8bb   : > { %v2118_v49 = vpop.f32.mrb[42].mxu1  ;;  %v5406_v48 = vcombine.low %v2352_v43, %v2360_v44  ;;  %v2323_v43 = vld [vmem:[%s7251_s18 + $0x98] sm:$0xff] }
 0x8bc   : > { %v5995_v50 = vpop.f32.mrb[43].mxu1  ;;  %v5408_v49 = vcombine.low %v2353_v45, %v2361_v47  ;;  %v2331_v44 = vld [vmem:[%s7251_s18 + $0xd8] sm:$0xff] }
 0x8bd   : > { %v5409_v50 = vcombine.high %v2353_v45, %v2361_v47  ;;  %3163 = vmatpush1.bf16.msra.mxu1 %v5406_v48  ;;  %v5381_v48 = vcombine.high %v2323_v43, %v2331_v44 }
 0x8de   : > { %v2123_v51 = vpop.permute.xlu1 %2122 }
 0x8df   : > { %v2149_v54 = vsel %vm1233_vm5, %v7413_v6, %v2123_v51  ;;  %v5347_v6 = vld [vmem:[%s8090_s12] ss:$0 sm:$0xff]  ;;  %v2368_v51 = vld [vmem:[%s7251_s18 + $0x200] sm:$0xff] }
 0x8e6   : > { %v2127_v52 = vpop.permute.xlu1 %2126 }
 0x8e7   : > { %v2151_v55 = vsel %vm2150_vm8, %v2149_v54, %v2127_v52  ;;  %v2376_v52 = vld [vmem:[%s7251_s18 + $0x240] sm:$0xff]  ;;  %v2377_v54 = vld [vmem:[%s7251_s18 + $0x248] sm:$0xff] }
 0x8ee   : > { %v2131_v53 = vpop.permute.xlu0 %2130 }
 0x8ef   : > { %v2153_v57 = vsel %vm2152_vm9, %v2151_v55, %v2131_v53  ;;  %v2369_v53 = vld [vmem:[%s7251_s18 + $0x208] sm:$0xff]  ;;  %v5422_v55 = vcombine.low %v2368_v51, %v2376_v52 }
 0x90c   : > { %v2135_v39 = vpop.permute.xlu1 %2134 }
 0x90d   : > { %v2155_v59 = vsel %vm2154_vm10, %v2153_v57, %v2135_v39  ;;  %v5423_v39 = vcombine.high %v2368_v51, %v2376_v52  ;;  %v5425_v57 = vcombine.high %v2369_v53, %v2377_v54  ;;  %v2347_v51 = vld [vmem:[%s7251_s18 + $0x158] sm:$0xff] }
 0x90f   : > { %3164 = vmatprep.subr.bf16.mxu1 %v5423_v39 }
 0x910   : > { %3165 = vmatpush1.bf16.msra.mxu1 %v5422_v55  ;;  %v2354_v55 = vld [vmem:[%s7251_s18 + $0x190] sm:$0xff] }
 0x91c   : > { %v2139_v56 = vpop.permute.xlu0 %2138 }
 0x91d   : > { %v2157_v60 = vsel %vm2156_vm11, %v2155_v59, %v2139_v56  ;;  %v5424_v56 = vcombine.low %v2369_v53, %v2377_v54  ;;  %v2392_v59 = vld [vmem:[%s7251_s18 + $0x2c0] sm:$0xff]  ;;  %v5380_v53 = vcombine.low %v2323_v43, %v2331_v44 }
 0x924   : > { %v2143_v58 = vpop.permute.xlu1 %2142 }
 0x925   : > { %v2159_v61 = vsel %vm2158_vm12, %v2157_v60, %v2143_v58  ;;  %v2384_v58 = vld [vmem:[%s7251_s18 + $0x280] sm:$0xff]  ;;  %v2385_v60 = vld [vmem:[%s7251_s18 + $0x288] sm:$0xff] }
 0x92c   : > { %v2147_v62 = vpop.permute.xlu0 %2146 }
 0x92d   : > { %v2161_v63 = vsel %vm2160_vm13, %v2159_v61, %v2147_v62  ;;  %v5439_v61 = vcombine.high %v2384_v58, %v2392_v59  ;;  %v2393_v62 = vld [vmem:[%s7251_s18 + $0x2c8] sm:$0xff] }
 0x92e   : > { %v2162_v3 = vpack.c.bf16 %v2161_v63, %v2161_v63  ;;  %v5438_v63 = vcombine.low %v2384_v58, %v2392_v59  ;;  %v2363_v58 = vld [vmem:[%s7251_s18 + $0x1d8] sm:$0xff] }
 0x92f   : > { %3166 = vmatprep.subr.bf16.mxu1 %v5439_v61 }
 0x930   : > { %6013 = vmatmul.mubr.bf16.vlgmr.msra.gmra.mrb[28].mxu0 %v2162_v3  ;;  %v5440_v3 = vcombine.low %v2385_v60, %v2393_v62  ;;  %3167 = vmatpush1.bf16.msra.mxu1 %v5438_v63  ;;  %v2370_v63 = vld [vmem:[%s7251_s18 + $0x210] sm:$0xff] }
 0x931   : > { %3229 = vmatprep.mubr.bf16.mxu0 %v6782_v38  ;;  %3198 = vmatpush1.bf16.msra.mxu0 %v5360_v21  ;;  %v5473_v21 = vcombine.high %v2417_v15, %v2425_v18 }
 0x932   : > { %3199 = vmatprep.subr.bf16.mxu0 %v5377_v28  ;;  %v2315_v28 = vld [vmem:[%s7251_s18 + $0x58] sm:$0xff] }
 0x933   : > { %v5364_v29 = vcombine.low %v2307_v25, %v2315_v28  ;;  %v5365_v30 = vcombine.high %v2307_v25, %v2315_v28  ;;  %v2418_v28 = vld [vmem:[%s7251_s18 + $0x390] sm:$0xff] }
 0x935   : > { %3200 = vmatpush1.bf16.msra.mxu0 %v5376_v33 }
 0x936   : > { %3201 = vmatprep.subr.bf16.mxu0 %v5393_v35  ;;  %v5356_v35 = vld [vmem:[%s8091_s25] ss:$0 sm:$0xff] }
 0x939   : > { %3202 = vmatpush1.bf16.msra.mxu0 %v5392_v37  ;;  %v5357_v37 = vld [vmem:[%s8092_s30] ss:$0 sm:$0xff] }
 0x93a   : > { %3203 = vmatprep.subr.bf16.mxu0 %v5409_v50  ;;  %v2339_v50 = vld [vmem:[%s7251_s18 + $0x118] sm:$0xff] }
 0x93b   : > { %v5397_v54 = vcombine.high %v2339_v50, %v2347_v51 }
 0x93d   : > { %3204 = vmatpush1.bf16.msra.mxu0 %v5408_v49  ;;  %v2338_v49 = vld [vmem:[%s7251_s18 + $0x110] sm:$0xff] }
 0x93e   : > { %3205 = vmatprep.subr.bf16.mxu0 %v5425_v57  ;;  %v2355_v57 = vld [vmem:[%s7251_s18 + $0x198] sm:$0xff] }
 0x941   : > { %3206 = vmatpush1.bf16.msra.mxu0 %v5424_v56  ;;  %v2362_v56 = vld [vmem:[%s7251_s18 + $0x1d0] sm:$0xff] }
 0x942   : > { %v5411_v61 = vcombine.high %v2354_v55, %v2362_v56 }
 0xa03   : > { %v2268_v5 = vpop.f32.mrb[28].mxu0 }
 0xa04   : > { %v2269_v0 = vadd.f32 %v5347_v6, %v2268_v5  ;;  %v6014_v7 = vpop.f32.mrb[29].mxu0  ;;  %v5441_v6 = vcombine.high %v2385_v60, %v2393_v62  ;;  %v2400_v5 = vld [vmem:[%s7251_s18 + $0x300] sm:$0xff]  ;;  %v5396_v60 = vcombine.low %v2339_v50, %v2347_v51  ;;  %v5413_v62 = vcombine.high %v2355_v57, %v2363_v58  ;;  %v2333_v50 = vld [vmem:[%s7251_s18 + $0xe8] sm:$0xff] }
 0xa05   : > { %v2271_v8 = vpop.f32.mrb[30].mxu0  ;;  %v2401_v7 = vld [vmem:[%s7251_s18 + $0x308] sm:$0xff] }
 0xa06   : > { %v6015_v9 = vpop.f32.mrb[31].mxu0  ;;  %v2274_v11 = vadd.f32 %v6414_v10, %v2269_v0  ;;  %3207 = vmatprep.subr.bf16.mxu0 %v5441_v6  ;;  %v2408_v0 = vld [vmem:[%s7251_s18 + $0x340] sm:$0xff]  ;;  %v2371_v6 = vld [vmem:[%s7251_s18 + $0x218] sm:$0xff] }
 0xa07   : > { %3208 = vmatpush1.bf16.msra.mxu0 %v5440_v3  ;;  %v5455_v8 = vcombine.high %v2400_v5, %v2408_v0  ;;  %v2409_v9 = vld [vmem:[%s7251_s18 + $0x348] sm:$0xff]  ;;  %v5454_v10 = vcombine.low %v2400_v5, %v2408_v0  ;;  %v2378_v3 = vld [vmem:[%s7251_s18 + $0x250] sm:$0xff]  ;;  %v2379_v5 = vld [vmem:[%s7251_s18 + $0x258] sm:$0xff]  ;;  %v5410_v0 = vcombine.low %v2354_v55, %v2362_v56 }
 0xa08   : > { %2277 = vadd.xlane.f32.xlu1 %v2274_v11  ;;  %v5457_v12 = vcombine.high %v2401_v7, %v2409_v9  ;;  %v5426_v14 = vcombine.low %v2370_v63, %v2378_v3  ;;  %v5428_v15 = vcombine.low %v2371_v6, %v2379_v5  ;;  %v2348_v55 = vld [vmem:[%s7251_s18 + $0x160] sm:$0xff]  ;;  %v2341_v56 = vld [vmem:[%s7251_s18 + $0x128] sm:$0xff] }
 0xa09   : > { %3168 = vmatprep.subr.bf16.mxu1 %v5455_v8  ;;  %v5427_v8 = vcombine.high %v2370_v63, %v2378_v3  ;;  %v2364_v63 = vld [vmem:[%s7251_s18 + $0x1e0] sm:$0xff]  ;;  %v2357_v3 = vld [vmem:[%s7251_s18 + $0x1a8] sm:$0xff] }
 0xa0a   : > { %3209 = vmatprep.subr.bf16.mxu0 %v5457_v12  ;;  %3169 = vmatpush1.bf16.msra.mxu1 %v5454_v10  ;;  %v2386_v10 = vld [vmem:[%s7251_s18 + $0x290] sm:$0xff]  ;;  %v2387_v12 = vld [vmem:[%s7251_s18 + $0x298] sm:$0xff] }
 0xa0b   : > { %3170 = vmatprep.subr.bf16.mxu1 %v5471_v17  ;;  %v5445_v18 = vcombine.high %v2387_v12, %v2395_v13  ;;  %v5444_v25 = vcombine.low %v2387_v12, %v2395_v13  ;;  %v2381_v12 = vld [vmem:[%s7251_s18 + $0x268] sm:$0xff] }
 0xa0e   : > { %3171 = vmatpush1.bf16.msra.mxu1 %v5470_v19  ;;  %v2402_v19 = vld [vmem:[%s7251_s18 + $0x310] sm:$0xff] }
 0xa0f   : > { %3238 = vmatprep.subr.bf16.mxu1 %v5363_v27 }
 0xa95   : > { %v2278_v40 = vpop.xlane.xlu1 %2277 }
 0xa96   : > { %v2280_v41 = vmul.f32 0.0078125, %v2278_v40 }
 0xa98   : > { %v7542_v42 = vsub.f32 %v2274_v11, %v2280_v41  ;;  %v5456_v11 = vcombine.low %v2401_v7, %v2409_v9  ;;  %v2322_v41 = vld [vmem:[%s7251_s18 + $0x90] sm:$0xff]  ;;  %v5412_v7 = vcombine.low %v2355_v57, %v2363_v58  ;;  %v5429_v9 = vcombine.high %v2371_v6, %v2379_v5  ;;  %v2349_v57 = vld [vmem:[%s7251_s18 + $0x168] sm:$0xff] }
 0xa99   : > { %v2365_v6 = vld [vmem:[%s7251_s18 + $0x1e8] sm:$0xff] }
 0xa9a   : > { %v2282_v22 = vmul.f32 %v7542_v42, %v7542_v42  ;;  %3210 = vmatpush1.bf16.msra.mxu0 %v5456_v11  ;;  %v2394_v11 = vld [vmem:[%s7251_s18 + $0x2d0] sm:$0xff] }
 0xa9b   : > { %3211 = vmatprep.subr.bf16.mxu0 %v5473_v21  ;;  %v5443_v17 = vcombine.high %v2386_v10, %v2394_v11  ;;  %v2403_v21 = vld [vmem:[%s7251_s18 + $0x318] sm:$0xff]  ;;  %v5442_v24 = vcombine.low %v2386_v10, %v2394_v11  ;;  %v2380_v10 = vld [vmem:[%s7251_s18 + $0x260] sm:$0xff]  ;;  %v2373_v11 = vld [vmem:[%s7251_s18 + $0x228] sm:$0xff] }
 0xa9c   : > { %2283 = vadd.xlane.f32.xlu0 %v2282_v22  ;;  %v2330_v22 = vld [vmem:[%s7251_s18 + $0xd0] sm:$0xff]  ;;  %v5461_v27 = vcombine.high %v2403_v21, %v2411_v23 }
 0xa9d   : > { %v5379_v47 = vcombine.high %v2322_v41, %v2330_v22  ;;  %v5378_v52 = vcombine.low %v2322_v41, %v2330_v22  ;;  %v2317_v41 = vld [vmem:[%s7251_s18 + $0x68] sm:$0xff] }
 0xa9e   : > { %3212 = vmatpush1.bf16.msra.mxu0 %v5472_v20  ;;  %v2410_v20 = vld [vmem:[%s7251_s18 + $0x350] sm:$0xff] }
 0xa9f   : > { %3279 = vmatprep.subr.bf16.mxu0 %v5365_v30  ;;  %v2419_v30 = vld [vmem:[%s7251_s18 + $0x398] sm:$0xff] }
 0xb29   : > { %v2284_v31 = vpop.xlane.xlu0 %2283 }
 0xb2a   : > { %v2285_v32 = vmul.f32 0.0078125, %v2284_v31  ;;  %v2427_v31 = vld [vmem:[%s7251_s18 + $0x3d8] sm:$0xff] }
 0xb2b   : > { %v5476_v43 = vcombine.low %v2419_v30, %v2427_v31 }
 0xb2c   : > { %v2286_v33 = vadd.f32 1e-05, %v2285_v32  ;;  %v5458_v32 = vcombine.low %v2402_v19, %v2410_v20 }
 0xb2e   : > { %6410 = vrsqrt.f32 %v2286_v33  ;;  %v5460_v33 = vcombine.low %v2403_v21, %v2411_v23  ;;  %v2397_v21 = vld [vmem:[%s7251_s18 + $0x2e8] sm:$0xff] }
 0xb38   : > { %v6411_v34 = vpop.eup %6410 }
 0xb39   : > { %v2288_v36 = vmul.f32 %v6411_v34, %v7542_v42  ;;  %v2346_v42 = vld [vmem:[%s7251_s18 + $0x150] sm:$0xff] }
 0xb3a   : > { %v5395_v39 = vcombine.high %v2338_v49, %v2346_v42  ;;  %v5394_v59 = vcombine.low %v2338_v49, %v2346_v42  ;;  %v2332_v49 = vld [vmem:[%s7251_s18 + $0xe0] sm:$0xff]  ;;  %v2325_v42 = vld [vmem:[%s7251_s18 + $0xa8] sm:$0xff] }
 0xb3b   : > { %v2295_v40 = vmul.f32 %v5356_v35, %v2288_v36  ;;  %v5477_v35 = vcombine.high %v2419_v30, %v2427_v31  ;;  %v2308_v36 = vld [vmem:[%s7251_s18 + $0x20] sm:$0xff]  ;;  %v2413_v30 = vld [vmem:[%s7251_s18 + $0x368] sm:$0xff] }
 0xb3d   : > { %v7579_v45 = vadd.f32 %v5357_v37, %v2295_v40  ;;  %v2316_v37 = vld [vmem:[%s7251_s18 + $0x60] sm:$0xff]  ;;  %v2309_v40 = vld [vmem:[%s7251_s18 + $0x28] sm:$0xff] }
 0xb3e   : > { %v5367_v44 = vcombine.high %v2308_v36, %v2316_v37  ;;  %v5366_v51 = vcombine.low %v2308_v36, %v2316_v37  ;;  %v2428_v36 = vld [vmem:[%s7251_s18 + $0x3e0] sm:$0xff]  ;;  %v2421_v37 = vld [vmem:[%s7251_s18 + $0x3a8] sm:$0xff] }
 0xb3f   : > { %v7583_v46 = vpack.c.bf16 %v7579_v45, %v7579_v45 }
 0xb41   : > { %3189 = vmatmul.mubr.bf16.vlgmr.msra.gmra.mrb[44].mxu1 %v7583_v46  ;;  %3230 = vmatmul.mubr.bf16.vlgmr.msra.gmra.mrb[32].mxu0 %v7583_v46 }
 0xb42   : > { %3239 = vmatpush1.bf16.msra.mxu1 %v5362_v26  ;;  %3280 = vmatpush1.bf16.msra.mxu0 %v5364_v29  ;;  %v5459_v26 = vcombine.high %v2402_v19, %v2410_v20  ;;  %v2426_v29 = vld [vmem:[%s7251_s18 + $0x3d0] sm:$0xff]  ;;  %v2396_v19 = vld [vmem:[%s7251_s18 + $0x2e0] sm:$0xff]  ;;  %v2389_v20 = vld [vmem:[%s7251_s18 + $0x2a8] sm:$0xff] }
 0xb43   : > { %3240 = vmatprep.subr.bf16.mxu1 %v5379_v47  ;;  %3281 = vmatprep.subr.bf16.mxu0 %v5381_v48  ;;  %v5475_v34 = vcombine.high %v2418_v28, %v2426_v29  ;;  %v5474_v22 = vcombine.low %v2418_v28, %v2426_v29  ;;  %v5369_v47 = vcombine.high %v2309_v40, %v2317_v41  ;;  %v2324_v48 = vld [vmem:[%s7251_s18 + $0xa0] sm:$0xff]  ;;  %v2405_v29 = vld [vmem:[%s7251_s18 + $0x328] sm:$0xff] }
 0xb44   : > { %3270 = vmatprep.mubr.bf16.mxu1 %v6782_v38  ;;  %3311 = vmatprep.mubr.bf16.mxu0 %v6782_v38  ;;  %v5382_v58 = vcombine.low %v2324_v48, %v2332_v49  ;;  %v2412_v28 = vld [vmem:[%s7251_s18 + $0x360] sm:$0xff] }
 0xb46   : > { %3241 = vmatpush1.bf16.msra.mxu1 %v5378_v52  ;;  %3282 = vmatpush1.bf16.msra.mxu0 %v5380_v53  ;;  %v5368_v52 = vcombine.low %v2309_v40, %v2317_v41  ;;  %v5383_v53 = vcombine.high %v2324_v48, %v2332_v49  ;;  %v2429_v40 = vld [vmem:[%s7251_s18 + $0x3e8] sm:$0xff]  ;;  %v2318_v48 = vld [vmem:[%s7251_s18 + $0x70] sm:$0xff]  ;;  %v2311_v49 = vld [vmem:[%s7251_s18 + $0x38] sm:$0xff] }
 0xb47   : > { %3242 = vmatprep.subr.bf16.mxu1 %v5395_v39  ;;  %3283 = vmatprep.subr.bf16.mxu0 %v5397_v54  ;;  %v5385_v39 = vcombine.high %v2325_v42, %v2333_v50  ;;  %v2340_v54 = vld [vmem:[%s7251_s18 + $0x120] sm:$0xff] }
 0xb48   : > { %v5398_v5 = vcombine.low %v2340_v54, %v2348_v55 }
 0xb4a   : > { %3243 = vmatpush1.bf16.msra.mxu1 %v5394_v59  ;;  %3284 = vmatpush1.bf16.msra.mxu0 %v5396_v60  ;;  %v5384_v59 = vcombine.low %v2325_v42, %v2333_v50  ;;  %v5399_v60 = vcombine.high %v2340_v54, %v2348_v55  ;;  %v2319_v42 = vld [vmem:[%s7251_s18 + $0x78] sm:$0xff]  ;;  %v2334_v54 = vld [vmem:[%s7251_s18 + $0xf0] sm:$0xff] }
 0xb4b   : > { %3244 = vmatprep.subr.bf16.mxu1 %v5411_v61  ;;  %3285 = vmatprep.subr.bf16.mxu0 %v5413_v62  ;;  %v5401_v61 = vcombine.high %v2341_v56, %v2349_v57  ;;  %v2356_v62 = vld [vmem:[%s7251_s18 + $0x1a0] sm:$0xff]  ;;  %v2327_v55 = vld [vmem:[%s7251_s18 + $0xb8] sm:$0xff] }
 0xb4c   : > { %v5414_v13 = vcombine.low %v2356_v62, %v2364_v63 }
 0xb4e   : > { %3245 = vmatpush1.bf16.msra.mxu1 %v5410_v0  ;;  %3286 = vmatpush1.bf16.msra.mxu0 %v5412_v7  ;;  %v5400_v0 = vcombine.low %v2341_v56, %v2349_v57  ;;  %v5415_v7 = vcombine.high %v2356_v62, %v2364_v63  ;;  %v2335_v56 = vld [vmem:[%s7251_s18 + $0xf8] sm:$0xff]  ;;  %v2350_v62 = vld [vmem:[%s7251_s18 + $0x170] sm:$0xff] }
 0xb4f   : > { %3246 = vmatprep.subr.bf16.mxu1 %v5427_v8  ;;  %3287 = vmatprep.subr.bf16.mxu0 %v5429_v9  ;;  %v5417_v8 = vcombine.high %v2357_v3, %v2365_v6  ;;  %v2372_v9 = vld [vmem:[%s7251_s18 + $0x220] sm:$0xff]  ;;  %v2343_v63 = vld [vmem:[%s7251_s18 + $0x138] sm:$0xff] }
 0xb50   : > { %v5430_v23 = vcombine.low %v2372_v9, %v2380_v10 }
 0xb52   : > { %3247 = vmatpush1.bf16.msra.mxu1 %v5426_v14  ;;  %3288 = vmatpush1.bf16.msra.mxu0 %v5428_v15  ;;  %v5416_v14 = vcombine.low %v2357_v3, %v2365_v6  ;;  %v5431_v15 = vcombine.high %v2372_v9, %v2380_v10  ;;  %v2351_v3 = vld [vmem:[%s7251_s18 + $0x178] sm:$0xff]  ;;  %v2366_v9 = vld [vmem:[%s7251_s18 + $0x1f0] sm:$0xff] }
 0xb53   : > { %3248 = vmatprep.subr.bf16.mxu1 %v5443_v17  ;;  %3289 = vmatprep.subr.bf16.mxu0 %v5445_v18  ;;  %v5433_v17 = vcombine.high %v2373_v11, %v2381_v12  ;;  %v2388_v18 = vld [vmem:[%s7251_s18 + $0x2a0] sm:$0xff]  ;;  %v2359_v10 = vld [vmem:[%s7251_s18 + $0x1b8] sm:$0xff] }
 0xb54   : > { %v5446_v31 = vcombine.low %v2388_v18, %v2396_v19 }
 0xb56   : > { %3249 = vmatpush1.bf16.msra.mxu1 %v5442_v24  ;;  %3290 = vmatpush1.bf16.msra.mxu0 %v5444_v25  ;;  %v5432_v24 = vcombine.low %v2373_v11, %v2381_v12  ;;  %v5447_v25 = vcombine.high %v2388_v18, %v2396_v19  ;;  %v2367_v11 = vld [vmem:[%s7251_s18 + $0x1f8] sm:$0xff]  ;;  %v2382_v18 = vld [vmem:[%s7251_s18 + $0x270] sm:$0xff] }
 0xb57   : > { %3250 = vmatprep.subr.bf16.mxu1 %v5459_v26  ;;  %3291 = vmatprep.subr.bf16.mxu0 %v5461_v27  ;;  %v5449_v26 = vcombine.high %v2389_v20, %v2397_v21  ;;  %v2404_v27 = vld [vmem:[%s7251_s18 + $0x320] sm:$0xff]  ;;  %v2375_v19 = vld [vmem:[%s7251_s18 + $0x238] sm:$0xff] }
 0xb58   : > { %v5462_v41 = vcombine.low %v2404_v27, %v2412_v28 }
 0xb5a   : > { %3251 = vmatpush1.bf16.msra.mxu1 %v5458_v32  ;;  %3292 = vmatpush1.bf16.msra.mxu0 %v5460_v33  ;;  %v5448_v32 = vcombine.low %v2389_v20, %v2397_v21  ;;  %v5463_v33 = vcombine.high %v2404_v27, %v2412_v28  ;;  %v2383_v20 = vld [vmem:[%s7251_s18 + $0x278] sm:$0xff] }
 0xb5b   : > { %3252 = vmatprep.subr.bf16.mxu1 %v5475_v34  ;;  %3293 = vmatprep.subr.bf16.mxu0 %v5477_v35  ;;  %v5465_v34 = vcombine.high %v2405_v29, %v2413_v30  ;;  %v2420_v35 = vld [vmem:[%s7251_s18 + $0x3a0] sm:$0xff]  ;;  %v2391_v27 = vld [vmem:[%s7251_s18 + $0x2b8] sm:$0xff] }
 0xb5c   : > { %v5478_v50 = vcombine.low %v2420_v35, %v2428_v36  ;;  %v2399_v28 = vld [vmem:[%s7251_s18 + $0x2f8] sm:$0xff] }
 0xb5e   : > { %3253 = vmatpush1.bf16.msra.mxu1 %v5474_v22  ;;  %3294 = vmatpush1.bf16.msra.mxu0 %v5476_v43  ;;  %v5464_v22 = vcombine.low %v2405_v29, %v2413_v30  ;;  %v5479_v43 = vcombine.high %v2420_v35, %v2428_v36  ;;  %v5436_v30 = vcombine.low %v2375_v19, %v2383_v20  ;;  %v2407_v35 = vld [vmem:[%s7251_s18 + $0x338] sm:$0xff] }
 0xb5f   : > { %3320 = vmatprep.subr.bf16.mxu1 %v5367_v44  ;;  %3361 = vmatprep.subr.bf16.mxu0 %v5369_v47  ;;  %v5481_v44 = vcombine.high %v2421_v37, %v2429_v40  ;;  %v2310_v47 = vld [vmem:[%s7251_s18 + $0x30] sm:$0xff]  ;;  %v2415_v36 = vld [vmem:[%s7251_s18 + $0x378] sm:$0xff] }
 0xb60   : > { %v5370_v57 = vcombine.low %v2310_v47, %v2318_v48 }
 0xb61   : > { %3271 = vmatmul.mubr.bf16.vlgmr.msra.gmra.mrb[48].mxu1 %v7583_v46  ;;  %3312 = vmatmul.mubr.bf16.vlgmr.msra.gmra.mrb[36].mxu0 %v7583_v46 }
 0xb62   : > { %3321 = vmatpush1.bf16.msra.mxu1 %v5366_v51  ;;  %3362 = vmatpush1.bf16.msra.mxu0 %v5368_v52  ;;  %v5480_v51 = vcombine.low %v2421_v37, %v2429_v40  ;;  %v5371_v52 = vcombine.high %v2310_v47, %v2318_v48  ;;  %v5452_v40 = vcombine.low %v2391_v27, %v2399_v28  ;;  %v2423_v47 = vld [vmem:[%s7251_s18 + $0x3b8] sm:$0xff] }
 0xb63   : > { %3322 = vmatprep.subr.bf16.mxu1 %v5383_v53  ;;  %3363 = vmatprep.subr.bf16.mxu0 %v5385_v39  ;;  %v5373_v53 = vcombine.high %v2311_v49, %v2319_v42  ;;  %v2326_v39 = vld [vmem:[%s7251_s18 + $0xb0] sm:$0xff]  ;;  %v2431_v48 = vld [vmem:[%s7251_s18 + $0x3f8] sm:$0xff] }
 0xb64   : > { %3352 = vmatprep.mubr.bf16.mxu1 %v6782_v38  ;;  %3393 = vmatprep.mubr.bf16.mxu0 %v6782_v38  ;;  %v5386_v6 = vcombine.low %v2326_v39, %v2334_v54 }
 0xb66   : > { %3323 = vmatpush1.bf16.msra.mxu1 %v5382_v58  ;;  %3364 = vmatpush1.bf16.msra.mxu0 %v5384_v59  ;;  %v5372_v58 = vcombine.low %v2311_v49, %v2319_v42  ;;  %v5387_v59 = vcombine.high %v2326_v39, %v2334_v54  ;;  %v5468_v42 = vcombine.low %v2407_v35, %v2415_v36  ;;  %v6250_v39 = vld [vmem:[%s7289_s13 + $0x40] sm:$0xff]  }
 0xb67   : > { %3324 = vmatprep.subr.bf16.mxu1 %v5399_v60  ;;  %3365 = vmatprep.subr.bf16.mxu0 %v5401_v61  ;;  %v5389_v60 = vcombine.high %v2327_v55, %v2335_v56  ;;  %v2342_v61 = vld [vmem:[%s7251_s18 + $0x130] sm:$0xff]  ;;  %v6251_v54 = vld [vmem:[%s7289_s13 + $0xc0] sm:$0xff]  }
 0xb68   : > { %v5402_v12 = vcombine.low %v2342_v61, %v2350_v62 }
 0xb6a   : > { %3325 = vmatpush1.bf16.msra.mxu1 %v5398_v5  ;;  %3366 = vmatpush1.bf16.msra.mxu0 %v5400_v0  ;;  %v5388_v5 = vcombine.low %v2327_v55, %v2335_v56  ;;  %v5403_v0 = vcombine.high %v2342_v61, %v2350_v62  ;;  %v6252_v55 = vld [vmem:[%s7289_s13] sm:$0xff]   ;;  %v6258_v61 = vld [vmem:[%s7289_s13 + $0x50] sm:$0xff]  }
 0xb6b   : > { %3326 = vmatprep.subr.bf16.mxu1 %v5415_v7  ;;  %3367 = vmatprep.subr.bf16.mxu0 %v5417_v8  ;;  %v5405_v7 = vcombine.high %v2343_v63, %v2351_v3  ;;  %v2358_v8 = vld [vmem:[%s7251_s18 + $0x1b0] sm:$0xff]  ;;  %v6253_v56 = vld [vmem:[%s7289_s13 + $0x80] sm:$0xff]  }
 0xb6c   : > { %v5418_v21 = vcombine.low %v2358_v8, %v2366_v9  ;;  %v6259_v62 = vld [vmem:[%s7289_s13 + $0xd0] sm:$0xff]  }
 0xb6e   : > { %3327 = vmatpush1.bf16.msra.mxu1 %v5414_v13  ;;  %3368 = vmatpush1.bf16.msra.mxu0 %v5416_v14  ;;  %v5404_v13 = vcombine.low %v2343_v63, %v2351_v3  ;;  %v5419_v14 = vcombine.high %v2358_v8, %v2366_v9  ;;  %v6260_v63 = vld [vmem:[%s7289_s13 + $0x10] sm:$0xff]   ;;  %v6267_v8 = vld [vmem:[%s7289_s13 + $0xe0] sm:$0xff]  }
 0xb6f   : > { %3328 = vmatprep.subr.bf16.mxu1 %v5431_v15  ;;  %3369 = vmatprep.subr.bf16.mxu0 %v5433_v17  ;;  %v5421_v15 = vcombine.high %v2359_v10, %v2367_v11  ;;  %v2374_v17 = vld [vmem:[%s7251_s18 + $0x230] sm:$0xff]  ;;  %v6268_v9 = vld [vmem:[%s7289_s13 + $0x20] sm:$0xff]  }
 0xb70   : > { %v5434_v29 = vcombine.low %v2374_v17, %v2382_v18  ;;  %v6261_v3 = vld [vmem:[%s7289_s13 + $0x90] sm:$0xff]  }
 0xb72   : > { %3329 = vmatpush1.bf16.msra.mxu1 %v5430_v23  ;;  %3370 = vmatpush1.bf16.msra.mxu0 %v5432_v24  ;;  %v5435_v23 = vcombine.high %v2374_v17, %v2382_v18  ;;  %v5437_v24 = vcombine.high %v2375_v19, %v2383_v20  ;;  %v6275_v17 = vld [vmem:[%s7289_s13 + $0xf0] sm:$0xff]   ;;  %v6278_v20 = vld [vmem:[%s7289_s13 + $0x78] sm:$0xff]  }
 0xb73   : > { %3330 = vmatprep.subr.bf16.mxu1 %v5447_v25  ;;  %3371 = vmatprep.subr.bf16.mxu0 %v5449_v26  ;;  %v2390_v25 = vld [vmem:[%s7251_s18 + $0x2b0] sm:$0xff] }
 0xb74   : > { %v2398_v26 = vld [vmem:[%s7251_s18 + $0x2f0] sm:$0xff] }
 0xb75   : > { %v5450_v37 = vcombine.low %v2390_v25, %v2398_v26  ;;  %v6276_v18 = vld [vmem:[%s7289_s13 + $0x30] sm:$0xff]  }
 0xb76   : > { %3331 = vmatpush1.bf16.msra.mxu1 %v5446_v31  ;;  %3372 = vmatpush1.bf16.msra.mxu0 %v5448_v32  ;;  %v5451_v31 = vcombine.high %v2390_v25, %v2398_v26  ;;  %v5453_v32 = vcombine.high %v2391_v27, %v2399_v28  ;;  %v6277_v19 = vld [vmem:[%s7289_s13 + $0xb0] sm:$0xff]   ;;  %v6283_v25 = vld [vmem:[%s7289_s13 + $0x1c0] sm:$0xff]   ;;  %v2450_v27 = vsub.s32 3, %v7334_v1 }
 0xb77   : > { %3332 = vmatprep.subr.bf16.mxu1 %v5463_v33  ;;  %3373 = vmatprep.subr.bf16.mxu0 %v5465_v34  ;;  %v2406_v33 = vld [vmem:[%s7251_s18 + $0x330] sm:$0xff] }
 0xb78   : > { %v2414_v34 = vld [vmem:[%s7251_s18 + $0x370] sm:$0xff] }
 0xb79   : > { %v5466_v49 = vcombine.low %v2406_v33, %v2414_v34  ;;  %v7722_v26 = vld [vmem:[%s7275_s15] sm:$0xff] }
 0xb7a   : > { %3333 = vmatpush1.bf16.msra.mxu1 %v5462_v41  ;;  %3374 = vmatpush1.bf16.msra.mxu0 %v5464_v22  ;;  %v5467_v41 = vcombine.high %v2406_v33, %v2414_v34  ;;  %v5469_v22 = vcombine.high %v2407_v35, %v2415_v36  ;;  %v2439_v28 = vrot.slane %v7722_v26, %v7341_v4 }
 0xb7b   : > { %3334 = vmatprep.subr.bf16.mxu1 %v5479_v43  ;;  %3375 = vmatprep.subr.bf16.mxu0 %v5481_v44  ;;  %v2422_v43 = vld [vmem:[%s7251_s18 + $0x3b0] sm:$0xff] }
 0xb7c   : > { %v2430_v44 = vld [vmem:[%s7251_s18 + $0x3f0] sm:$0xff] }
 0xb7e   : > { %3335 = vmatpush1.bf16.msra.mxu1 %v5478_v50  ;;  %3376 = vmatpush1.bf16.msra.mxu0 %v5480_v51  ;;  %v5483_v50 = vcombine.high %v2422_v43, %v2430_v44  ;;  %v5485_v51 = vcombine.high %v2423_v47, %v2431_v48 }
 0xb7f   : > { %3402 = vmatprep.subr.bf16.mxu1 %v5371_v52  ;;  %3443 = vmatprep.subr.bf16.mxu0 %v5373_v53  ;;  %v5482_v52 = vcombine.low %v2422_v43, %v2430_v44  ;;  %v5484_v53 = vcombine.low %v2423_v47, %v2431_v48 }
 0xb81   : > { %3353 = vmatmul.mubr.bf16.vlgmr.msra.gmra.mrb[52].mxu1 %v7583_v46  ;;  %3394 = vmatmul.mubr.bf16.vlgmr.msra.gmra.mrb[40].mxu0 %v7583_v46 }
 0xb82   : > { %3403 = vmatpush1.bf16.msra.mxu1 %v5370_v57  ;;  %3444 = vmatpush1.bf16.msra.mxu0 %v5372_v58  ;;  %v6254_v57 = vld [vmem:[%s7289_s13 + $0x48] sm:$0xff]  }
 0xb83   : > { %3404 = vmatprep.subr.bf16.mxu1 %v5387_v59  ;;  %3445 = vmatprep.subr.bf16.mxu0 %v5389_v60  ;;  %v6255_v58 = vld [vmem:[%s7289_s13 + $0xc8] sm:$0xff]  }
 0xb84   : > { %3434 = vmatprep.mubr.bf16.mxu1 %v6782_v38  ;;  %3475 = vmatprep.mubr.bf16.mxu0 %v6782_v38  ;;  %v5420_v38 = vcombine.low %v2359_v10, %v2367_v11  ;;  %v6256_v59 = vld [vmem:[%s7289_s13 + $0x8] sm:$0xff]   ;;  %v6269_v10 = vld [vmem:[%s7289_s13 + $0xa0] sm:$0xff]  }
 0xb85   : > { %v6257_v60 = vld [vmem:[%s7289_s13 + $0x88] sm:$0xff]  }
 0xb86   : > { %3405 = vmatpush1.bf16.msra.mxu1 %v5386_v6  ;;  %3446 = vmatpush1.bf16.msra.mxu0 %v5388_v5  ;;  %v6263_v6 = vld [vmem:[%s7289_s13 + $0xd8] sm:$0xff]   ;;  %v6270_v11 = vld [vmem:[%s7289_s13 + $0x68] sm:$0xff]  }
 0xb87   : > { %3406 = vmatprep.subr.bf16.mxu1 %v5403_v0  ;;  %3447 = vmatprep.subr.bf16.mxu0 %v5405_v7  ;;  %v6264_v5 = vld [vmem:[%s7289_s13 + $0x18] sm:$0xff]   ;;  %v6266_v7 = vld [vmem:[%s7289_s13 + $0x60] sm:$0xff]  }
 0xb88   : > { %v6265_v0 = vld [vmem:[%s7289_s13 + $0x98] sm:$0xff]  }
 0xb8a   : > { %3407 = vmatpush1.bf16.msra.mxu1 %v5402_v12  ;;  %3448 = vmatpush1.bf16.msra.mxu0 %v5404_v13  ;;  %v6271_v12 = vld [vmem:[%s7289_s13 + $0xe8] sm:$0xff]  }
 0xb8b   : > { %3408 = vmatprep.subr.bf16.mxu1 %v5419_v14  ;;  %3449 = vmatprep.subr.bf16.mxu0 %v5421_v15  ;;  %v6272_v13 = vld [vmem:[%s7289_s13 + $0x28] sm:$0xff]   ;;  %v6274_v15 = vld [vmem:[%s7289_s13 + $0x70] sm:$0xff]  }
 0xb8c   : > { %v6273_v14 = vld [vmem:[%s7289_s13 + $0xa8] sm:$0xff]  }
 0xb8e   : > { %3409 = vmatpush1.bf16.msra.mxu1 %v5418_v21  ;;  %3450 = vmatpush1.bf16.msra.mxu0 %v5420_v38  ;;  %v6279_v21 = vld [vmem:[%s7289_s13 + $0xf8] sm:$0xff]  }
 0xb8f   : > { %3410 = vmatprep.subr.bf16.mxu1 %v5435_v23  ;;  %3451 = vmatprep.subr.bf16.mxu0 %v5437_v24  ;;  %v6280_v38 = vld [vmem:[%s7289_s13 + $0x38] sm:$0xff]   ;;  %v6282_v24 = vld [vmem:[%s7289_s13 + $0x140] sm:$0xff]  }
 0xb90   : > { %v6281_v23 = vld [vmem:[%s7289_s13 + $0xb8] sm:$0xff]  }
 0xb92   : > { %3411 = vmatpush1.bf16.msra.mxu1 %v5434_v29  ;;  %3452 = vmatpush1.bf16.msra.mxu0 %v5436_v30  ;;  %v2447_v29 = vrot.slane %v7722_v26, %v7361_v16  ;;  %v2443_v30 = vrot.slane %v7722_v26, %v7337_v2 }
 0xb93   : > { %3412 = vmatprep.subr.bf16.mxu1 %v5451_v31  ;;  %3453 = vmatprep.subr.bf16.mxu0 %v5453_v32  ;;  %v2451_v31 = vrot.slane %v7722_v26, %v2450_v27 }
 0xb96   : > { %3413 = vmatpush1.bf16.msra.mxu1 %v5450_v37  ;;  %3454 = vmatpush1.bf16.msra.mxu0 %v5452_v40 }
 0xb97   : > { %3414 = vmatprep.subr.bf16.mxu1 %v5467_v41  ;;  %3455 = vmatprep.subr.bf16.mxu0 %v5469_v22 }
 0xb9a   : > { %3415 = vmatpush1.bf16.msra.mxu1 %v5466_v49  ;;  %3456 = vmatpush1.bf16.msra.mxu0 %v5468_v42 }
 0xb9b   : > { %3416 = vmatprep.subr.bf16.mxu1 %v5483_v50  ;;  %3457 = vmatprep.subr.bf16.mxu0 %v5485_v51 }
 0xb9e   : > { %3417 = vmatpush1.bf16.msra.mxu1 %v5482_v52  ;;  %3458 = vmatpush1.bf16.msra.mxu0 %v5484_v53  ;;  %v6284_v53 = vld [vmem:[%s7289_s13 + $0x100] sm:$0xff]  }
 0xb9f   : > { %5679 = vmatprep.subr.bf16.mxu1 %v6250_v39  ;;  %5701 = vmatprep.subr.bf16.mxu0 %v6251_v54  ;;  %v6285_v39 = vld [vmem:[%s7289_s13 + $0x180] sm:$0xff]  }
 0xba1   : > { %3435 = vmatmul.mubr.bf16.vlgmr.msra.gmra.mrb[56].mxu1 %v7583_v46  ;;  %3476 = vmatmul.mubr.bf16.vlgmr.msra.gmra.mrb[44].mxu0 %v7583_v46  ;;  %v6262_v46 = vld [vmem:[%s7289_s13 + $0x58] sm:$0xff]  }
 0xba2   : > { %5680 = vmatpush3.bf16.msra.mxu1 %v6252_v55  ;;  %5702 = vmatpush3.bf16.msra.mxu0 %v6253_v56  ;;  %v6286_v56 = vld [vmem:[%s7289_s13 + $0x148] sm:$0xff]  }
 0xba3   : > { %5681 = vmatprep.subr.bf16.mxu1 %v6254_v57  ;;  %5703 = vmatprep.subr.bf16.mxu0 %v6255_v58  ;;  %v6287_v57 = vld [vmem:[%s7289_s13 + $0x1c8] sm:$0xff]  }
 0xba4   : > { %v6288_v58 = vld [vmem:[%s7289_s13 + $0x108] sm:$0xff]  }
 0xba6   : > { %5682 = vmatpush3.bf16.msra.mxu1 %v6256_v59  ;;  %5704 = vmatpush3.bf16.msra.mxu0 %v6257_v60  ;;  %v6289_v59 = vld [vmem:[%s7289_s13 + $0x188] sm:$0xff]   ;;  %v6290_v60 = vld [vmem:[%s7289_s13 + $0x150] sm:$0xff]  }
 0xba7   : > { %5683 = vmatprep.subr.bf16.mxu1 %v6258_v61  ;;  %5705 = vmatprep.subr.bf16.mxu0 %v6259_v62  ;;  %v6291_v61 = vld [vmem:[%s7289_s13 + $0x1d0] sm:$0xff]  }
 0xba8   : > { %v6292_v62 = vld [vmem:[%s7289_s13 + $0x110] sm:$0xff]  }
 0xbaa   : > { %5684 = vmatpush3.bf16.msra.mxu1 %v6260_v63  ;;  %5706 = vmatpush3.bf16.msra.mxu0 %v6261_v3  ;;  %v6293_v63 = vld [vmem:[%s7289_s13 + $0x190] sm:$0xff]   ;;  %v6294_v3 = vld [vmem:[%s7289_s13 + $0x158] sm:$0xff]  }
 0xbab   : > { %5685 = vmatprep.subr.bf16.mxu1 %v6262_v46  ;;  %5707 = vmatprep.subr.bf16.mxu0 %v6263_v6  ;;  %v6295_v46 = vld [vmem:[%s7289_s13 + $0x1d8] sm:$0xff]  }
 0xbac   : > { %v6296_v6 = vld [vmem:[%s7289_s13 + $0x118] sm:$0xff]  }
 0xbae   : > { %5686 = vmatpush3.bf16.msra.mxu1 %v6264_v5  ;;  %5708 = vmatpush3.bf16.msra.mxu0 %v6265_v0  ;;  %v6297_v5 = vld [vmem:[%s7289_s13 + $0x198] sm:$0xff]   ;;  %v6298_v0 = vld [vmem:[%s7289_s13 + $0x160] sm:$0xff]  }
 0xbaf   : > { %5687 = vmatprep.subr.bf16.mxu1 %v6266_v7  ;;  %5709 = vmatprep.subr.bf16.mxu0 %v6267_v8  ;;  %v6299_v7 = vld [vmem:[%s7289_s13 + $0x1e0] sm:$0xff]  }
 0xbb0   : > { %v6300_v8 = vld [vmem:[%s7289_s13 + $0x120] sm:$0xff]  }
 0xbb2   : > { %5688 = vmatpush3.bf16.msra.mxu1 %v6268_v9  ;;  %5710 = vmatpush3.bf16.msra.mxu0 %v6269_v10  ;;  %v6301_v9 = vld [vmem:[%s7289_s13 + $0x1a0] sm:$0xff]   ;;  %v6302_v10 = vld [vmem:[%s7289_s13 + $0x168] sm:$0xff]  }
 0xbb3   : > { %5689 = vmatprep.subr.bf16.mxu1 %v6270_v11  ;;  %5711 = vmatprep.subr.bf16.mxu0 %v6271_v12  ;;  %v6303_v11 = vld [vmem:[%s7289_s13 + $0x1e8] sm:$0xff]   ;;  %v2454_v12 = vsub.s32 4, %v7334_v1 }
 0xbb6   : > { %5690 = vmatpush3.bf16.msra.mxu1 %v6272_v13  ;;  %5712 = vmatpush3.bf16.msra.mxu0 %v6273_v14  ;;  %v2462_v13 = vsub.s32 6, %v7334_v1  ;;  %v6304_v14 = vld [vmem:[%s7289_s13 + $0x128] sm:$0xff]  }
 0xbb7   : > { %5691 = vmatprep.subr.bf16.mxu1 %v6274_v15  ;;  %5713 = vmatprep.subr.bf16.mxu0 %v6275_v17  ;;  %v6305_v15 = vld [vmem:[%s7289_s13 + $0x1a8] sm:$0xff]   ;;  %v2458_v17 = vsub.s32 5, %v7334_v1 }
 0xbba   : > { %5692 = vmatpush3.bf16.msra.mxu1 %v6276_v18  ;;  %5714 = vmatpush3.bf16.msra.mxu0 %v6277_v19  ;;  %v2466_v18 = vsub.s32 7, %v7334_v1  ;;  %v6306_v19 = vld [vmem:[%s7289_s13 + $0x170] sm:$0xff]  }
 0xbbb   : > { %5693 = vmatprep.subr.bf16.mxu1 %v6278_v20  ;;  %5715 = vmatprep.subr.bf16.mxu0 %v6279_v21  ;;  %v6307_v20 = vld [vmem:[%s7289_s13 + $0x1f0] sm:$0xff]   ;;  %v2455_v21 = vrot.slane %v7722_v26, %v2454_v12 }
 0xbbe   : > { %5694 = vmatpush3.bf16.msra.mxu1 %v6280_v38  ;;  %5716 = vmatpush3.bf16.msra.mxu0 %v6281_v23  ;;  %v2463_v38 = vrot.slane %v7722_v26, %v2462_v13  ;;  %v2459_v23 = vrot.slane %v7722_v26, %v2458_v17 }
 0xbbf   : > { %5723 = vmatprep.subr.bf16.mxu1 %v6282_v24  ;;  %5745 = vmatprep.subr.bf16.mxu0 %v6283_v25  ;;  %v2467_v24 = vrot.slane %v7722_v26, %v2466_v18  ;;  %v6308_v25 = vld [vmem:[%s7289_s13 + $0x130] sm:$0xff]  }
 0xc14   : > { %v3190_v32 = vpop.f32.mrb[44].mxu1  ;;  %v3231_v33 = vpop.f32.mrb[32].mxu0 }
 0xc15   : > { %v3191_v34 = vadd.f32 %v3190_v32, %v2439_v28  ;;  %v3232_v35 = vadd.f32 %v3231_v33, %v2447_v29  ;;  %v3192_v36 = vpop.f32.mrb[45].mxu1  ;;  %v3233_v37 = vpop.f32.mrb[33].mxu0  ;;  %v6309_v28 = vld [vmem:[%s7289_s13 + $0x1b0] sm:$0xff]   ;;  %v6310_v29 = vld [vmem:[%s7289_s13 + $0x178] sm:$0xff]  }
 0xc16   : > { %v3193_v40 = vadd.f32 %v3192_v36, %v2443_v30  ;;  %v3234_v41 = vadd.f32 %v3233_v37, %v2451_v31  ;;  %v3194_v22 = vpop.f32.mrb[46].mxu1  ;;  %v3235_v43 = vpop.f32.mrb[34].mxu0  ;;  %v6311_v30 = vld [vmem:[%s7289_s13 + $0x1f8] sm:$0xff]  }
 0xc17   : > { %v3484_v44 = vmax.f32 %v3191_v34, 0.0  ;;  %v3486_v47 = vmax.f32 %v3232_v35, 0.0  ;;  %v3195_v48 = vpop.f32.mrb[47].mxu1  ;;  %v3236_v49 = vpop.f32.mrb[35].mxu0  ;;  %v6312_v22 = vld [vmem:[%s7289_s13 + $0x138] sm:$0xff]  }
 0xc18   : > { %v3485_v42 = vmax.f32 %v3193_v40, 0.0  ;;  %v3487_v50 = vmax.f32 %v3234_v41, 0.0  ;;  %v6313_v43 = vld [vmem:[%s7289_s13 + $0x1b8] sm:$0xff]  }
 0xc19   : > { %v3500_v54 = vpack.c.bf16 %v3484_v44, %v3484_v44  ;;  %v3502_v55 = vpack.c.bf16 %v3486_v47, %v3486_v47 }
 0xc1a   : > { %v3501_v51 = vpack.c.bf16 %v3485_v42, %v3485_v42  ;;  %v3503_v52 = vpack.c.bf16 %v3487_v50, %v3487_v50  ;;  %v6314_v42 = vld [vmem:[%s7289_s13 + $0x240] sm:$0xff]  }
 0xc1b   : > { %v6315_v50 = vld [vmem:[%s7289_s13 + $0x2c0] sm:$0xff]  }
 0xc1c   : > { %4579 = vmatprep.mubr.bf16.mxu1 %v3501_v51  ;;  %4619 = vmatprep.mubr.bf16.mxu0 %v3503_v52 }
 0xc1d   : > { %4580 = vmatmul.mubr.bf16.vlgmr.msra.gmra.mrb[60].mxu1 %v3500_v54  ;;  %4620 = vmatmul.mubr.bf16.vlgmr.msra.gmra.mrb[48].mxu0 %v3502_v55  ;;  %v6316_v54 = vld [vmem:[%s7289_s13 + $0x200] sm:$0xff]  }
 0xc1e   : > { %5724 = vmatpush3.bf16.msra.mxu1 %v6284_v53  ;;  %5746 = vmatpush3.bf16.msra.mxu0 %v6285_v39  ;;  %v6317_v55 = vld [vmem:[%s7289_s13 + $0x280] sm:$0xff]  }
 0xc1f   : > { %5725 = vmatprep.subr.bf16.mxu1 %v6286_v56  ;;  %5747 = vmatprep.subr.bf16.mxu0 %v6287_v57 }
 0xc22   : > { %5726 = vmatpush3.bf16.msra.mxu1 %v6288_v58  ;;  %5748 = vmatpush3.bf16.msra.mxu0 %v6289_v59  ;;  %v6318_v58 = vld [vmem:[%s7289_s13 + $0x248] sm:$0xff]  }
 0xc23   : > { %5727 = vmatprep.subr.bf16.mxu1 %v6290_v60  ;;  %5749 = vmatprep.subr.bf16.mxu0 %v6291_v61  ;;  %v6319_v59 = vld [vmem:[%s7289_s13 + $0x2c8] sm:$0xff]  }
 0xc24   : > { %v6320_v60 = vld [vmem:[%s7289_s13 + $0x208] sm:$0xff]  }
 0xc25   : > { %v6321_v61 = vld [vmem:[%s7289_s13 + $0x288] sm:$0xff]  }
 0xc26   : > { %5728 = vmatpush3.bf16.msra.mxu1 %v6292_v62  ;;  %5750 = vmatpush3.bf16.msra.mxu0 %v6293_v63  ;;  %v6322_v62 = vld [vmem:[%s7289_s13 + $0x250] sm:$0xff]  }
 0xc27   : > { %5729 = vmatprep.subr.bf16.mxu1 %v6294_v3  ;;  %5751 = vmatprep.subr.bf16.mxu0 %v6295_v46  ;;  %v6323_v63 = vld [vmem:[%s7289_s13 + $0x2d0] sm:$0xff]  }
 0xc28   : > { %v6324_v3 = vld [vmem:[%s7289_s13 + $0x210] sm:$0xff]  }
 0xc29   : > { %v6325_v46 = vld [vmem:[%s7289_s13 + $0x290] sm:$0xff]  }
 0xc2a   : > { %5730 = vmatpush3.bf16.msra.mxu1 %v6296_v6  ;;  %5752 = vmatpush3.bf16.msra.mxu0 %v6297_v5  ;;  %v6326_v6 = vld [vmem:[%s7289_s13 + $0x258] sm:$0xff]  }
 0xc2b   : > { %5731 = vmatprep.subr.bf16.mxu1 %v6298_v0  ;;  %5753 = vmatprep.subr.bf16.mxu0 %v6299_v7  ;;  %v6327_v5 = vld [vmem:[%s7289_s13 + $0x2d8] sm:$0xff]  }
 0xc2c   : > { %v6328_v0 = vld [vmem:[%s7289_s13 + $0x218] sm:$0xff]  }
 0xc2d   : > { %v6329_v7 = vld [vmem:[%s7289_s13 + $0x298] sm:$0xff]  }
 0xc2e   : > { %5732 = vmatpush3.bf16.msra.mxu1 %v6300_v8  ;;  %5754 = vmatpush3.bf16.msra.mxu0 %v6301_v9  ;;  %v6330_v8 = vld [vmem:[%s7289_s13 + $0x260] sm:$0xff]  }
 0xc2f   : > { %5733 = vmatprep.subr.bf16.mxu1 %v6302_v10  ;;  %5755 = vmatprep.subr.bf16.mxu0 %v6303_v11  ;;  %v6331_v9 = vld [vmem:[%s7289_s13 + $0x2e0] sm:$0xff]  }
 0xc30   : > { %v6332_v10 = vld [vmem:[%s7289_s13 + $0x220] sm:$0xff]  }
 0xc31   : > { %v6333_v11 = vld [vmem:[%s7289_s13 + $0x2a0] sm:$0xff]  }
 0xc32   : > { %5734 = vmatpush3.bf16.msra.mxu1 %v6304_v14  ;;  %5756 = vmatpush3.bf16.msra.mxu0 %v6305_v15  ;;  %v6334_v14 = vld [vmem:[%s7289_s13 + $0x268] sm:$0xff]  }
 0xc33   : > { %5735 = vmatprep.subr.bf16.mxu1 %v6306_v19  ;;  %5757 = vmatprep.subr.bf16.mxu0 %v6307_v20  ;;  %v6335_v15 = vld [vmem:[%s7289_s13 + $0x2e8] sm:$0xff]  }
 0xc34   : > { %v3272_v31 = vpop.f32.mrb[48].mxu1  ;;  %v3313_v32 = vpop.f32.mrb[36].mxu0  ;;  %v6336_v19 = vld [vmem:[%s7289_s13 + $0x228] sm:$0xff]  }
 0xc35   : > { %v3273_v33 = vadd.f32 %v3272_v31, %v2455_v21  ;;  %v3314_v34 = vadd.f32 %v3313_v32, %v2463_v38  ;;  %v3274_v35 = vpop.f32.mrb[49].mxu1  ;;  %v3315_v36 = vpop.f32.mrb[37].mxu0  ;;  %v6337_v20 = vld [vmem:[%s7289_s13 + $0x2a8] sm:$0xff]   ;;  %v7805_v21 = vld [vmem:[%s7275_s15 + $0x8] sm:$0xff]  ;;  %v6338_v38 = vld [vmem:[%s7289_s13 + $0x270] sm:$0xff]  }
 0xc36   : > { %v3275_v37 = vadd.f32 %v3274_v35, %v2459_v23  ;;  %v3316_v40 = vadd.f32 %v3315_v36, %v2467_v24  ;;  %v3276_v41 = vpop.f32.mrb[50].mxu1  ;;  %v3317_v26 = vpop.f32.mrb[38].mxu0  ;;  %5736 = vmatpush3.bf16.msra.mxu1 %v6308_v25  ;;  %5758 = vmatpush3.bf16.msra.mxu0 %v6309_v28  ;;  %v6339_v23 = vld [vmem:[%s7289_s13 + $0x2f0] sm:$0xff]   ;;  %v2471_v24 = vrot.slane %v7805_v21, %v7341_v4  ;;  %v6342_v32 = vld [vmem:[%s7289_s13 + $0x278] sm:$0xff]  }
 0xc37   : > { %v3488_v44 = vmax.f32 %v3273_v33, 0.0  ;;  %v3490_v47 = vmax.f32 %v3314_v34, 0.0  ;;  %v3277_v48 = vpop.f32.mrb[51].mxu1  ;;  %v3318_v49 = vpop.f32.mrb[39].mxu0  ;;  %5737 = vmatprep.subr.bf16.mxu1 %v6310_v29  ;;  %5759 = vmatprep.subr.bf16.mxu0 %v6311_v30  ;;  %v2479_v25 = vrot.slane %v7805_v21, %v7361_v16  ;;  %v2475_v28 = vrot.slane %v7805_v21, %v7337_v2  ;;  %v6340_v30 = vld [vmem:[%s7289_s13 + $0x230] sm:$0xff]   ;;  %v6343_v4 = vld [vmem:[%s7289_s13 + $0x2f8] sm:$0xff]  }
 0xc38   : > { %v3489_v51 = vmax.f32 %v3275_v37, 0.0  ;;  %v3491_v52 = vmax.f32 %v3316_v40, 0.0  ;;  %v2483_v29 = vrot.slane %v7805_v21, %v2450_v27  ;;  %v6341_v31 = vld [vmem:[%s7289_s13 + $0x2b0] sm:$0xff]   ;;  %v6344_v26 = vld [vmem:[%s7289_s13 + $0x238] sm:$0xff]   ;;  %v6346_v49 = vld [vmem:[%s7289_s13 + $0x340] sm:$0xff]  }
 0xc39   : > { %v3504_v56 = vpack.c.bf16 %v3488_v44, %v3488_v44  ;;  %v3506_v57 = vpack.c.bf16 %v3490_v47, %v3490_v47 }
 0xc3a   : > { %v3505_v53 = vpack.c.bf16 %v3489_v51, %v3489_v51  ;;  %v3507_v39 = vpack.c.bf16 %v3491_v52, %v3491_v52  ;;  %5738 = vmatpush3.bf16.msra.mxu1 %v6312_v22  ;;  %5760 = vmatpush3.bf16.msra.mxu0 %v6313_v43  ;;  %v6345_v22 = vld [vmem:[%s7289_s13 + $0x2b8] sm:$0xff]  }
 0xc3b   : > { %5767 = vmatprep.subr.bf16.mxu1 %v6314_v42  ;;  %5789 = vmatprep.subr.bf16.mxu0 %v6315_v50  ;;  %v6347_v42 = vld [vmem:[%s7289_s13 + $0x3c0] sm:$0xff]  }
 0xc3c   : > { %4659 = vmatprep.mubr.bf16.mxu1 %v3505_v53  ;;  %4699 = vmatprep.mubr.bf16.mxu0 %v3507_v39  ;;  %v6348_v39 = vld [vmem:[%s7289_s13 + $0x300] sm:$0xff]  }
 0xc3d   : > { %4660 = vmatmul.mubr.bf16.vlgmr.msra.gmra.mrb[64].mxu1 %v3504_v56  ;;  %4700 = vmatmul.mubr.bf16.vlgmr.msra.gmra.mrb[52].mxu0 %v3506_v57  ;;  %v6350_v57 = vld [vmem:[%s7289_s13 + $0x348] sm:$0xff]  }
 0xc3e   : > { %5768 = vmatpush3.bf16.msra.mxu1 %v6316_v54  ;;  %5790 = vmatpush3.bf16.msra.mxu0 %v6317_v55  ;;  %v6349_v54 = vld [vmem:[%s7289_s13 + $0x380] sm:$0xff]  }
 0xc3f   : > { %5769 = vmatprep.subr.bf16.mxu1 %v6318_v58  ;;  %5791 = vmatprep.subr.bf16.mxu0 %v6319_v59  ;;  %v6351_v58 = vld [vmem:[%s7289_s13 + $0x3c8] sm:$0xff]  }
 0xc40   : > { %v6352_v59 = vld [vmem:[%s7289_s13 + $0x308] sm:$0xff]  }
 0xc42   : > { %5770 = vmatpush3.bf16.msra.mxu1 %v6320_v60  ;;  %5792 = vmatpush3.bf16.msra.mxu0 %v6321_v61  ;;  %v6353_v60 = vld [vmem:[%s7289_s13 + $0x388] sm:$0xff]   ;;  %v6354_v61 = vld [vmem:[%s7289_s13 + $0x350] sm:$0xff]  }
 0xc43   : > { %5771 = vmatprep.subr.bf16.mxu1 %v6322_v62  ;;  %5793 = vmatprep.subr.bf16.mxu0 %v6323_v63  ;;  %v6355_v62 = vld [vmem:[%s7289_s13 + $0x3d0] sm:$0xff]  }
 0xc44   : > { %v6356_v63 = vld [vmem:[%s7289_s13 + $0x310] sm:$0xff]  }
 0xc46   : > { %5772 = vmatpush3.bf16.msra.mxu1 %v6324_v3  ;;  %5794 = vmatpush3.bf16.msra.mxu0 %v6325_v46  ;;  %v6357_v3 = vld [vmem:[%s7289_s13 + $0x390] sm:$0xff]   ;;  %v6358_v46 = vld [vmem:[%s7289_s13 + $0x358] sm:$0xff]  }
 0xc47   : > { %5773 = vmatprep.subr.bf16.mxu1 %v6326_v6  ;;  %5795 = vmatprep.subr.bf16.mxu0 %v6327_v5  ;;  %v6359_v6 = vld [vmem:[%s7289_s13 + $0x3d8] sm:$0xff]  }
 0xc48   : > { %v6360_v5 = vld [vmem:[%s7289_s13 + $0x318] sm:$0xff]  }
 0xc4a   : > { %5774 = vmatpush3.bf16.msra.mxu1 %v6328_v0  ;;  %5796 = vmatpush3.bf16.msra.mxu0 %v6329_v7  ;;  %v6361_v0 = vld [vmem:[%s7289_s13 + $0x398] sm:$0xff]   ;;  %v6362_v7 = vld [vmem:[%s7289_s13 + $0x360] sm:$0xff]  }
 0xc4b   : > { %5775 = vmatprep.subr.bf16.mxu1 %v6330_v8  ;;  %5797 = vmatprep.subr.bf16.mxu0 %v6331_v9  ;;  %v6363_v8 = vld [vmem:[%s7289_s13 + $0x3e0] sm:$0xff]  }
 0xc4c   : > { %v6364_v9 = vld [vmem:[%s7289_s13 + $0x320] sm:$0xff]  }
 0xc4e   : > { %5776 = vmatpush3.bf16.msra.mxu1 %v6332_v10  ;;  %5798 = vmatpush3.bf16.msra.mxu0 %v6333_v11  ;;  %v6365_v10 = vld [vmem:[%s7289_s13 + $0x3a0] sm:$0xff]   ;;  %v6366_v11 = vld [vmem:[%s7289_s13 + $0x368] sm:$0xff]  }
 0xc4f   : > { %5777 = vmatprep.subr.bf16.mxu1 %v6334_v14  ;;  %5799 = vmatprep.subr.bf16.mxu0 %v6335_v15  ;;  %v6367_v14 = vld [vmem:[%s7289_s13 + $0x3e8] sm:$0xff]  }
 0xc50   : > { %v6368_v15 = vld [vmem:[%s7289_s13 + $0x328] sm:$0xff]  }
 0xc52   : > { %5778 = vmatpush3.bf16.msra.mxu1 %v6336_v19  ;;  %5800 = vmatpush3.bf16.msra.mxu0 %v6337_v20  ;;  %v6369_v19 = vld [vmem:[%s7289_s13 + $0x3a8] sm:$0xff]   ;;  %v6370_v20 = vld [vmem:[%s7289_s13 + $0x370] sm:$0xff]  }
 0xc53   : > { %5779 = vmatprep.subr.bf16.mxu1 %v6338_v38  ;;  %5801 = vmatprep.subr.bf16.mxu0 %v6339_v23  ;;  %v6371_v38 = vld [vmem:[%s7289_s13 + $0x3f0] sm:$0xff]   ;;  %v2487_v23 = vrot.slane %v7805_v21, %v2454_v12  ;;  %v6374_v12 = vld [vmem:[%s7289_s13 + $0x378] sm:$0xff]  }
 0xc54   : > { %v3354_v33 = vpop.f32.mrb[52].mxu1  ;;  %v3395_v34 = vpop.f32.mrb[40].mxu0 }
 0xc55   : > { %v3355_v16 = vadd.f32 %v3354_v33, %v2471_v24  ;;  %v3396_v35 = vadd.f32 %v3395_v34, %v2479_v25  ;;  %v3356_v36 = vpop.f32.mrb[53].mxu1  ;;  %v3397_v37 = vpop.f32.mrb[41].mxu0  ;;  %v2495_v24 = vrot.slane %v7805_v21, %v2462_v13  ;;  %v2491_v25 = vrot.slane %v7805_v21, %v2458_v17 }
 0xc56   : > { %v3357_v2 = vadd.f32 %v3356_v36, %v2475_v28  ;;  %v3398_v40 = vadd.f32 %v3397_v37, %v2483_v29  ;;  %v3358_v41 = vpop.f32.mrb[54].mxu1  ;;  %v3399_v27 = vpop.f32.mrb[42].mxu0  ;;  %5780 = vmatpush3.bf16.msra.mxu1 %v6340_v30  ;;  %5802 = vmatpush3.bf16.msra.mxu0 %v6341_v31  ;;  %v2499_v28 = vrot.slane %v7805_v21, %v2466_v18  ;;  %v6372_v29 = vld [vmem:[%s7289_s13 + $0x330] sm:$0xff]   ;;  %v6375_v31 = vld [vmem:[%s7289_s13 + $0x3f8] sm:$0xff]  }
 0xc57   : > { %v3492_v43 = vmax.f32 %v3355_v16, 0.0  ;;  %v3494_v44 = vmax.f32 %v3396_v35, 0.0  ;;  %v3359_v47 = vpop.f32.mrb[55].mxu1  ;;  %v3400_v48 = vpop.f32.mrb[43].mxu0  ;;  %5781 = vmatprep.subr.bf16.mxu1 %v6342_v32  ;;  %5803 = vmatprep.subr.bf16.mxu0 %v6343_v4  ;;  %v6373_v30 = vld [vmem:[%s7289_s13 + $0x3b0] sm:$0xff]   ;;  %v6376_v18 = vld [vmem:[%s7289_s13 + $0x338] sm:$0xff]  }
 0xc58   : > { %v3493_v50 = vmax.f32 %v3357_v2, 0.0  ;;  %v3495_v51 = vmax.f32 %v3398_v40, 0.0  ;;  %v6377_v21 = vld [vmem:[%s7289_s13 + $0x3b8] sm:$0xff]  }
 0xc59   : > { %v3508_v55 = vpack.c.bf16 %v3492_v43, %v3492_v43  ;;  %v3510_v56 = vpack.c.bf16 %v3494_v44, %v3494_v44 }
 0xc5a   : > { %v3509_v52 = vpack.c.bf16 %v3493_v50, %v3493_v50  ;;  %v3511_v53 = vpack.c.bf16 %v3495_v51, %v3495_v51  ;;  %5782 = vmatpush3.bf16.msra.mxu1 %v6344_v26  ;;  %5804 = vmatpush3.bf16.msra.mxu0 %v6345_v22 }
 0xc5b   : > { %5811 = vmatprep.subr.bf16.mxu1 %v6346_v49  ;;  %5833 = vmatprep.subr.bf16.mxu0 %v6347_v42  ;;  %v5486_v42 = vld [vmem:[%s860_s16] ss:$0 sm:$0xff] }
 0xc5c   : > { %4739 = vmatprep.mubr.bf16.mxu1 %v3509_v52  ;;  %4779 = vmatprep.mubr.bf16.mxu0 %v3511_v53 }
 0xc5d   : > { %4740 = vmatmul.mubr.bf16.vlgmr.msra.gmra.mrb[68].mxu1 %v3508_v55  ;;  %4780 = vmatmul.mubr.bf16.vlgmr.msra.gmra.mrb[56].mxu0 %v3510_v56 }
 0xc5e   : > { %5812 = vmatpush3.bf16.msra.mxu1 %v6348_v39  ;;  %5834 = vmatpush3.bf16.msra.mxu0 %v6349_v54 }
 0xc5f   : > { %5813 = vmatprep.subr.bf16.mxu1 %v6350_v57  ;;  %5835 = vmatprep.subr.bf16.mxu0 %v6351_v58 }
 0xc62   : > { %5814 = vmatpush3.bf16.msra.mxu1 %v6352_v59  ;;  %5836 = vmatpush3.bf16.msra.mxu0 %v6353_v60 }
 0xc63   : > { %5815 = vmatprep.subr.bf16.mxu1 %v6354_v61  ;;  %5837 = vmatprep.subr.bf16.mxu0 %v6355_v62 }
 0xc66   : > { %5816 = vmatpush3.bf16.msra.mxu1 %v6356_v63  ;;  %5838 = vmatpush3.bf16.msra.mxu0 %v6357_v3 }
 0xc67   : > { %5817 = vmatprep.subr.bf16.mxu1 %v6358_v46  ;;  %5839 = vmatprep.subr.bf16.mxu0 %v6359_v6 }
 0xc6a   : > { %5818 = vmatpush3.bf16.msra.mxu1 %v6360_v5  ;;  %5840 = vmatpush3.bf16.msra.mxu0 %v6361_v0 }
 0xc6b   : > { %5819 = vmatprep.subr.bf16.mxu1 %v6362_v7  ;;  %5841 = vmatprep.subr.bf16.mxu0 %v6363_v8 }
 0xc6e   : > { %5820 = vmatpush3.bf16.msra.mxu1 %v6364_v9  ;;  %5842 = vmatpush3.bf16.msra.mxu0 %v6365_v10 }
 0xc6f   : > { %5821 = vmatprep.subr.bf16.mxu1 %v6366_v11  ;;  %5843 = vmatprep.subr.bf16.mxu0 %v6367_v14 }
 0xc72   : > { %5822 = vmatpush3.bf16.msra.mxu1 %v6368_v15  ;;  %5844 = vmatpush3.bf16.msra.mxu0 %v6369_v19 }
 0xc73   : > { %5823 = vmatprep.subr.bf16.mxu1 %v6370_v20  ;;  %5845 = vmatprep.subr.bf16.mxu0 %v6371_v38 }
 0xc74   : > { %v3436_v32 = vpop.f32.mrb[56].mxu1  ;;  %v3477_v13 = vpop.f32.mrb[44].mxu0 }
 0xc75   : > { %v3437_v4 = vadd.f32 %v3436_v32, %v2487_v23  ;;  %v3478_v33 = vadd.f32 %v3477_v13, %v2495_v24  ;;  %v3438_v34 = vpop.f32.mrb[57].mxu1  ;;  %v3479_v16 = vpop.f32.mrb[45].mxu0 }
 0xc76   : > { %v3439_v35 = vadd.f32 %v3438_v34, %v2491_v25  ;;  %v3480_v17 = vadd.f32 %v3479_v16, %v2499_v28  ;;  %v3440_v36 = vpop.f32.mrb[58].mxu1  ;;  %v3481_v1 = vpop.f32.mrb[46].mxu0  ;;  %5824 = vmatpush3.bf16.msra.mxu1 %v6372_v29  ;;  %5846 = vmatpush3.bf16.msra.mxu0 %v6373_v30 }
 0xc77   : > { %v3496_v37 = vmax.f32 %v3437_v4, 0.0  ;;  %v3498_v2 = vmax.f32 %v3478_v33, 0.0  ;;  %v3441_v40 = vpop.f32.mrb[59].mxu1  ;;  %v3482_v41 = vpop.f32.mrb[47].mxu0  ;;  %5825 = vmatprep.subr.bf16.mxu1 %v6374_v12  ;;  %5847 = vmatprep.subr.bf16.mxu0 %v6375_v31 }
 0xc78   : > { %v3497_v27 = vmax.f32 %v3439_v35, 0.0  ;;  %v3499_v26 = vmax.f32 %v3480_v17, 0.0 }
 0xc79   : > { %v3512_v44 = vpack.c.bf16 %v3496_v37, %v3496_v37  ;;  %v3514_v47 = vpack.c.bf16 %v3498_v2, %v3498_v2 }
 0xc7a   : > { %v3513_v22 = vpack.c.bf16 %v3497_v27, %v3497_v27  ;;  %v3515_v43 = vpack.c.bf16 %v3499_v26, %v3499_v26  ;;  %5826 = vmatpush3.bf16.msra.mxu1 %v6376_v18  ;;  %5848 = vmatpush3.bf16.msra.mxu0 %v6377_v21  ;;  %v5615_v26 = vld [vmem:[%s863_s17] ss:$0 sm:$0xff] }
 0xc7c   : > { %4819 = vmatprep.mubr.bf16.mxu1 %v3513_v22  ;;  %4859 = vmatprep.mubr.bf16.mxu0 %v3515_v43 }
 0xc7d   : > { %4820 = vmatmul.mubr.bf16.vlgmr.msra.gmra.mrb[72].mxu1 %v3512_v44  ;;  %4860 = vmatmul.mubr.bf16.vlgmr.msra.gmra.mrb[60].mxu0 %v3514_v47  ;;  %v4900_v47 = vld [vmem:[%s8097_s2] sm:$0xff] (!%p5617_p3) }
 0xcf0   : > { %v5695_v48 = vpop.f32.mrb[60].mxu1  ;;  %v5717_v49 = vpop.f32.mrb[48].mxu0 }
 0xcf1   : > { %v5696_v50 = vpop.f32.mrb[61].mxu1  ;;  %v5718_v51 = vpop.f32.mrb[49].mxu0 }
 0xcf2   : > { %v5697_v52 = vadd.f32 %v5696_v50, %v5695_v48  ;;  %v5719_v53 = vadd.f32 %v5718_v51, %v5717_v49  ;;  %v5698_v39 = vpop.f32.mrb[62].mxu1  ;;  %v5720_v54 = vpop.f32.mrb[50].mxu0  ;;  %v4901_v48 = vld [vmem:[%s8097_s2 + $0x8] sm:$0xff] (!%p5617_p3)  ;;  %v4902_v49 = vld [vmem:[%s8097_s2 + $0x10] sm:$0xff] (!%p5617_p3)  ;;  %v4903_v51 = vld [vmem:[%s8097_s2 + $0x18] sm:$0xff] (!%p5617_p3) }
 0xcf3   : > { %v5699_v55 = vpop.f32.mrb[63].mxu1  ;;  %v5721_v56 = vpop.f32.mrb[51].mxu0  ;;  %v6052_v50 = vpack.c.bf16 (!%p5617_p3), %v4901_v48, %v4900_v47  ;;  %v4904_v39 = vld [vmem:[%s8097_s2 + $0x20] sm:$0xff] (!%p5617_p3)  ;;  %v4905_v54 = vld [vmem:[%s8097_s2 + $0x28] sm:$0xff] (!%p5617_p3) }
 0xcf4   : > { %v4582_v57 = vadd.f32 %v5697_v52, %v5486_v42  ;;  %v6792_v42 = vmov (!%p5617_p3), 0.0|0.0   ;;  %v6794_v52 = vmov (!%p5617_p3), 0.0   ;;  %v6058_v55 = vpack.c.bf16 (!%p5617_p3), %v4905_v54, %v4904_v39  ;;  %v4906_v56 = vld [vmem:[%s8097_s2 + $0x30] sm:$0xff] (!%p5617_p3) }
 0xcf5   : > { %6051 = vmatprep.subr.bf16.mxu0 (!%p5617_p3), %v6792_v42  ;;  %6048 = vmatprep.mubr.msk.f32.mxu0 (!%p5617_p3), %vm6793_vm14, %v6794_v52 }
 0xcf6   : > { %v4622_v58 = vadd.f32 %v5719_v53, %v4582_v57  ;;  %6053 = vmatpush3.bf16.msra.mxu0 (!%p5617_p3), %v6052_v50  ;;  %v6055_v53 = vpack.c.bf16 (!%p5617_p3), %v4903_v51, %v4902_v49  ;;  %v4907_v57 = vld [vmem:[%s8097_s2 + $0x38] sm:$0xff] (!%p5617_p3) }
 0xcf7   : > { %6054 = vmatprep.subr.bf16.mxu0 (!%p5617_p3), %v6792_v42 }
 0xcfa   : > { %6056 = vmatpush3.bf16.msra.mxu0 (!%p5617_p3), %v6055_v53 }
 0xcfb   : > { %6057 = vmatprep.subr.bf16.mxu0 (!%p5617_p3), %v6792_v42 }
 0xcfe   : > { %6059 = vmatpush3.bf16.msra.mxu0 (!%p5617_p3), %v6058_v55 }
 0xcff   : > { %6060 = vmatprep.subr.bf16.mxu0 (!%p5617_p3), %v6792_v42 }
 0xd10   : > { %v5739_v59 = vpop.f32.mrb[64].mxu1  ;;  %v5761_v60 = vpop.f32.mrb[52].mxu0 }
 0xd11   : > { %v5740_v61 = vpop.f32.mrb[65].mxu1  ;;  %v5762_v62 = vpop.f32.mrb[53].mxu0 }
 0xd12   : > { %v5741_v63 = vadd.f32 %v5740_v61, %v5739_v59  ;;  %v5763_v3 = vadd.f32 %v5762_v62, %v5761_v60  ;;  %v5742_v46 = vpop.f32.mrb[66].mxu1  ;;  %v5764_v6 = vpop.f32.mrb[54].mxu0  ;;  %v4908_v59 = vld [vmem:[%s8097_s2 + $0x40] sm:$0xff] (!%p5617_p3)  ;;  %v4909_v60 = vld [vmem:[%s8097_s2 + $0x48] sm:$0xff] (!%p5617_p3)  ;;  %v4910_v62 = vld [vmem:[%s8097_s2 + $0x50] sm:$0xff] (!%p5617_p3) }
 0xd13   : > { %v5743_v5 = vpop.f32.mrb[67].mxu1  ;;  %v5765_v0 = vpop.f32.mrb[55].mxu0  ;;  %v6064_v61 = vpack.c.bf16 (!%p5617_p3), %v4909_v60, %v4908_v59  ;;  %v4912_v46 = vld [vmem:[%s8097_s2 + $0x60] sm:$0xff] (!%p5617_p3)  ;;  %v4913_v6 = vld [vmem:[%s8097_s2 + $0x68] sm:$0xff] (!%p5617_p3) }
 0xd14   : > { %v4662_v7 = vadd.f32 %v5741_v63, %v4622_v58  ;;  %v6061_v58 = vpack.c.bf16 (!%p5617_p3), %v4907_v57, %v4906_v56  ;;  %v4911_v63 = vld [vmem:[%s8097_s2 + $0x58] sm:$0xff] (!%p5617_p3)  ;;  %v6070_v5 = vpack.c.bf16 (!%p5617_p3), %v4913_v6, %v4912_v46  ;;  %v4914_v0 = vld [vmem:[%s8097_s2 + $0x70] sm:$0xff] (!%p5617_p3) }
 0xd16   : > { %v4702_v8 = vadd.f32 %v5763_v3, %v4662_v7  ;;  %6062 = vmatpush3.bf16.msra.mxu0 (!%p5617_p3), %v6061_v58  ;;  %v6067_v3 = vpack.c.bf16 (!%p5617_p3), %v4911_v63, %v4910_v62  ;;  %v4915_v7 = vld [vmem:[%s8097_s2 + $0x78] sm:$0xff] (!%p5617_p3) }
 0xd17   : > { %6063 = vmatprep.subr.bf16.mxu0 (!%p5617_p3), %v6792_v42 }
 0xd1a   : > { %6065 = vmatpush3.bf16.msra.mxu0 (!%p5617_p3), %v6064_v61 }
 0xd1b   : > { %6066 = vmatprep.subr.bf16.mxu0 (!%p5617_p3), %v6792_v42 }
 0xd1e   : > { %6068 = vmatpush3.bf16.msra.mxu0 (!%p5617_p3), %v6067_v3 }
 0xd1f   : > { %6069 = vmatprep.subr.bf16.mxu0 (!%p5617_p3), %v6792_v42 }
 0xd22   : > { %6071 = vmatpush3.bf16.msra.mxu0 (!%p5617_p3), %v6070_v5 }
 0xd23   : > { %6072 = vmatprep.subr.bf16.mxu0 (!%p5617_p3), %v6792_v42 }
 0xd30   : > { %v5783_v9 = vpop.f32.mrb[68].mxu1  ;;  %v5805_v10 = vpop.f32.mrb[56].mxu0 }
 0xd31   : > { %v5784_v11 = vpop.f32.mrb[69].mxu1  ;;  %v5806_v14 = vpop.f32.mrb[57].mxu0 }
 0xd32   : > { %v5785_v15 = vadd.f32 %v5784_v11, %v5783_v9  ;;  %v5807_v19 = vadd.f32 %v5806_v14, %v5805_v10  ;;  %v5786_v20 = vpop.f32.mrb[70].mxu1  ;;  %v5808_v38 = vpop.f32.mrb[58].mxu0  ;;  %v6795_v9 = vmov (!%p5617_p3), 0   ;;  %v5618_v10 = vld [vmem:[#allocation3] ss:$0 sm:$0xff] (!%p5617_p3) }
 0xd33   : > { %v5787_v23 = vpop.f32.mrb[71].mxu1  ;;  %v5809_v24 = vpop.f32.mrb[59].mxu0  ;;  %6415 = vset.pattern.permute.xlu0 (!%p5617_p3), %v6795_v9 }
 0xd34   : > { %v4742_v25 = vadd.f32 %v5785_v15, %v4702_v8  ;;  %v6073_v8 = vpack.c.bf16 (!%p5617_p3), %v4915_v7, %v4914_v0 }
 0xd36   : > { %v4782_v28 = vadd.f32 %v5807_v19, %v4742_v25  ;;  %6074 = vmatpush3.bf16.msra.mxu0 (!%p5617_p3), %v6073_v8 }
 0xd50   : > { %v5827_v29 = vpop.f32.mrb[72].mxu1  ;;  %v5849_v30 = vpop.f32.mrb[60].mxu0 }
 0xd51   : > { %v5828_v12 = vpop.f32.mrb[73].mxu1  ;;  %v5850_v31 = vpop.f32.mrb[61].mxu0 }
 0xd52   : > { %v5829_v32 = vadd.f32 %v5828_v12, %v5827_v29  ;;  %v5851_v13 = vadd.f32 %v5850_v31, %v5849_v30  ;;  %v5830_v4 = vpop.f32.mrb[74].mxu1  ;;  %v5852_v33 = vpop.f32.mrb[62].mxu0 }
 0xd53   : > { %v5831_v34 = vpop.f32.mrb[75].mxu1  ;;  %v5853_v16 = vpop.f32.mrb[63].mxu0 }
 0xd54   : > { %v4822_v35 = vadd.f32 %v5829_v32, %v4782_v28 }
 0xd56   : > { %v4862_v17 = vadd.f32 %v5851_v13, %v4822_v35 }
 0xd58   : > { %v4867_v36 = vadd.f32 %v4862_v17, %v7579_v45  ;;  %v5616_v45 = vld [vmem:[%s866_s20] ss:$0 sm:$0xff] }
 0xd5a   : > { %4870 = vadd.xlane.f32.xlu0 %v4867_v36 }
 0xde7   : > { %v4871_v1 = vpop.xlane.xlu0 %4870 }
 0xde8   : > { %v4872_v18 = vmul.f32 0.0078125, %v4871_v1 }
 0xdea   : > { %v4873_v21 = vsub.f32 %v4867_v36, %v4872_v18 }
 0xdec   : > { %v4874_v37 = vmul.f32 %v4873_v21, %v4873_v21 }
 0xdee   : > { %4875 = vadd.xlane.f32.xlu1 %v4874_v37 }
 0xe7b   : > { %v4876_v2 = vpop.xlane.xlu1 %4875 }
 0xe7c   : > { %v4877_v40 = vmul.f32 0.0078125, %v4876_v2 }
 0xe7e   : > { %v4878_v41 = vadd.f32 1e-05, %v4877_v40 }
 0xe80   : > { %6412 = vrsqrt.f32 %v4878_v41 }
 0xe8a   : > { %v6413_v27 = vpop.eup %6412 }
 0xe8b   : > { %v4880_v22 = vmul.f32 %v6413_v27, %v4873_v21  ;;  %4899 = sbr.rel (%p5617_p3) target bundleno = 4282 (0x10ba), region = 132 }
 0xe8d   : > { %v4887_v43 = vmul.f32 %v5615_v26, %v4880_v22 }
 0xe8f   : > { %v7884_v44 = vadd.f32 %v5616_v45, %v4887_v43 }
 0xe91   : > { %4895 = vst [vmem:[#allocation2] sm:$0xff] %v7884_v44  ;;  %6049 = vmatmul.mubr.f32.vlgmr.msra.gmra.mrb[0].mxu0 (!%p5617_p3), %v7884_v44 }
 0xf64   : > { %v4989_v11 = vpop.f32.mrb[0].mxu0 }
 0xf65   : > { %v4990_v14 = vadd.f32 %v5618_v10, %v4989_v11  ;;  %v6050_v15 = vpop.f32.mrb[1].mxu0 }
 0xf67   : > { %v4994_v19 = vsel %vm4993_vm15, %v4990_v14, -inf }
 0xf68   : > { %v4995_v20 = vrot.slane %v4994_v19, 4 }
 0xf6a   : > { %v4996_v38 = vmax.f32 %v4994_v19, %v4995_v20 }
 0xf6c   : > { %v4997_v23 = vrot.slane %v4996_v38, 2 }
 0xf6e   : > { %v4998_v24 = vmax.f32 %v4996_v38, %v4997_v23 }
 0xf70   : > { %v4999_v25 = vrot.slane %v4998_v24, 1 }
 0xf72   : > { %v5000_v28 = vmax.f32 %v4998_v24, %v4999_v25 }
 0xf74   : > { %v5001_v29 = vsub.f32 %v4990_v14, %v5000_v28 }
 0xf76   : > { %v5002_v30 = vmul.f32 1.442695, %v5001_v29 }
 0xf78   : > { %6416 = vpow2.f32 %v5002_v30 }
 0xf82   : > { %v6417_v12 = vpop.eup %6416 }
 0xf83   : > { %v5004_v31 = vsel %vm4993_vm15, %v6417_v12, 0.0 }
 0xf84   : > { %v5005_v32 = vrot.slane %v5004_v31, 4 }
 0xf86   : > { %v5006_v13 = vadd.f32 %v5005_v32, %v5004_v31 }
 0xf88   : > { %v5007_v4 = vrot.slane %v5006_v13, 2 }
 0xf8a   : > { %v5008_v33 = vadd.f32 %v5007_v4, %v5006_v13 }
 0xf8c   : > { %v5009_v34 = vrot.slane %v5008_v33, 1 }
 0xf8e   : > { %v5010_v16 = vadd.f32 %v5009_v34, %v5008_v33 }
 0xf90   : > { %6418 = vrcp.f32 %v5010_v16 }
 0xf9a   : > { %v6419_v35 = vpop.eup %6418 }
 0xf9b   : > { %v5012_v17 = vmul.f32 %v6419_v35, %v6417_v12 }
 0xf9d   : > { %5015 = vperm.xlu0 %6415, %v5012_v17  }
0x101c   : > { %v5016_v36 = vpop.permute.xlu0 %5015 }
0x101d   : > { %v5018_v1 = vmul.f32 %v5016_v36, %v7884_v44 }
0x101f   : > { %v5019_v18 = vrot.slane %v5018_v1, 4 }
0x1021   : > { %v5020_v21 = vadd.f32 %v5019_v18, %v5018_v1 }
0x1023   : > { %v5021_v37 = vrot.slane %v5020_v21, 2 }
0x1025   : > { %v5022_v2 = vadd.f32 %v5021_v37, %v5020_v21 }
0x1027   : > { %v5023_v40 = vrot.slane %v5022_v2, 1 }
0x1029   : > { %v5024_v41 = vadd.f32 %v5023_v40, %v5022_v2 }
0x102b   : > { %5025 = vadd.xlane.f32.xlu0 %v5024_v41 }
0x10b8   : > { %v5026_v27 = vpop.xlane.xlu0 %5025 }
0x10b9   : > { %5028 = vst.msk [vmem:[#allocation19] sm:$0x1] %vm5027_vm0, %v5026_v27 }
0x10ba PF: > { %s8098_s6 = sld [smem:[#allocation28_spill]]  ;;  %s6796_s28 = smov [#allocation19]  }
0x10bb   : > { %s5036_s20 = sshll.u32 %s6796_s28, 4  ;;  %s5037_s20 = int_to_ptr.vmem [resolvable:$true] %s5036_s20 }
0x10bc   : > { %s6684_s7 = scalar_lea.vmem %s5037_s20, 16  ;;  %s6690_s5 = scalar_lea.vmem %s5037_s20, 32 }
0x10bd   : > { %p6685_p12 = scmp.ne.s32.totalorder %s5037_s20, %s6684_s7  ;;  %p6691_p11 = scmp.lt.s32.totalorder %s5037_s20, %s5037_s20 }
0x10be   : > { %p6692_p10 = scmp.lt.s32.totalorder %s6690_s5, %s6684_s7 }
0x10c0   : > { %p6145_p2 = scmp.eq.s32.totalorder %s8098_s6, 1  ;;  %p6693_p0 = por %p6692_p10, %p6691_p11 }
0x10c2   : > { %p6686_p8 = pnand %p6685_p12, %p6145_p2 }
0x10c4   : > { %p6687_p7 = pneg %p6686_p8 }
0x10c6   : > { %p6694_p13 = pnand %p6693_p0, %p6687_p7 }
0x10c8   : > { %6697 = shalt.err (!%p6694_p13)
}
0x10c9   : > { %s8099_s3 = sld [smem:[#allocation46_spill]] }
0x10cf   : > { %s6698_s24 = scalar_lea.hbm %s8099_s3, 16 }
0x10d0   : > { %p6699_p5 = scmp.ne.s32.totalorder %s8099_s3, %s6698_s24  ;;  %p6704_p1 = scmp.lt.u32.totalorder %s6698_s24, %s8099_s3 }
0x10d2   : > { %p6700_p9 = pnand %p6699_p5, %p6145_p2 }
0x10d4   : > { %p6701_p4 = pneg %p6700_p9 }
0x10d6   : > { %p6706_p6 = pnand %p6704_p1, %p6701_p4 }
0x10d8   : > { %6709 = shalt.err (!%p6706_p6)
}
0x10d9   : > { %6106 = dma.vmem_to_hbm [thread:$0]  (%p6145_p2), %s5037_s20, 16, %s8099_s3, [#allocation6]  }
0x10da   : > { %6747 = dma.done.wait (%p6145_p2), [#allocation6], 16  }
0x10db   : > { %6749 = vsyncadd (%p6145_p2), [#allocation6], 4294967280 }
0x10dc PF: > { %s8100_s29 = sld [smem:[#allocation29_spill]]  ;;  %s8101_s26 = sld [smem:[#allocation26_spill]] }
0x10dd   : > { %s8102_s27 = sld [smem:[#allocation27_spill]]  ;;  %s8103_s28 = sld [smem:[#allocation30_spill]] }
0x10e2   : > { %p38_p3 = scmp.ge.s32.totalorder %s8100_s29, 4  }
0x10e4   :  { %40 = sbr.rel (!%p38_p3) target bundleno = 26 (0x1a), region = 223 }
0x10eb   :  { %5049 = vsyncpa [#allocation5], 1 }
0x10ec   :  { %5051 = vsyncpa [#allocation5 + $0x1], 1 }
0x10ed   :  { %5052 = vsyncpa [#allocation8], 1 }
0x10ee   :  { %5053 = vsyncpa [#allocation11], 1 }
0x10ef   :  { %5055 = vsyncpa [#allocation11 + $0x1], 1 }
0x10f0   :  { %5056 = vsyncpa [#allocation14], 1 }
0x10f1   :  { %5058 = vsyncpa [#allocation14 + $0x1], 1 }
0x10f2   :  { %5059 = vsyncpa [#allocation17], 1 }
0x10f3   :  { %5061 = vsyncpa [#allocation17 + $0x1], 1 }
0x10f4   :  { %5062 = vsyncpa [#allocation6], 1 }
0x10f5   :  { %5064 = vsyncpa [#allocation6 + $0x1], 1 }

</bundles_post_ra>
